<compile_context>
chip_gen: v7x
topology: tpu7x:2x2x1
jax: 0.10.0
libtpu: 0.0.40
codegen_flags: <defaults>
</compile_context>

<pallas_src>
import functools

import jax
import jax.numpy as jnp
import numpy as np
from jax.experimental import pallas as pl
from jax.experimental.pallas import tpu as pltpu


# ---------------------------------------------------------------------------
# Pallas kernels
# ---------------------------------------------------------------------------

def _mm_bias_kernel(a_ref, b_ref, bias_ref, o_ref, acc_ref, *, relu):
    """o = maybe_relu(a @ b + bias); grid = (Mt, Nt, Kt), k innermost ('arbitrary')."""
    k = pl.program_id(2)

    @pl.when(k == 0)
    def _():
        acc_ref[...] = jnp.zeros_like(acc_ref)

    acc_ref[...] += jnp.dot(a_ref[...], b_ref[...],
                            preferred_element_type=jnp.float32)

    @pl.when(k == pl.num_programs(2) - 1)
    def _():
        out = acc_ref[...] + bias_ref[...]
        if relu:
            out = jnp.maximum(out, 0.0)
        o_ref[...] = out.astype(o_ref.dtype)


def _mm_bias_res_kernel(a_ref, b_ref, bias_ref, r_ref, o_ref, acc_ref, *, relu):
    """o = maybe_relu(a @ b + bias + residual); same grid structure as above."""
    k = pl.program_id(2)

    @pl.when(k == 0)
    def _():
        acc_ref[...] = jnp.zeros_like(acc_ref)

    acc_ref[...] += jnp.dot(a_ref[...], b_ref[...],
                            preferred_element_type=jnp.float32)

    @pl.when(k == pl.num_programs(2) - 1)
    def _():
        out = acc_ref[...] + bias_ref[...] + r_ref[...].astype(jnp.float32)
        if relu:
            out = jnp.maximum(out, 0.0)
        o_ref[...] = out.astype(o_ref.dtype)


def _maxpool_kernel(p_ref, o_ref):
    """3x3/stride-2 max pool from phase-decomposed padded input.

    p_ref: (4, 1, Hh, Wh, C)  -- the 4 stride-2 phases of the padded image
    o_ref: (1, Ho, Wo, C)
    Tap (di, dj) of the 3x3 window maps to phase (di%2, dj%2) at offset (di//2, dj//2).
    """
    ho, wo = o_ref.shape[1], o_ref.shape[2]
    acc = None
    for di in range(3):
        for dj in range(3):
            ph = (di % 2) * 2 + (dj % 2)
            oi, oj = di // 2, dj // 2
            v = p_ref[ph, 0, oi:oi + ho, oj:oj + wo, :]
            acc = v if acc is None else jnp.maximum(acc, v)
    o_ref[0] = acc


# ---------------------------------------------------------------------------
# Pallas wrappers
# ---------------------------------------------------------------------------

def _round_up(x, m):
    return (x + m - 1) // m * m


def _pad2(x, rows, cols):
    r, c = x.shape
    if r == rows and c == cols:
        return x
    return jnp.pad(x, ((0, rows - r), (0, cols - c)))


def _pick_divisor(dim, candidates):
    for c in candidates:
        if dim % c == 0:
            return c
    return dim


def fused_matmul(a, w, bias, residual=None, relu=True):
    """maybe_relu(a @ w + bias [+ residual]) with bf16 MXU operands, f32 accumulate.

    a: (M, K) activations (any float dtype, cast to bf16)
    w: (K, N) BN-scale-folded weights (cast to bf16)
    bias: (N,) f32 folded BN bias
    residual: optional (M, N), added in f32 in the epilogue before ReLU
    returns (M, N) bf16
    """
    M, K = a.shape
    Kw, N = w.shape
    assert K == Kw

    # Adaptive tiles: large (feeds the 256x256 MXU on v6e/v7x), clamped for small
    # layers so we don't pad excessively.  Multiples of 16 (bf16 sublane) / 128 (lane).
    if M >= 256:
        Mp, tm = _round_up(M, 256), 256
    else:
        Mp = _round_up(M, 16)
        tm = Mp
    if N >= 256:
        Np, tn = _round_up(N, 256), 256
    else:
        Np = _round_up(N, 128)
        tn = Np
    Kp = _round_up(K, 128)
    tk = _pick_divisor(Kp, (512, 384, 256, 128))

    a_p = _pad2(a.astype(jnp.bfloat16), Mp, Kp)
    w_p = _pad2(w.astype(jnp.bfloat16), Kp, Np)
    b_p = _pad2(bias.reshape(1, N).astype(jnp.float32), 1, Np)

    grid = (Mp // tm, Np // tn, Kp // tk)

    in_specs = [
        pl.BlockSpec((tm, tk), lambda i, j, k: (i, k)),
        pl.BlockSpec((tk, tn), lambda i, j, k: (k, j)),
        pl.BlockSpec((1, tn), lambda i, j, k: (0, j)),
    ]
    if residual is None:
        kernel = functools.partial(_mm_bias_kernel, relu=relu)
        args = (a_p, w_p, b_p)
    else:
        r_p = _pad2(residual.astype(jnp.bfloat16), Mp, Np)
        kernel = functools.partial(_mm_bias_res_kernel, relu=relu)
        in_specs = in_specs + [pl.BlockSpec((tm, tn), lambda i, j, k: (i, j))]
        args = (a_p, w_p, b_p, r_p)

    out = pl.pallas_call(
        kernel,
        out_shape=jax.ShapeDtypeStruct((Mp, Np), jnp.bfloat16),
        grid_spec=pltpu.PrefetchScalarGridSpec(
            num_scalar_prefetch=0,
            grid=grid,
            in_specs=in_specs,
            out_specs=pl.BlockSpec((tm, tn), lambda i, j, k: (i, j)),
            scratch_shapes=[pltpu.VMEM((tm, tn), jnp.float32)],
        ),
        compiler_params=pltpu.CompilerParams(
            dimension_semantics=("parallel", "parallel", "arbitrary"),
            vmem_limit_bytes=32 * 1024 * 1024),
    )(*args)
    return out[:M, :N]


def _im2col(x, kh, kw, stride, pad):
    """x: (N, H, W, C) NHWC -> patches (N, Ho, Wo, kh*kw, C), K ordered (kh, kw, C)."""
    n, h, w, c = x.shape
    xp = jnp.pad(x, ((0, 0), (pad, pad), (pad, pad), (0, 0)))
    ho = (h + 2 * pad - kh) // stride + 1
    wo = (w + 2 * pad - kw) // stride + 1
    cols = []
    for di in range(kh):
        for dj in range(kw):
            cols.append(xp[:, di:di + stride * ho:stride,
                           dj:dj + stride * wo:stride, :])
    patches = jnp.stack(cols, axis=3)  # (N, Ho, Wo, kh*kw, C)
    return patches, (n, ho, wo)


def conv_bn(x, w, bn, stride, pad, relu=True, residual=None):
    """PyTorch-equivalent Conv2d(bias=False) + BatchNorm(eval) [+ residual] [+ ReLU]."""
    cout, cin, kh, kw = w.shape
    gamma, beta, mean, var = bn
    scale = gamma * jax.lax.rsqrt(var + 1e-5)
    bias = beta - mean * scale
    # Fold BN scale into the weight columns (removes a per-element multiply + an
    # extra input stream from every Pallas matmul call).
    w_mat = jnp.transpose(w, (2, 3, 1, 0)).reshape(kh * kw * cin, cout) * scale[None, :]

    if kh == 1 and kw == 1 and pad == 0:
        # 1x1 conv: no im2col needed at all.
        xs = x[:, ::stride, ::stride, :]
        n, ho, wo, _ = xs.shape
        a = xs.reshape(n * ho * wo, cin)
    else:
        # TODO(synk): 3x3/7x7 convs still materialize im2col patches (kh*kw x A-operand
        # HBM traffic); an implicit-GEMM variant reading shifted windows of the padded
        # NHWC activation directly in the kernel would remove that.
        patches, (n, ho, wo) = _im2col(x, kh, kw, stride, pad)
        a = patches.reshape(n * ho * wo, kh * kw * cin)

    res_flat = residual.reshape(-1, cout) if residual is not None else None
    out = fused_matmul(a, w_mat, bias, residual=res_flat, relu=relu)
    return out.reshape(n, ho, wo, cout)


def maxpool_3x3_s2(x):
    """nn.MaxPool2d(kernel_size=3, stride=2, padding=1) on NHWC, via Pallas.

    Phase-decomposes the (-inf)-padded input into its 4 stride-2 phases and grids the
    kernel over the batch, so only ~one padded image sits in VMEM per grid step.
    """
    n, h, w, c = x.shape
    neg = jnp.finfo(x.dtype).min
    ho = (h - 1) // 2 + 1
    wo = (w - 1) // 2 + 1
    hp = _round_up(h + 2, 2)
    wp = _round_up(w + 2, 2)
    xp = jnp.pad(x, ((0, 0), (1, hp - h - 1), (1, wp - w - 1), (0, 0)),
                 constant_values=neg)
    # phases[pi*2+pj] = xp[:, pi::2, pj::2, :]  -> (4, N, Hh, Wh, C)
    phases = jnp.stack([xp[:, pi::2, pj::2, :]
                        for pi in range(2) for pj in range(2)], axis=0)
    hh, wh = hp // 2, wp // 2

    out = pl.pallas_call(
        _maxpool_kernel,
        out_shape=jax.ShapeDtypeStruct((n, ho, wo, c), x.dtype),
        grid=(n,),
        in_specs=[pl.BlockSpec((4, 1, hh, wh, c), lambda b: (0, b, 0, 0, 0))],
        out_specs=pl.BlockSpec((1, ho, wo, c), lambda b: (b, 0, 0, 0)),
        compiler_params=pltpu.CompilerParams(
            dimension_semantics=("parallel",)),
    )(phases)
    return out


# ---------------------------------------------------------------------------
# ResNet-50 (stem + layer1 + layer2) forward — the Shared_module_fr forward
# ---------------------------------------------------------------------------

def bottleneck(x, p, stride):
    identity = x
    out = conv_bn(x, p['conv1'], p['bn1'], stride=1, pad=0, relu=True)
    out = conv_bn(out, p['conv2'], p['bn2'], stride=stride, pad=1, relu=True)
    if 'down_conv' in p:
        identity = conv_bn(x, p['down_conv'], p['down_bn'],
                           stride=stride, pad=0, relu=False)
    # conv3 + BN + residual add + ReLU fused in one Pallas matmul kernel.
    out = conv_bn(out, p['conv3'], p['bn3'], stride=1, pad=0,
                  relu=True, residual=identity)
    return out


def shared_module_fr_forward(x_nchw, params):
    # layout: input NCHW (PyTorch), internally NHWC bf16 activations, output NCHW f32.
    x = jnp.transpose(x_nchw, (0, 2, 3, 1)).astype(jnp.bfloat16)
    x = conv_bn(x, params['conv1'], params['bn1'], stride=2, pad=3, relu=True)
    x = maxpool_3x3_s2(x)
    for blk in params['layer1']:
        x = bottleneck(x, blk, stride=1)
    for i, blk in enumerate(params['layer2']):
        x = bottleneck(x, blk, stride=2 if i == 0 else 1)
    return jnp.transpose(x, (0, 3, 1, 2)).astype(jnp.float32)


# ---------------------------------------------------------------------------
# Deterministic parameter initialization (resnet50 stem + layer1 + layer2 shapes)
# ---------------------------------------------------------------------------

def _init_conv(key, cout, cin, kh, kw):
    fan_in = cin * kh * kw
    return (jax.random.normal(key, (cout, cin, kh, kw), jnp.float32)
            * (1.0 / np.sqrt(fan_in)))


def _init_bn(key, c):
    k1, k2, k3, k4 = jax.random.split(key, 4)
    gamma = 1.0 + 0.1 * jax.random.normal(k1, (c,), jnp.float32)
    beta = 0.1 * jax.random.normal(k2, (c,), jnp.float32)
    mean = 0.1 * jax.random.normal(k3, (c,), jnp.float32)
    var = jax.random.uniform(k4, (c,), jnp.float32, minval=0.5, maxval=1.5)
    return (gamma, beta, mean, var)


def init_params(key):
    keys = iter(jax.random.split(key, 200))
    conv = lambda co, ci, kh, kw: _init_conv(next(keys), co, ci, kh, kw)
    bn = lambda c: _init_bn(next(keys), c)

    params = {'conv1': conv(64, 3, 7, 7), 'bn1': bn(64)}

    def make_layer(inplanes, planes, blocks):
        out_planes = planes * 4
        layer = []
        for b in range(blocks):
            cin = inplanes if b == 0 else out_planes
            p = {
                'conv1': conv(planes, cin, 1, 1), 'bn1': bn(planes),
                'conv2': conv(planes, planes, 3, 3), 'bn2': bn(planes),
                'conv3': conv(out_planes, planes, 1, 1), 'bn3': bn(out_planes),
            }
            if b == 0:
                p['down_conv'] = conv(out_planes, cin, 1, 1)
                p['down_bn'] = bn(out_planes)
            layer.append(p)
        return layer

    params['layer1'] = make_layer(64, 64, 3)     # stride 1
    params['layer2'] = make_layer(256, 128, 4)   # stride 2 in first block
    return params


# TODO(synk): the efficientnetv2_{s,m,l} / shufflenetv2 branches of Shared_module_fr
# call an entire torchvision backbone (`x = self.model_sh_fr(x)`) and are not
# translated; this script implements the explicit resnet50 forward path.

if __name__ == "__main__":
    key = jax.random.PRNGKey(0)
    params = init_params(key)
    x = jax.random.normal(jax.random.PRNGKey(0), (2, 3, 32, 32), jnp.float32)

    fwd = jax.jit(lambda inp: shared_module_fr_forward(inp, params))
    out = fwd(x)
    out = jax.block_until_ready(out)

    assert out.shape == (2, 512, 4, 4), out.shape
    assert jnp.all(jnp.isfinite(out))
    print("KERNEL_OK")
</pallas_src>

<mosaic_0001>
module attributes {stable_mosaic.version = 11 : i64} {
  func.func @_mm_bias_kernel(%arg0: i32, %arg1: i32, %arg2: i32, %arg3: memref<256x256xbf16, #tpu.memory_space<vmem>>, %arg4: memref<256x128xbf16, #tpu.memory_space<vmem>>, %arg5: memref<1x128xf32, #tpu.memory_space<vmem>>, %arg6: memref<256x128xbf16, #tpu.memory_space<vmem>>, %arg7: memref<256x128xf32, #tpu.memory_space<vmem>>) attributes {dimension_semantics = [#tpu.dimension_semantics<parallel>, #tpu.dimension_semantics<parallel>, #tpu.dimension_semantics<arbitrary>], iteration_bounds = array<i64: 2, 1, 1>, scalar_prefetch = 0 : i64, scratch_operands = 1 : i64, tpu.core_type = #tpu.core_type<tc>, window_params = [{transform_indices = @transform_0, window_bounds = array<i64: 256, 256>}, {transform_indices = @transform_1, window_bounds = array<i64: 256, 128>}, {transform_indices = @transform_2, window_bounds = array<i64: 1, 128>}, {transform_indices = @transform_3, window_bounds = array<i64: 256, 128>}]} {
    %c0_i32 = arith.constant 0 : i32
    %0 = arith.cmpi eq, %arg2, %c0_i32 : i32
    %1 = arith.extui %0 : i1 to i32
    %c0_i32_0 = arith.constant 0 : i32
    %2 = arith.cmpi ne, %1, %c0_i32_0 : i32
    scf.if %2 {
      %cst_10 = arith.constant 0.000000e+00 : f32
      %12 = vector.broadcast %cst_10 : f32 to vector<256x128xf32>
      %c0_11 = arith.constant 0 : index
      %c0_12 = arith.constant 0 : index
      %13 = vector.load %arg7[%c0_11, %c0_12] : memref<256x128xf32, #tpu.memory_space<vmem>>, vector<256x128xf32>
      tpu.vector_store %arg7[%c0_11, %c0_12], %12 {strides = array<i32>} : memref<256x128xf32, #tpu.memory_space<vmem>>, vector<256x128xf32>,
    } else {
    }
    %c0 = arith.constant 0 : index
    %c0_1 = arith.constant 0 : index
    %3 = vector.load %arg7[%c0, %c0_1] : memref<256x128xf32, #tpu.memory_space<vmem>>, vector<256x128xf32>
    %c0_2 = arith.constant 0 : index
    %c0_3 = arith.constant 0 : index
    %4 = vector.load %arg3[%c0_2, %c0_3] : memref<256x256xbf16, #tpu.memory_space<vmem>>, vector<256x256xbf16>
    %c0_4 = arith.constant 0 : index
    %c0_5 = arith.constant 0 : index
    %5 = vector.load %arg4[%c0_4, %c0_5] : memref<256x128xbf16, #tpu.memory_space<vmem>>, vector<256x128xbf16>
    %cst = arith.constant dense<0.000000e+00> : vector<256x128xf32>
    %6 = tpu.matmul %4, %5, %cst {dimension_numbers = #tpu.dot_dimension_numbers<[1], [0], [0], [1], [0, 0, 1, 1], [], []>} : vector<256x256xbf16>, vector<256x128xbf16>, vector<256x128xf32> -> vector<256x128xf32>
    %7 = arith.addf %3, %6 : vector<256x128xf32>
    %c0_6 = arith.constant 0 : index
    %c0_7 = arith.constant 0 : index
    %8 = vector.load %arg7[%c0_6, %c0_7] : memref<256x128xf32, #tpu.memory_space<vmem>>, vector<256x128xf32>
    tpu.vector_store %arg7[%c0_6, %c0_7], %7 {strides = array<i32>} : memref<256x128xf32, #tpu.memory_space<vmem>>, vector<256x128xf32>,
    %c0_i32_8 = arith.constant 0 : i32
    %9 = arith.cmpi eq, %arg2, %c0_i32_8 : i32
    %10 = arith.extui %9 : i1 to i32
    %c0_i32_9 = arith.constant 0 : i32
    %11 = arith.cmpi ne, %10, %c0_i32_9 : i32
    scf.if %11 {
      %c0_10 = arith.constant 0 : index
      %c0_11 = arith.constant 0 : index
      %12 = vector.load %arg7[%c0_10, %c0_11] : memref<256x128xf32, #tpu.memory_space<vmem>>, vector<256x128xf32>
      %c0_12 = arith.constant 0 : index
      %c0_13 = arith.constant 0 : index
      %13 = vector.load %arg5[%c0_12, %c0_13] : memref<1x128xf32, #tpu.memory_space<vmem>>, vector<1x128xf32>
      %14 = vector.broadcast %13 : vector<1x128xf32> to vector<256x128xf32>
      %15 = arith.addf %12, %14 : vector<256x128xf32>
      %cst_14 = arith.constant 0.000000e+00 : f32
      %16 = vector.broadcast %cst_14 : f32 to vector<256x128xf32>
      %17 = arith.maximumf %15, %16 : vector<256x128xf32>
      %18 = arith.truncf %17 : vector<256x128xf32> to vector<256x128xbf16>
      %c0_15 = arith.constant 0 : index
      %c0_16 = arith.constant 0 : index
      %19 = vector.load %arg6[%c0_15, %c0_16] : memref<256x128xbf16, #tpu.memory_space<vmem>>, vector<256x128xbf16>
      tpu.vector_store %arg6[%c0_15, %c0_16], %18 {strides = array<i32>} : memref<256x128xbf16, #tpu.memory_space<vmem>>, vector<256x128xbf16>,
    } else {
    }
    return
  }
  func.func @transform_0(%arg0: i32, %arg1: i32, %arg2: i32) -> (i32, i32) {
    %c0_i32 = arith.constant 0 : i32
    return %arg0, %arg2 : i32, i32
  }
  func.func @transform_1(%arg0: i32, %arg1: i32, %arg2: i32) -> (i32, i32) {
    %c0_i32 = arith.constant 0 : i32
    return %arg2, %arg1 : i32, i32
  }
  func.func @transform_2(%arg0: i32, %arg1: i32, %arg2: i32) -> (i32, i32) {
    %c0_i32 = arith.constant 0 : i32
    %c0_i32_0 = arith.constant 0 : i32
    return %c0_i32, %arg1 : i32, i32
  }
  func.func @transform_3(%arg0: i32, %arg1: i32, %arg2: i32) -> (i32, i32) {
    %c0_i32 = arith.constant 0 : i32
    return %arg0, %arg1 : i32, i32
  }
}

module attributes {stable_mosaic.version = 11 : i64} {
  func.func @_maxpool_kernel(%arg0: i32, %arg1: memref<4x1x9x9x64xbf16, #tpu.memory_space<vmem>>, %arg2: memref<1x8x8x64xbf16, #tpu.memory_space<vmem>>) attributes {dimension_semantics = [#tpu.dimension_semantics<parallel>], iteration_bounds = array<i64: 2>, scalar_prefetch = 0 : i64, scratch_operands = 0 : i64, tpu.core_type = #tpu.core_type<tc>, window_params = [{transform_indices = @transform_0, window_bounds = array<i64: 4, 1, 9, 9, 64>}, {transform_indices = @transform_1, window_bounds = array<i64: 1, 8, 8, 64>}]} {
    %c0 = arith.constant 0 : index
    %c0_0 = arith.constant 0 : index
    %c0_1 = arith.constant 0 : index
    %c0_2 = arith.constant 0 : index
    %c0_3 = arith.constant 0 : index
    %0 = vector.load %arg1[%c0, %c0_0, %c0_1, %c0_2, %c0_3] : memref<4x1x9x9x64xbf16, #tpu.memory_space<vmem>>, vector<1x1x8x8x64xbf16>
    %1 = vector.shape_cast %0 : vector<1x1x8x8x64xbf16> to vector<8x8x64xbf16>
    %c1 = arith.constant 1 : index
    %c0_4 = arith.constant 0 : index
    %c0_5 = arith.constant 0 : index
    %c0_6 = arith.constant 0 : index
    %c0_7 = arith.constant 0 : index
    %2 = vector.load %arg1[%c1, %c0_4, %c0_5, %c0_6, %c0_7] : memref<4x1x9x9x64xbf16, #tpu.memory_space<vmem>>, vector<1x1x8x8x64xbf16>
    %3 = vector.shape_cast %2 : vector<1x1x8x8x64xbf16> to vector<8x8x64xbf16>
    %4 = arith.maximumf %1, %3 : vector<8x8x64xbf16>
    %c0_8 = arith.constant 0 : index
    %c0_9 = arith.constant 0 : index
    %c0_10 = arith.constant 0 : index
    %c1_11 = arith.constant 1 : index
    %c0_12 = arith.constant 0 : index
    %5 = vector.load %arg1[%c0_8, %c0_9, %c0_10, %c1_11, %c0_12] : memref<4x1x9x9x64xbf16, #tpu.memory_space<vmem>>, vector<1x1x8x8x64xbf16>
    %6 = vector.shape_cast %5 : vector<1x1x8x8x64xbf16> to vector<8x8x64xbf16>
    %7 = arith.maximumf %4, %6 : vector<8x8x64xbf16>
    %c2 = arith.constant 2 : index
    %c0_13 = arith.constant 0 : index
    %c0_14 = arith.constant 0 : index
    %c0_15 = arith.constant 0 : index
    %c0_16 = arith.constant 0 : index
    %8 = vector.load %arg1[%c2, %c0_13, %c0_14, %c0_15, %c0_16] : memref<4x1x9x9x64xbf16, #tpu.memory_space<vmem>>, vector<1x1x8x8x64xbf16>
    %9 = vector.shape_cast %8 : vector<1x1x8x8x64xbf16> to vector<8x8x64xbf16>
    %10 = arith.maximumf %7, %9 : vector<8x8x64xbf16>
    %c3 = arith.constant 3 : index
    %c0_17 = arith.constant 0 : index
    %c0_18 = arith.constant 0 : index
    %c0_19 = arith.constant 0 : index
    %c0_20 = arith.constant 0 : index
    %11 = vector.load %arg1[%c3, %c0_17, %c0_18, %c0_19, %c0_20] : memref<4x1x9x9x64xbf16, #tpu.memory_space<vmem>>, vector<1x1x8x8x64xbf16>
    %12 = vector.shape_cast %11 : vector<1x1x8x8x64xbf16> to vector<8x8x64xbf16>
    %13 = arith.maximumf %10, %12 : vector<8x8x64xbf16>
    %c2_21 = arith.constant 2 : index
    %c0_22 = arith.constant 0 : index
    %c0_23 = arith.constant 0 : index
    %c1_24 = arith.constant 1 : index
    %c0_25 = arith.constant 0 : index
    %14 = vector.load %arg1[%c2_21, %c0_22, %c0_23, %c1_24, %c0_25] : memref<4x1x9x9x64xbf16, #tpu.memory_space<vmem>>, vector<1x1x8x8x64xbf16>
    %15 = vector.shape_cast %14 : vector<1x1x8x8x64xbf16> to vector<8x8x64xbf16>
    %16 = arith.maximumf %13, %15 : vector<8x8x64xbf16>
    %c0_26 = arith.constant 0 : index
    %c0_27 = arith.constant 0 : index
    %c1_28 = arith.constant 1 : index
    %c0_29 = arith.constant 0 : index
    %c0_30 = arith.constant 0 : index
    %17 = vector.load %arg1[%c0_26, %c0_27, %c1_28, %c0_29, %c0_30] : memref<4x1x9x9x64xbf16, #tpu.memory_space<vmem>>, vector<1x1x8x8x64xbf16>
    %18 = vector.shape_cast %17 : vector<1x1x8x8x64xbf16> to vector<8x8x64xbf16>
    %19 = arith.maximumf %16, %18 : vector<8x8x64xbf16>
    %c1_31 = arith.constant 1 : index
    %c0_32 = arith.constant 0 : index
    %c1_33 = arith.constant 1 : index
    %c0_34 = arith.constant 0 : index
    %c0_35 = arith.constant 0 : index
    %20 = vector.load %arg1[%c1_31, %c0_32, %c1_33, %c0_34, %c0_35] : memref<4x1x9x9x64xbf16, #tpu.memory_space<vmem>>, vector<1x1x8x8x64xbf16>
    %21 = vector.shape_cast %20 : vector<1x1x8x8x64xbf16> to vector<8x8x64xbf16>
    %22 = arith.maximumf %19, %21 : vector<8x8x64xbf16>
    %c0_36 = arith.constant 0 : index
    %c0_37 = arith.constant 0 : index
    %c1_38 = arith.constant 1 : index
    %c1_39 = arith.constant 1 : index
    %c0_40 = arith.constant 0 : index
    %23 = vector.load %arg1[%c0_36, %c0_37, %c1_38, %c1_39, %c0_40] : memref<4x1x9x9x64xbf16, #tpu.memory_space<vmem>>, vector<1x1x8x8x64xbf16>
    %24 = vector.shape_cast %23 : vector<1x1x8x8x64xbf16> to vector<8x8x64xbf16>
    %25 = arith.maximumf %22, %24 : vector<8x8x64xbf16>
    %c0_41 = arith.constant 0 : index
    %c0_42 = arith.constant 0 : index
    %c0_43 = arith.constant 0 : index
    %c0_44 = arith.constant 0 : index
    %26 = vector.load %arg2[%c0_41, %c0_42, %c0_43, %c0_44] : memref<1x8x8x64xbf16, #tpu.memory_space<vmem>>, vector<1x8x8x64xbf16>
    %27 = vector.shape_cast %26 : vector<1x8x8x64xbf16> to vector<8x8x64xbf16>
    %28 = vector.shape_cast %25 : vector<8x8x64xbf16> to vector<1x8x8x64xbf16>
    tpu.vector_store %arg2[%c0_41, %c0_42, %c0_43, %c0_44], %28 {strides = array<i32>} : memref<1x8x8x64xbf16, #tpu.memory_space<vmem>>, vector<1x8x8x64xbf16>,
    return
  }
  func.func @transform_0(%arg0: i32) -> (i32, i32, i32, i32, i32) {
    %c0_i32 = arith.constant 0 : i32
    %c0_i32_0 = arith.constant 0 : i32
    %c0_i32_1 = arith.constant 0 : i32
    %c0_i32_2 = arith.constant 0 : i32
    %c0_i32_3 = arith.constant 0 : i32
    return %c0_i32, %arg0, %c0_i32_0, %c0_i32_1, %c0_i32_2 : i32, i32, i32, i32, i32
  }
  func.func @transform_1(%arg0: i32) -> (i32, i32, i32, i32) {
    %c0_i32 = arith.constant 0 : i32
    %c0_i32_0 = arith.constant 0 : i32
    %c0_i32_1 = arith.constant 0 : i32
    %c0_i32_2 = arith.constant 0 : i32
    return %arg0, %c0_i32, %c0_i32_0, %c0_i32_1 : i32, i32, i32, i32
  }
}

module attributes {stable_mosaic.version = 11 : i64} {
  func.func @_mm_bias_kernel(%arg0: i32, %arg1: i32, %arg2: i32, %arg3: memref<128x128xbf16, #tpu.memory_space<vmem>>, %arg4: memref<128x128xbf16, #tpu.memory_space<vmem>>, %arg5: memref<1x128xf32, #tpu.memory_space<vmem>>, %arg6: memref<128x128xbf16, #tpu.memory_space<vmem>>, %arg7: memref<128x128xf32, #tpu.memory_space<vmem>>) attributes {dimension_semantics = [#tpu.dimension_semantics<parallel>, #tpu.dimension_semantics<parallel>, #tpu.dimension_semantics<arbitrary>], iteration_bounds = array<i64: 1, 1, 1>, scalar_prefetch = 0 : i64, scratch_operands = 1 : i64, tpu.core_type = #tpu.core_type<tc>, window_params = [{transform_indices = @transform_0, window_bounds = array<i64: 128, 128>}, {transform_indices = @transform_1, window_bounds = array<i64: 128, 128>}, {transform_indices = @transform_2, window_bounds = array<i64: 1, 128>}, {transform_indices = @transform_3, window_bounds = array<i64: 128, 128>}]} {
    %c0_i32 = arith.constant 0 : i32
    %0 = arith.cmpi eq, %arg2, %c0_i32 : i32
    %1 = arith.extui %0 : i1 to i32
    %c0_i32_0 = arith.constant 0 : i32
    %2 = arith.cmpi ne, %1, %c0_i32_0 : i32
    scf.if %2 {
      %cst_10 = arith.constant 0.000000e+00 : f32
      %12 = vector.broadcast %cst_10 : f32 to vector<128x128xf32>
      %c0_11 = arith.constant 0 : index
      %c0_12 = arith.constant 0 : index
      %13 = vector.load %arg7[%c0_11, %c0_12] : memref<128x128xf32, #tpu.memory_space<vmem>>, vector<128x128xf32>
      tpu.vector_store %arg7[%c0_11, %c0_12], %12 {strides = array<i32>} : memref<128x128xf32, #tpu.memory_space<vmem>>, vector<128x128xf32>,
    } else {
    }
    %c0 = arith.constant 0 : index
    %c0_1 = arith.constant 0 : index
    %3 = vector.load %arg7[%c0, %c0_1] : memref<128x128xf32, #tpu.memory_space<vmem>>, vector<128x128xf32>
    %c0_2 = arith.constant 0 : index
    %c0_3 = arith.constant 0 : index
    %4 = vector.load %arg3[%c0_2, %c0_3] : memref<128x128xbf16, #tpu.memory_space<vmem>>, vector<128x128xbf16>
    %c0_4 = arith.constant 0 : index
    %c0_5 = arith.constant 0 : index
    %5 = vector.load %arg4[%c0_4, %c0_5] : memref<128x128xbf16, #tpu.memory_space<vmem>>, vector<128x128xbf16>
    %cst = arith.constant dense<0.000000e+00> : vector<128x128xf32>
    %6 = tpu.matmul %4, %5, %cst {dimension_numbers = #tpu.dot_dimension_numbers<[1], [0], [0], [1], [0, 0, 1, 1], [], []>} : vector<128x128xbf16>, vector<128x128xbf16>, vector<128x128xf32> -> vector<128x128xf32>
    %7 = arith.addf %3, %6 : vector<128x128xf32>
    %c0_6 = arith.constant 0 : index
    %c0_7 = arith.constant 0 : index
    %8 = vector.load %arg7[%c0_6, %c0_7] : memref<128x128xf32, #tpu.memory_space<vmem>>, vector<128x128xf32>
    tpu.vector_store %arg7[%c0_6, %c0_7], %7 {strides = array<i32>} : memref<128x128xf32, #tpu.memory_space<vmem>>, vector<128x128xf32>,
    %c0_i32_8 = arith.constant 0 : i32
    %9 = arith.cmpi eq, %arg2, %c0_i32_8 : i32
    %10 = arith.extui %9 : i1 to i32
    %c0_i32_9 = arith.constant 0 : i32
    %11 = arith.cmpi ne, %10, %c0_i32_9 : i32
    scf.if %11 {
      %c0_10 = arith.constant 0 : index
      %c0_11 = arith.constant 0 : index
      %12 = vector.load %arg7[%c0_10, %c0_11] : memref<128x128xf32, #tpu.memory_space<vmem>>, vector<128x128xf32>
      %c0_12 = arith.constant 0 : index
      %c0_13 = arith.constant 0 : index
      %13 = vector.load %arg5[%c0_12, %c0_13] : memref<1x128xf32, #tpu.memory_space<vmem>>, vector<1x128xf32>
      %14 = vector.broadcast %13 : vector<1x128xf32> to vector<128x128xf32>
      %15 = arith.addf %12, %14 : vector<128x128xf32>
      %cst_14 = arith.constant 0.000000e+00 : f32
      %16 = vector.broadcast %cst_14 : f32 to vector<128x128xf32>
      %17 = arith.maximumf %15, %16 : vector<128x128xf32>
      %18 = arith.truncf %17 : vector<128x128xf32> to vector<128x128xbf16>
      %c0_15 = arith.constant 0 : index
      %c0_16 = arith.constant 0 : index
      %19 = vector.load %arg6[%c0_15, %c0_16] : memref<128x128xbf16, #tpu.memory_space<vmem>>, vector<128x128xbf16>
      tpu.vector_store %arg6[%c0_15, %c0_16], %18 {strides = array<i32>} : memref<128x128xbf16, #tpu.memory_space<vmem>>, vector<128x128xbf16>,
    } else {
    }
    return
  }
  func.func @transform_0(%arg0: i32, %arg1: i32, %arg2: i32) -> (i32, i32) {
    %c0_i32 = arith.constant 0 : i32
    return %arg0, %arg2 : i32, i32
  }
  func.func @transform_1(%arg0: i32, %arg1: i32, %arg2: i32) -> (i32, i32) {
    %c0_i32 = arith.constant 0 : i32
    return %arg2, %arg1 : i32, i32
  }
  func.func @transform_2(%arg0: i32, %arg1: i32, %arg2: i32) -> (i32, i32) {
    %c0_i32 = arith.constant 0 : i32
    %c0_i32_0 = arith.constant 0 : i32
    return %c0_i32, %arg1 : i32, i32
  }
  func.func @transform_3(%arg0: i32, %arg1: i32, %arg2: i32) -> (i32, i32) {
    %c0_i32 = arith.constant 0 : i32
    return %arg0, %arg1 : i32, i32
  }
}

module attributes {stable_mosaic.version = 11 : i64} {
  func.func @_mm_bias_kernel(%arg0: i32, %arg1: i32, %arg2: i32, %arg3: memref<128x128xbf16, #tpu.memory_space<vmem>>, %arg4: memref<128x128xbf16, #tpu.memory_space<vmem>>, %arg5: memref<1x128xf32, #tpu.memory_space<vmem>>, %arg6: memref<128x128xbf16, #tpu.memory_space<vmem>>, %arg7: memref<128x128xf32, #tpu.memory_space<vmem>>) attributes {dimension_semantics = [#tpu.dimension_semantics<parallel>, #tpu.dimension_semantics<parallel>, #tpu.dimension_semantics<arbitrary>], iteration_bounds = array<i64: 1, 1, 5>, scalar_prefetch = 0 : i64, scratch_operands = 1 : i64, tpu.core_type = #tpu.core_type<tc>, window_params = [{transform_indices = @transform_0, window_bounds = array<i64: 128, 128>}, {transform_indices = @transform_1, window_bounds = array<i64: 128, 128>}, {transform_indices = @transform_2, window_bounds = array<i64: 1, 128>}, {transform_indices = @transform_3, window_bounds = array<i64: 128, 128>}]} {
    %c0_i32 = arith.constant 0 : i32
    %0 = arith.cmpi eq, %arg2, %c0_i32 : i32
    %1 = arith.extui %0 : i1 to i32
    %c0_i32_0 = arith.constant 0 : i32
    %2 = arith.cmpi ne, %1, %c0_i32_0 : i32
    scf.if %2 {
      %cst_9 = arith.constant 0.000000e+00 : f32
      %12 = vector.broadcast %cst_9 : f32 to vector<128x128xf32>
      %c0_10 = arith.constant 0 : index
      %c0_11 = arith.constant 0 : index
      %13 = vector.load %arg7[%c0_10, %c0_11] : memref<128x128xf32, #tpu.memory_space<vmem>>, vector<128x128xf32>
      tpu.vector_store %arg7[%c0_10, %c0_11], %12 {strides = array<i32>} : memref<128x128xf32, #tpu.memory_space<vmem>>, vector<128x128xf32>,
    } else {
    }
    %c0 = arith.constant 0 : index
    %c0_1 = arith.constant 0 : index
    %3 = vector.load %arg7[%c0, %c0_1] : memref<128x128xf32, #tpu.memory_space<vmem>>, vector<128x128xf32>
    %c0_2 = arith.constant 0 : index
    %c0_3 = arith.constant 0 : index
    %4 = vector.load %arg3[%c0_2, %c0_3] : memref<128x128xbf16, #tpu.memory_space<vmem>>, vector<128x128xbf16>
    %c0_4 = arith.constant 0 : index
    %c0_5 = arith.constant 0 : index
    %5 = vector.load %arg4[%c0_4, %c0_5] : memref<128x128xbf16, #tpu.memory_space<vmem>>, vector<128x128xbf16>
    %cst = arith.constant dense<0.000000e+00> : vector<128x128xf32>
    %6 = tpu.matmul %4, %5, %cst {dimension_numbers = #tpu.dot_dimension_numbers<[1], [0], [0], [1], [0, 0, 1, 1], [], []>} : vector<128x128xbf16>, vector<128x128xbf16>, vector<128x128xf32> -> vector<128x128xf32>
    %7 = arith.addf %3, %6 : vector<128x128xf32>
    %c0_6 = arith.constant 0 : index
    %c0_7 = arith.constant 0 : index
    %8 = vector.load %arg7[%c0_6, %c0_7] : memref<128x128xf32, #tpu.memory_space<vmem>>, vector<128x128xf32>
    tpu.vector_store %arg7[%c0_6, %c0_7], %7 {strides = array<i32>} : memref<128x128xf32, #tpu.memory_space<vmem>>, vector<128x128xf32>,
    %c4_i32 = arith.constant 4 : i32
    %9 = arith.cmpi eq, %arg2, %c4_i32 : i32
    %10 = arith.extui %9 : i1 to i32
    %c0_i32_8 = arith.constant 0 : i32
    %11 = arith.cmpi ne, %10, %c0_i32_8 : i32
    scf.if %11 {
      %c0_9 = arith.constant 0 : index
      %c0_10 = arith.constant 0 : index
      %12 = vector.load %arg7[%c0_9, %c0_10] : memref<128x128xf32, #tpu.memory_space<vmem>>, vector<128x128xf32>
      %c0_11 = arith.constant 0 : index
      %c0_12 = arith.constant 0 : index
      %13 = vector.load %arg5[%c0_11, %c0_12] : memref<1x128xf32, #tpu.memory_space<vmem>>, vector<1x128xf32>
      %14 = vector.broadcast %13 : vector<1x128xf32> to vector<128x128xf32>
      %15 = arith.addf %12, %14 : vector<128x128xf32>
      %cst_13 = arith.constant 0.000000e+00 : f32
      %16 = vector.broadcast %cst_13 : f32 to vector<128x128xf32>
      %17 = arith.maximumf %15, %16 : vector<128x128xf32>
      %18 = arith.truncf %17 : vector<128x128xf32> to vector<128x128xbf16>
      %c0_14 = arith.constant 0 : index
      %c0_15 = arith.constant 0 : index
      %19 = vector.load %arg6[%c0_14, %c0_15] : memref<128x128xbf16, #tpu.memory_space<vmem>>, vector<128x128xbf16>
      tpu.vector_store %arg6[%c0_14, %c0_15], %18 {strides = array<i32>} : memref<128x128xbf16, #tpu.memory_space<vmem>>, vector<128x128xbf16>,
    } else {
    }
    return
  }
  func.func @transform_0(%arg0: i32, %arg1: i32, %arg2: i32) -> (i32, i32) {
    %c0_i32 = arith.constant 0 : i32
    return %arg0, %arg2 : i32, i32
  }
  func.func @transform_1(%arg0: i32, %arg1: i32, %arg2: i32) -> (i32, i32) {
    %c0_i32 = arith.constant 0 : i32
    return %arg2, %arg1 : i32, i32
  }
  func.func @transform_2(%arg0: i32, %arg1: i32, %arg2: i32) -> (i32, i32) {
    %c0_i32 = arith.constant 0 : i32
    %c0_i32_0 = arith.constant 0 : i32
    return %c0_i32, %arg1 : i32, i32
  }
  func.func @transform_3(%arg0: i32, %arg1: i32, %arg2: i32) -> (i32, i32) {
    %c0_i32 = arith.constant 0 : i32
    return %arg0, %arg1 : i32, i32
  }
}

module attributes {stable_mosaic.version = 11 : i64} {
  func.func @_mm_bias_kernel(%arg0: i32, %arg1: i32, %arg2: i32, %arg3: memref<128x128xbf16, #tpu.memory_space<vmem>>, %arg4: memref<128x256xbf16, #tpu.memory_space<vmem>>, %arg5: memref<1x256xf32, #tpu.memory_space<vmem>>, %arg6: memref<128x256xbf16, #tpu.memory_space<vmem>>, %arg7: memref<128x256xf32, #tpu.memory_space<vmem>>) attributes {dimension_semantics = [#tpu.dimension_semantics<parallel>, #tpu.dimension_semantics<parallel>, #tpu.dimension_semantics<arbitrary>], iteration_bounds = array<i64: 1, 1, 1>, scalar_prefetch = 0 : i64, scratch_operands = 1 : i64, tpu.core_type = #tpu.core_type<tc>, window_params = [{transform_indices = @transform_0, window_bounds = array<i64: 128, 128>}, {transform_indices = @transform_1, window_bounds = array<i64: 128, 256>}, {transform_indices = @transform_2, window_bounds = array<i64: 1, 256>}, {transform_indices = @transform_3, window_bounds = array<i64: 128, 256>}]} {
    %c0_i32 = arith.constant 0 : i32
    %0 = arith.cmpi eq, %arg2, %c0_i32 : i32
    %1 = arith.extui %0 : i1 to i32
    %c0_i32_0 = arith.constant 0 : i32
    %2 = arith.cmpi ne, %1, %c0_i32_0 : i32
    scf.if %2 {
      %cst_10 = arith.constant 0.000000e+00 : f32
      %12 = vector.broadcast %cst_10 : f32 to vector<128x256xf32>
      %c0_11 = arith.constant 0 : index
      %c0_12 = arith.constant 0 : index
      %13 = vector.load %arg7[%c0_11, %c0_12] : memref<128x256xf32, #tpu.memory_space<vmem>>, vector<128x256xf32>
      tpu.vector_store %arg7[%c0_11, %c0_12], %12 {strides = array<i32>} : memref<128x256xf32, #tpu.memory_space<vmem>>, vector<128x256xf32>,
    } else {
    }
    %c0 = arith.constant 0 : index
    %c0_1 = arith.constant 0 : index
    %3 = vector.load %arg7[%c0, %c0_1] : memref<128x256xf32, #tpu.memory_space<vmem>>, vector<128x256xf32>
    %c0_2 = arith.constant 0 : index
    %c0_3 = arith.constant 0 : index
    %4 = vector.load %arg3[%c0_2, %c0_3] : memref<128x128xbf16, #tpu.memory_space<vmem>>, vector<128x128xbf16>
    %c0_4 = arith.constant 0 : index
    %c0_5 = arith.constant 0 : index
    %5 = vector.load %arg4[%c0_4, %c0_5] : memref<128x256xbf16, #tpu.memory_space<vmem>>, vector<128x256xbf16>
    %cst = arith.constant dense<0.000000e+00> : vector<128x256xf32>
    %6 = tpu.matmul %4, %5, %cst {dimension_numbers = #tpu.dot_dimension_numbers<[1], [0], [0], [1], [0, 0, 1, 1], [], []>} : vector<128x128xbf16>, vector<128x256xbf16>, vector<128x256xf32> -> vector<128x256xf32>
    %7 = arith.addf %3, %6 : vector<128x256xf32>
    %c0_6 = arith.constant 0 : index
    %c0_7 = arith.constant 0 : index
    %8 = vector.load %arg7[%c0_6, %c0_7] : memref<128x256xf32, #tpu.memory_space<vmem>>, vector<128x256xf32>
    tpu.vector_store %arg7[%c0_6, %c0_7], %7 {strides = array<i32>} : memref<128x256xf32, #tpu.memory_space<vmem>>, vector<128x256xf32>,
    %c0_i32_8 = arith.constant 0 : i32
    %9 = arith.cmpi eq, %arg2, %c0_i32_8 : i32
    %10 = arith.extui %9 : i1 to i32
    %c0_i32_9 = arith.constant 0 : i32
    %11 = arith.cmpi ne, %10, %c0_i32_9 : i32
    scf.if %11 {
      %c0_10 = arith.constant 0 : index
      %c0_11 = arith.constant 0 : index
      %12 = vector.load %arg7[%c0_10, %c0_11] : memref<128x256xf32, #tpu.memory_space<vmem>>, vector<128x256xf32>
      %c0_12 = arith.constant 0 : index
      %c0_13 = arith.constant 0 : index
      %13 = vector.load %arg5[%c0_12, %c0_13] : memref<1x256xf32, #tpu.memory_space<vmem>>, vector<1x256xf32>
      %14 = vector.broadcast %13 : vector<1x256xf32> to vector<128x256xf32>
      %15 = arith.addf %12, %14 : vector<128x256xf32>
      %16 = arith.truncf %15 : vector<128x256xf32> to vector<128x256xbf16>
      %c0_14 = arith.constant 0 : index
      %c0_15 = arith.constant 0 : index
      %17 = vector.load %arg6[%c0_14, %c0_15] : memref<128x256xbf16, #tpu.memory_space<vmem>>, vector<128x256xbf16>
      tpu.vector_store %arg6[%c0_14, %c0_15], %16 {strides = array<i32>} : memref<128x256xbf16, #tpu.memory_space<vmem>>, vector<128x256xbf16>,
    } else {
    }
    return
  }
  func.func @transform_0(%arg0: i32, %arg1: i32, %arg2: i32) -> (i32, i32) {
    %c0_i32 = arith.constant 0 : i32
    return %arg0, %arg2 : i32, i32
  }
  func.func @transform_1(%arg0: i32, %arg1: i32, %arg2: i32) -> (i32, i32) {
    %c0_i32 = arith.constant 0 : i32
    return %arg2, %arg1 : i32, i32
  }
  func.func @transform_2(%arg0: i32, %arg1: i32, %arg2: i32) -> (i32, i32) {
    %c0_i32 = arith.constant 0 : i32
    %c0_i32_0 = arith.constant 0 : i32
    return %c0_i32, %arg1 : i32, i32
  }
  func.func @transform_3(%arg0: i32, %arg1: i32, %arg2: i32) -> (i32, i32) {
    %c0_i32 = arith.constant 0 : i32
    return %arg0, %arg1 : i32, i32
  }
}

module attributes {stable_mosaic.version = 11 : i64} {
  func.func @_mm_bias_res_kernel(%arg0: i32, %arg1: i32, %arg2: i32, %arg3: memref<128x128xbf16, #tpu.memory_space<vmem>>, %arg4: memref<128x256xbf16, #tpu.memory_space<vmem>>, %arg5: memref<1x256xf32, #tpu.memory_space<vmem>>, %arg6: memref<128x256xbf16, #tpu.memory_space<vmem>>, %arg7: memref<128x256xbf16, #tpu.memory_space<vmem>>, %arg8: memref<128x256xf32, #tpu.memory_space<vmem>>) attributes {dimension_semantics = [#tpu.dimension_semantics<parallel>, #tpu.dimension_semantics<parallel>, #tpu.dimension_semantics<arbitrary>], iteration_bounds = array<i64: 1, 1, 1>, scalar_prefetch = 0 : i64, scratch_operands = 1 : i64, tpu.core_type = #tpu.core_type<tc>, window_params = [{transform_indices = @transform_0, window_bounds = array<i64: 128, 128>}, {transform_indices = @transform_1, window_bounds = array<i64: 128, 256>}, {transform_indices = @transform_2, window_bounds = array<i64: 1, 256>}, {transform_indices = @transform_3, window_bounds = array<i64: 128, 256>}, {transform_indices = @transform_4, window_bounds = array<i64: 128, 256>}]} {
    %c0_i32 = arith.constant 0 : i32
    %0 = arith.cmpi eq, %arg2, %c0_i32 : i32
    %1 = arith.extui %0 : i1 to i32
    %c0_i32_0 = arith.constant 0 : i32
    %2 = arith.cmpi ne, %1, %c0_i32_0 : i32
    scf.if %2 {
      %cst_10 = arith.constant 0.000000e+00 : f32
      %12 = vector.broadcast %cst_10 : f32 to vector<128x256xf32>
      %c0_11 = arith.constant 0 : index
      %c0_12 = arith.constant 0 : index
      %13 = vector.load %arg8[%c0_11, %c0_12] : memref<128x256xf32, #tpu.memory_space<vmem>>, vector<128x256xf32>
      tpu.vector_store %arg8[%c0_11, %c0_12], %12 {strides = array<i32>} : memref<128x256xf32, #tpu.memory_space<vmem>>, vector<128x256xf32>,
    } else {
    }
    %c0 = arith.constant 0 : index
    %c0_1 = arith.constant 0 : index
    %3 = vector.load %arg8[%c0, %c0_1] : memref<128x256xf32, #tpu.memory_space<vmem>>, vector<128x256xf32>
    %c0_2 = arith.constant 0 : index
    %c0_3 = arith.constant 0 : index
    %4 = vector.load %arg3[%c0_2, %c0_3] : memref<128x128xbf16, #tpu.memory_space<vmem>>, vector<128x128xbf16>
    %c0_4 = arith.constant 0 : index
    %c0_5 = arith.constant 0 : index
    %5 = vector.load %arg4[%c0_4, %c0_5] : memref<128x256xbf16, #tpu.memory_space<vmem>>, vector<128x256xbf16>
    %cst = arith.constant dense<0.000000e+00> : vector<128x256xf32>
    %6 = tpu.matmul %4, %5, %cst {dimension_numbers = #tpu.dot_dimension_numbers<[1], [0], [0], [1], [0, 0, 1, 1], [], []>} : vector<128x128xbf16>, vector<128x256xbf16>, vector<128x256xf32> -> vector<128x256xf32>
    %7 = arith.addf %3, %6 : vector<128x256xf32>
    %c0_6 = arith.constant 0 : index
    %c0_7 = arith.constant 0 : index
    %8 = vector.load %arg8[%c0_6, %c0_7] : memref<128x256xf32, #tpu.memory_space<vmem>>, vector<128x256xf32>
    tpu.vector_store %arg8[%c0_6, %c0_7], %7 {strides = array<i32>} : memref<128x256xf32, #tpu.memory_space<vmem>>, vector<128x256xf32>,
    %c0_i32_8 = arith.constant 0 : i32
    %9 = arith.cmpi eq, %arg2, %c0_i32_8 : i32
    %10 = arith.extui %9 : i1 to i32
    %c0_i32_9 = arith.constant 0 : i32
    %11 = arith.cmpi ne, %10, %c0_i32_9 : i32
    scf.if %11 {
      %c0_10 = arith.constant 0 : index
      %c0_11 = arith.constant 0 : index
      %12 = vector.load %arg8[%c0_10, %c0_11] : memref<128x256xf32, #tpu.memory_space<vmem>>, vector<128x256xf32>
      %c0_12 = arith.constant 0 : index
      %c0_13 = arith.constant 0 : index
      %13 = vector.load %arg5[%c0_12, %c0_13] : memref<1x256xf32, #tpu.memory_space<vmem>>, vector<1x256xf32>
      %14 = vector.broadcast %13 : vector<1x256xf32> to vector<128x256xf32>
      %15 = arith.addf %12, %14 : vector<128x256xf32>
      %c0_14 = arith.constant 0 : index
      %c0_15 = arith.constant 0 : index
      %16 = vector.load %arg6[%c0_14, %c0_15] : memref<128x256xbf16, #tpu.memory_space<vmem>>, vector<128x256xbf16>
      %17 = arith.extf %16 : vector<128x256xbf16> to vector<128x256xf32>
      %18 = arith.addf %15, %17 : vector<128x256xf32>
      %cst_16 = arith.constant 0.000000e+00 : f32
      %19 = vector.broadcast %cst_16 : f32 to vector<128x256xf32>
      %20 = arith.maximumf %18, %19 : vector<128x256xf32>
      %21 = arith.truncf %20 : vector<128x256xf32> to vector<128x256xbf16>
      %c0_17 = arith.constant 0 : index
      %c0_18 = arith.constant 0 : index
      %22 = vector.load %arg7[%c0_17, %c0_18] : memref<128x256xbf16, #tpu.memory_space<vmem>>, vector<128x256xbf16>
      tpu.vector_store %arg7[%c0_17, %c0_18], %21 {strides = array<i32>} : memref<128x256xbf16, #tpu.memory_space<vmem>>, vector<128x256xbf16>,
    } else {
    }
    return
  }
  func.func @transform_0(%arg0: i32, %arg1: i32, %arg2: i32) -> (i32, i32) {
    %c0_i32 = arith.constant 0 : i32
    return %arg0, %arg2 : i32, i32
  }
  func.func @transform_1(%arg0: i32, %arg1: i32, %arg2: i32) -> (i32, i32) {
    %c0_i32 = arith.constant 0 : i32
    return %arg2, %arg1 : i32, i32
  }
  func.func @transform_2(%arg0: i32, %arg1: i32, %arg2: i32) -> (i32, i32) {
    %c0_i32 = arith.constant 0 : i32
    %c0_i32_0 = arith.constant 0 : i32
    return %c0_i32, %arg1 : i32, i32
  }
  func.func @transform_3(%arg0: i32, %arg1: i32, %arg2: i32) -> (i32, i32) {
    %c0_i32 = arith.constant 0 : i32
    return %arg0, %arg1 : i32, i32
  }
  func.func @transform_4(%arg0: i32, %arg1: i32, %arg2: i32) -> (i32, i32) {
    %c0_i32 = arith.constant 0 : i32
    return %arg0, %arg1 : i32, i32
  }
}

module attributes {stable_mosaic.version = 11 : i64} {
  func.func @_mm_bias_kernel(%arg0: i32, %arg1: i32, %arg2: i32, %arg3: memref<128x256xbf16, #tpu.memory_space<vmem>>, %arg4: memref<256x128xbf16, #tpu.memory_space<vmem>>, %arg5: memref<1x128xf32, #tpu.memory_space<vmem>>, %arg6: memref<128x128xbf16, #tpu.memory_space<vmem>>, %arg7: memref<128x128xf32, #tpu.memory_space<vmem>>) attributes {dimension_semantics = [#tpu.dimension_semantics<parallel>, #tpu.dimension_semantics<parallel>, #tpu.dimension_semantics<arbitrary>], iteration_bounds = array<i64: 1, 1, 1>, scalar_prefetch = 0 : i64, scratch_operands = 1 : i64, tpu.core_type = #tpu.core_type<tc>, window_params = [{transform_indices = @transform_0, window_bounds = array<i64: 128, 256>}, {transform_indices = @transform_1, window_bounds = array<i64: 256, 128>}, {transform_indices = @transform_2, window_bounds = array<i64: 1, 128>}, {transform_indices = @transform_3, window_bounds = array<i64: 128, 128>}]} {
    %c0_i32 = arith.constant 0 : i32
    %0 = arith.cmpi eq, %arg2, %c0_i32 : i32
    %1 = arith.extui %0 : i1 to i32
    %c0_i32_0 = arith.constant 0 : i32
    %2 = arith.cmpi ne, %1, %c0_i32_0 : i32
    scf.if %2 {
      %cst_10 = arith.constant 0.000000e+00 : f32
      %12 = vector.broadcast %cst_10 : f32 to vector<128x128xf32>
      %c0_11 = arith.constant 0 : index
      %c0_12 = arith.constant 0 : index
      %13 = vector.load %arg7[%c0_11, %c0_12] : memref<128x128xf32, #tpu.memory_space<vmem>>, vector<128x128xf32>
      tpu.vector_store %arg7[%c0_11, %c0_12], %12 {strides = array<i32>} : memref<128x128xf32, #tpu.memory_space<vmem>>, vector<128x128xf32>,
    } else {
    }
    %c0 = arith.constant 0 : index
    %c0_1 = arith.constant 0 : index
    %3 = vector.load %arg7[%c0, %c0_1] : memref<128x128xf32, #tpu.memory_space<vmem>>, vector<128x128xf32>
    %c0_2 = arith.constant 0 : index
    %c0_3 = arith.constant 0 : index
    %4 = vector.load %arg3[%c0_2, %c0_3] : memref<128x256xbf16, #tpu.memory_space<vmem>>, vector<128x256xbf16>
    %c0_4 = arith.constant 0 : index
    %c0_5 = arith.constant 0 : index
    %5 = vector.load %arg4[%c0_4, %c0_5] : memref<256x128xbf16, #tpu.memory_space<vmem>>, vector<256x128xbf16>
    %cst = arith.constant dense<0.000000e+00> : vector<128x128xf32>
    %6 = tpu.matmul %4, %5, %cst {dimension_numbers = #tpu.dot_dimension_numbers<[1], [0], [0], [1], [0, 0, 1, 1], [], []>} : vector<128x256xbf16>, vector<256x128xbf16>, vector<128x128xf32> -> vector<128x128xf32>
    %7 = arith.addf %3, %6 : vector<128x128xf32>
    %c0_6 = arith.constant 0 : index
    %c0_7 = arith.constant 0 : index
    %8 = vector.load %arg7[%c0_6, %c0_7] : memref<128x128xf32, #tpu.memory_space<vmem>>, vector<128x128xf32>
    tpu.vector_store %arg7[%c0_6, %c0_7], %7 {strides = array<i32>} : memref<128x128xf32, #tpu.memory_space<vmem>>, vector<128x128xf32>,
    %c0_i32_8 = arith.constant 0 : i32
    %9 = arith.cmpi eq, %arg2, %c0_i32_8 : i32
    %10 = arith.extui %9 : i1 to i32
    %c0_i32_9 = arith.constant 0 : i32
    %11 = arith.cmpi ne, %10, %c0_i32_9 : i32
    scf.if %11 {
      %c0_10 = arith.constant 0 : index
      %c0_11 = arith.constant 0 : index
      %12 = vector.load %arg7[%c0_10, %c0_11] : memref<128x128xf32, #tpu.memory_space<vmem>>, vector<128x128xf32>
      %c0_12 = arith.constant 0 : index
      %c0_13 = arith.constant 0 : index
      %13 = vector.load %arg5[%c0_12, %c0_13] : memref<1x128xf32, #tpu.memory_space<vmem>>, vector<1x128xf32>
      %14 = vector.broadcast %13 : vector<1x128xf32> to vector<128x128xf32>
      %15 = arith.addf %12, %14 : vector<128x128xf32>
      %cst_14 = arith.constant 0.000000e+00 : f32
      %16 = vector.broadcast %cst_14 : f32 to vector<128x128xf32>
      %17 = arith.maximumf %15, %16 : vector<128x128xf32>
      %18 = arith.truncf %17 : vector<128x128xf32> to vector<128x128xbf16>
      %c0_15 = arith.constant 0 : index
      %c0_16 = arith.constant 0 : index
      %19 = vector.load %arg6[%c0_15, %c0_16] : memref<128x128xbf16, #tpu.memory_space<vmem>>, vector<128x128xbf16>
      tpu.vector_store %arg6[%c0_15, %c0_16], %18 {strides = array<i32>} : memref<128x128xbf16, #tpu.memory_space<vmem>>, vector<128x128xbf16>,
    } else {
    }
    return
  }
  func.func @transform_0(%arg0: i32, %arg1: i32, %arg2: i32) -> (i32, i32) {
    %c0_i32 = arith.constant 0 : i32
    return %arg0, %arg2 : i32, i32
  }
  func.func @transform_1(%arg0: i32, %arg1: i32, %arg2: i32) -> (i32, i32) {
    %c0_i32 = arith.constant 0 : i32
    return %arg2, %arg1 : i32, i32
  }
  func.func @transform_2(%arg0: i32, %arg1: i32, %arg2: i32) -> (i32, i32) {
    %c0_i32 = arith.constant 0 : i32
    %c0_i32_0 = arith.constant 0 : i32
    return %c0_i32, %arg1 : i32, i32
  }
  func.func @transform_3(%arg0: i32, %arg1: i32, %arg2: i32) -> (i32, i32) {
    %c0_i32 = arith.constant 0 : i32
    return %arg0, %arg1 : i32, i32
  }
}

module attributes {stable_mosaic.version = 11 : i64} {
  func.func @_mm_bias_kernel(%arg0: i32, %arg1: i32, %arg2: i32, %arg3: memref<32x384xbf16, #tpu.memory_space<vmem>>, %arg4: memref<384x128xbf16, #tpu.memory_space<vmem>>, %arg5: memref<1x128xf32, #tpu.memory_space<vmem>>, %arg6: memref<32x128xbf16, #tpu.memory_space<vmem>>, %arg7: memref<32x128xf32, #tpu.memory_space<vmem>>) attributes {dimension_semantics = [#tpu.dimension_semantics<parallel>, #tpu.dimension_semantics<parallel>, #tpu.dimension_semantics<arbitrary>], iteration_bounds = array<i64: 1, 1, 3>, scalar_prefetch = 0 : i64, scratch_operands = 1 : i64, tpu.core_type = #tpu.core_type<tc>, window_params = [{transform_indices = @transform_0, window_bounds = array<i64: 32, 384>}, {transform_indices = @transform_1, window_bounds = array<i64: 384, 128>}, {transform_indices = @transform_2, window_bounds = array<i64: 1, 128>}, {transform_indices = @transform_3, window_bounds = array<i64: 32, 128>}]} {
    %c0_i32 = arith.constant 0 : i32
    %0 = arith.cmpi eq, %arg2, %c0_i32 : i32
    %1 = arith.extui %0 : i1 to i32
    %c0_i32_0 = arith.constant 0 : i32
    %2 = arith.cmpi ne, %1, %c0_i32_0 : i32
    scf.if %2 {
      %cst_9 = arith.constant 0.000000e+00 : f32
      %12 = vector.broadcast %cst_9 : f32 to vector<32x128xf32>
      %c0_10 = arith.constant 0 : index
      %c0_11 = arith.constant 0 : index
      %13 = vector.load %arg7[%c0_10, %c0_11] : memref<32x128xf32, #tpu.memory_space<vmem>>, vector<32x128xf32>
      tpu.vector_store %arg7[%c0_10, %c0_11], %12 {strides = array<i32>} : memref<32x128xf32, #tpu.memory_space<vmem>>, vector<32x128xf32>,
    } else {
    }
    %c0 = arith.constant 0 : index
    %c0_1 = arith.constant 0 : index
    %3 = vector.load %arg7[%c0, %c0_1] : memref<32x128xf32, #tpu.memory_space<vmem>>, vector<32x128xf32>
    %c0_2 = arith.constant 0 : index
    %c0_3 = arith.constant 0 : index
    %4 = vector.load %arg3[%c0_2, %c0_3] : memref<32x384xbf16, #tpu.memory_space<vmem>>, vector<32x384xbf16>
    %c0_4 = arith.constant 0 : index
    %c0_5 = arith.constant 0 : index
    %5 = vector.load %arg4[%c0_4, %c0_5] : memref<384x128xbf16, #tpu.memory_space<vmem>>, vector<384x128xbf16>
    %cst = arith.constant dense<0.000000e+00> : vector<32x128xf32>
    %6 = tpu.matmul %4, %5, %cst {dimension_numbers = #tpu.dot_dimension_numbers<[1], [0], [0], [1], [0, 0, 1, 1], [], []>} : vector<32x384xbf16>, vector<384x128xbf16>, vector<32x128xf32> -> vector<32x128xf32>
    %7 = arith.addf %3, %6 : vector<32x128xf32>
    %c0_6 = arith.constant 0 : index
    %c0_7 = arith.constant 0 : index
    %8 = vector.load %arg7[%c0_6, %c0_7] : memref<32x128xf32, #tpu.memory_space<vmem>>, vector<32x128xf32>
    tpu.vector_store %arg7[%c0_6, %c0_7], %7 {strides = array<i32>} : memref<32x128xf32, #tpu.memory_space<vmem>>, vector<32x128xf32>,
    %c2_i32 = arith.constant 2 : i32
    %9 = arith.cmpi eq, %arg2, %c2_i32 : i32
    %10 = arith.extui %9 : i1 to i32
    %c0_i32_8 = arith.constant 0 : i32
    %11 = arith.cmpi ne, %10, %c0_i32_8 : i32
    scf.if %11 {
      %c0_9 = arith.constant 0 : index
      %c0_10 = arith.constant 0 : index
      %12 = vector.load %arg7[%c0_9, %c0_10] : memref<32x128xf32, #tpu.memory_space<vmem>>, vector<32x128xf32>
      %c0_11 = arith.constant 0 : index
      %c0_12 = arith.constant 0 : index
      %13 = vector.load %arg5[%c0_11, %c0_12] : memref<1x128xf32, #tpu.memory_space<vmem>>, vector<1x128xf32>
      %14 = vector.broadcast %13 : vector<1x128xf32> to vector<32x128xf32>
      %15 = arith.addf %12, %14 : vector<32x128xf32>
      %cst_13 = arith.constant 0.000000e+00 : f32
      %16 = vector.broadcast %cst_13 : f32 to vector<32x128xf32>
      %17 = arith.maximumf %15, %16 : vector<32x128xf32>
      %18 = arith.truncf %17 : vector<32x128xf32> to vector<32x128xbf16>
      %c0_14 = arith.constant 0 : index
      %c0_15 = arith.constant 0 : index
      %19 = vector.load %arg6[%c0_14, %c0_15] : memref<32x128xbf16, #tpu.memory_space<vmem>>, vector<32x128xbf16>
      tpu.vector_store %arg6[%c0_14, %c0_15], %18 {strides = array<i32>} : memref<32x128xbf16, #tpu.memory_space<vmem>>, vector<32x128xbf16>,
    } else {
    }
    return
  }
  func.func @transform_0(%arg0: i32, %arg1: i32, %arg2: i32) -> (i32, i32) {
    %c0_i32 = arith.constant 0 : i32
    return %arg0, %arg2 : i32, i32
  }
  func.func @transform_1(%arg0: i32, %arg1: i32, %arg2: i32) -> (i32, i32) {
    %c0_i32 = arith.constant 0 : i32
    return %arg2, %arg1 : i32, i32
  }
  func.func @transform_2(%arg0: i32, %arg1: i32, %arg2: i32) -> (i32, i32) {
    %c0_i32 = arith.constant 0 : i32
    %c0_i32_0 = arith.constant 0 : i32
    return %c0_i32, %arg1 : i32, i32
  }
  func.func @transform_3(%arg0: i32, %arg1: i32, %arg2: i32) -> (i32, i32) {
    %c0_i32 = arith.constant 0 : i32
    return %arg0, %arg1 : i32, i32
  }
}

module attributes {stable_mosaic.version = 11 : i64} {
  func.func @_mm_bias_kernel(%arg0: i32, %arg1: i32, %arg2: i32, %arg3: memref<32x256xbf16, #tpu.memory_space<vmem>>, %arg4: memref<256x256xbf16, #tpu.memory_space<vmem>>, %arg5: memref<1x256xf32, #tpu.memory_space<vmem>>, %arg6: memref<32x256xbf16, #tpu.memory_space<vmem>>, %arg7: memref<32x256xf32, #tpu.memory_space<vmem>>) attributes {dimension_semantics = [#tpu.dimension_semantics<parallel>, #tpu.dimension_semantics<parallel>, #tpu.dimension_semantics<arbitrary>], iteration_bounds = array<i64: 1, 2, 1>, scalar_prefetch = 0 : i64, scratch_operands = 1 : i64, tpu.core_type = #tpu.core_type<tc>, window_params = [{transform_indices = @transform_0, window_bounds = array<i64: 32, 256>}, {transform_indices = @transform_1, window_bounds = array<i64: 256, 256>}, {transform_indices = @transform_2, window_bounds = array<i64: 1, 256>}, {transform_indices = @transform_3, window_bounds = array<i64: 32, 256>}]} {
    %c0_i32 = arith.constant 0 : i32
    %0 = arith.cmpi eq, %arg2, %c0_i32 : i32
    %1 = arith.extui %0 : i1 to i32
    %c0_i32_0 = arith.constant 0 : i32
    %2 = arith.cmpi ne, %1, %c0_i32_0 : i32
    scf.if %2 {
      %cst_10 = arith.constant 0.000000e+00 : f32
      %12 = vector.broadcast %cst_10 : f32 to vector<32x256xf32>
      %c0_11 = arith.constant 0 : index
      %c0_12 = arith.constant 0 : index
      %13 = vector.load %arg7[%c0_11, %c0_12] : memref<32x256xf32, #tpu.memory_space<vmem>>, vector<32x256xf32>
      tpu.vector_store %arg7[%c0_11, %c0_12], %12 {strides = array<i32>} : memref<32x256xf32, #tpu.memory_space<vmem>>, vector<32x256xf32>,
    } else {
    }
    %c0 = arith.constant 0 : index
    %c0_1 = arith.constant 0 : index
    %3 = vector.load %arg7[%c0, %c0_1] : memref<32x256xf32, #tpu.memory_space<vmem>>, vector<32x256xf32>
    %c0_2 = arith.constant 0 : index
    %c0_3 = arith.constant 0 : index
    %4 = vector.load %arg3[%c0_2, %c0_3] : memref<32x256xbf16, #tpu.memory_space<vmem>>, vector<32x256xbf16>
    %c0_4 = arith.constant 0 : index
    %c0_5 = arith.constant 0 : index
    %5 = vector.load %arg4[%c0_4, %c0_5] : memref<256x256xbf16, #tpu.memory_space<vmem>>, vector<256x256xbf16>
    %cst = arith.constant dense<0.000000e+00> : vector<32x256xf32>
    %6 = tpu.matmul %4, %5, %cst {dimension_numbers = #tpu.dot_dimension_numbers<[1], [0], [0], [1], [0, 0, 1, 1], [], []>} : vector<32x256xbf16>, vector<256x256xbf16>, vector<32x256xf32> -> vector<32x256xf32>
    %7 = arith.addf %3, %6 : vector<32x256xf32>
    %c0_6 = arith.constant 0 : index
    %c0_7 = arith.constant 0 : index
    %8 = vector.load %arg7[%c0_6, %c0_7] : memref<32x256xf32, #tpu.memory_space<vmem>>, vector<32x256xf32>
    tpu.vector_store %arg7[%c0_6, %c0_7], %7 {strides = array<i32>} : memref<32x256xf32, #tpu.memory_space<vmem>>, vector<32x256xf32>,
    %c0_i32_8 = arith.constant 0 : i32
    %9 = arith.cmpi eq, %arg2, %c0_i32_8 : i32
    %10 = arith.extui %9 : i1 to i32
    %c0_i32_9 = arith.constant 0 : i32
    %11 = arith.cmpi ne, %10, %c0_i32_9 : i32
    scf.if %11 {
      %c0_10 = arith.constant 0 : index
      %c0_11 = arith.constant 0 : index
      %12 = vector.load %arg7[%c0_10, %c0_11] : memref<32x256xf32, #tpu.memory_space<vmem>>, vector<32x256xf32>
      %c0_12 = arith.constant 0 : index
      %c0_13 = arith.constant 0 : index
      %13 = vector.load %arg5[%c0_12, %c0_13] : memref<1x256xf32, #tpu.memory_space<vmem>>, vector<1x256xf32>
      %14 = vector.broadcast %13 : vector<1x256xf32> to vector<32x256xf32>
      %15 = arith.addf %12, %14 : vector<32x256xf32>
      %16 = arith.truncf %15 : vector<32x256xf32> to vector<32x256xbf16>
      %c0_14 = arith.constant 0 : index
      %c0_15 = arith.constant 0 : index
      %17 = vector.load %arg6[%c0_14, %c0_15] : memref<32x256xbf16, #tpu.memory_space<vmem>>, vector<32x256xbf16>
      tpu.vector_store %arg6[%c0_14, %c0_15], %16 {strides = array<i32>} : memref<32x256xbf16, #tpu.memory_space<vmem>>, vector<32x256xbf16>,
    } else {
    }
    return
  }
  func.func @transform_0(%arg0: i32, %arg1: i32, %arg2: i32) -> (i32, i32) {
    %c0_i32 = arith.constant 0 : i32
    return %arg0, %arg2 : i32, i32
  }
  func.func @transform_1(%arg0: i32, %arg1: i32, %arg2: i32) -> (i32, i32) {
    %c0_i32 = arith.constant 0 : i32
    return %arg2, %arg1 : i32, i32
  }
  func.func @transform_2(%arg0: i32, %arg1: i32, %arg2: i32) -> (i32, i32) {
    %c0_i32 = arith.constant 0 : i32
    %c0_i32_0 = arith.constant 0 : i32
    return %c0_i32, %arg1 : i32, i32
  }
  func.func @transform_3(%arg0: i32, %arg1: i32, %arg2: i32) -> (i32, i32) {
    %c0_i32 = arith.constant 0 : i32
    return %arg0, %arg1 : i32, i32
  }
}

module attributes {stable_mosaic.version = 11 : i64} {
  func.func @_mm_bias_kernel(%arg0: i32, %arg1: i32, %arg2: i32, %arg3: memref<32x512xbf16, #tpu.memory_space<vmem>>, %arg4: memref<512x128xbf16, #tpu.memory_space<vmem>>, %arg5: memref<1x128xf32, #tpu.memory_space<vmem>>, %arg6: memref<32x128xbf16, #tpu.memory_space<vmem>>, %arg7: memref<32x128xf32, #tpu.memory_space<vmem>>) attributes {dimension_semantics = [#tpu.dimension_semantics<parallel>, #tpu.dimension_semantics<parallel>, #tpu.dimension_semantics<arbitrary>], iteration_bounds = array<i64: 1, 1, 1>, scalar_prefetch = 0 : i64, scratch_operands = 1 : i64, tpu.core_type = #tpu.core_type<tc>, window_params = [{transform_indices = @transform_0, window_bounds = array<i64: 32, 512>}, {transform_indices = @transform_1, window_bounds = array<i64: 512, 128>}, {transform_indices = @transform_2, window_bounds = array<i64: 1, 128>}, {transform_indices = @transform_3, window_bounds = array<i64: 32, 128>}]} {
    %c0_i32 = arith.constant 0 : i32
    %0 = arith.cmpi eq, %arg2, %c0_i32 : i32
    %1 = arith.extui %0 : i1 to i32
    %c0_i32_0 = arith.constant 0 : i32
    %2 = arith.cmpi ne, %1, %c0_i32_0 : i32
    scf.if %2 {
      %cst_10 = arith.constant 0.000000e+00 : f32
      %12 = vector.broadcast %cst_10 : f32 to vector<32x128xf32>
      %c0_11 = arith.constant 0 : index
      %c0_12 = arith.constant 0 : index
      %13 = vector.load %arg7[%c0_11, %c0_12] : memref<32x128xf32, #tpu.memory_space<vmem>>, vector<32x128xf32>
      tpu.vector_store %arg7[%c0_11, %c0_12], %12 {strides = array<i32>} : memref<32x128xf32, #tpu.memory_space<vmem>>, vector<32x128xf32>,
    } else {
    }
    %c0 = arith.constant 0 : index
    %c0_1 = arith.constant 0 : index
    %3 = vector.load %arg7[%c0, %c0_1] : memref<32x128xf32, #tpu.memory_space<vmem>>, vector<32x128xf32>
    %c0_2 = arith.constant 0 : index
    %c0_3 = arith.constant 0 : index
    %4 = vector.load %arg3[%c0_2, %c0_3] : memref<32x512xbf16, #tpu.memory_space<vmem>>, vector<32x512xbf16>
    %c0_4 = arith.constant 0 : index
    %c0_5 = arith.constant 0 : index
    %5 = vector.load %arg4[%c0_4, %c0_5] : memref<512x128xbf16, #tpu.memory_space<vmem>>, vector<512x128xbf16>
    %cst = arith.constant dense<0.000000e+00> : vector<32x128xf32>
    %6 = tpu.matmul %4, %5, %cst {dimension_numbers = #tpu.dot_dimension_numbers<[1], [0], [0], [1], [0, 0, 1, 1], [], []>} : vector<32x512xbf16>, vector<512x128xbf16>, vector<32x128xf32> -> vector<32x128xf32>
    %7 = arith.addf %3, %6 : vector<32x128xf32>
    %c0_6 = arith.constant 0 : index
    %c0_7 = arith.constant 0 : index
    %8 = vector.load %arg7[%c0_6, %c0_7] : memref<32x128xf32, #tpu.memory_space<vmem>>, vector<32x128xf32>
    tpu.vector_store %arg7[%c0_6, %c0_7], %7 {strides = array<i32>} : memref<32x128xf32, #tpu.memory_space<vmem>>, vector<32x128xf32>,
    %c0_i32_8 = arith.constant 0 : i32
    %9 = arith.cmpi eq, %arg2, %c0_i32_8 : i32
    %10 = arith.extui %9 : i1 to i32
    %c0_i32_9 = arith.constant 0 : i32
    %11 = arith.cmpi ne, %10, %c0_i32_9 : i32
    scf.if %11 {
      %c0_10 = arith.constant 0 : index
      %c0_11 = arith.constant 0 : index
      %12 = vector.load %arg7[%c0_10, %c0_11] : memref<32x128xf32, #tpu.memory_space<vmem>>, vector<32x128xf32>
      %c0_12 = arith.constant 0 : index
      %c0_13 = arith.constant 0 : index
      %13 = vector.load %arg5[%c0_12, %c0_13] : memref<1x128xf32, #tpu.memory_space<vmem>>, vector<1x128xf32>
      %14 = vector.broadcast %13 : vector<1x128xf32> to vector<32x128xf32>
      %15 = arith.addf %12, %14 : vector<32x128xf32>
      %cst_14 = arith.constant 0.000000e+00 : f32
      %16 = vector.broadcast %cst_14 : f32 to vector<32x128xf32>
      %17 = arith.maximumf %15, %16 : vector<32x128xf32>
      %18 = arith.truncf %17 : vector<32x128xf32> to vector<32x128xbf16>
      %c0_15 = arith.constant 0 : index
      %c0_16 = arith.constant 0 : index
      %19 = vector.load %arg6[%c0_15, %c0_16] : memref<32x128xbf16, #tpu.memory_space<vmem>>, vector<32x128xbf16>
      tpu.vector_store %arg6[%c0_15, %c0_16], %18 {strides = array<i32>} : memref<32x128xbf16, #tpu.memory_space<vmem>>, vector<32x128xbf16>,
    } else {
    }
    return
  }
  func.func @transform_0(%arg0: i32, %arg1: i32, %arg2: i32) -> (i32, i32) {
    %c0_i32 = arith.constant 0 : i32
    return %arg0, %arg2 : i32, i32
  }
  func.func @transform_1(%arg0: i32, %arg1: i32, %arg2: i32) -> (i32, i32) {
    %c0_i32 = arith.constant 0 : i32
    return %arg2, %arg1 : i32, i32
  }
  func.func @transform_2(%arg0: i32, %arg1: i32, %arg2: i32) -> (i32, i32) {
    %c0_i32 = arith.constant 0 : i32
    %c0_i32_0 = arith.constant 0 : i32
    return %c0_i32, %arg1 : i32, i32
  }
  func.func @transform_3(%arg0: i32, %arg1: i32, %arg2: i32) -> (i32, i32) {
    %c0_i32 = arith.constant 0 : i32
    return %arg0, %arg1 : i32, i32
  }
}

module attributes {stable_mosaic.version = 11 : i64} {
  func.func @_mm_bias_res_kernel(%arg0: i32, %arg1: i32, %arg2: i32, %arg3: memref<32x128xbf16, #tpu.memory_space<vmem>>, %arg4: memref<128x256xbf16, #tpu.memory_space<vmem>>, %arg5: memref<1x256xf32, #tpu.memory_space<vmem>>, %arg6: memref<32x256xbf16, #tpu.memory_space<vmem>>, %arg7: memref<32x256xbf16, #tpu.memory_space<vmem>>, %arg8: memref<32x256xf32, #tpu.memory_space<vmem>>) attributes {dimension_semantics = [#tpu.dimension_semantics<parallel>, #tpu.dimension_semantics<parallel>, #tpu.dimension_semantics<arbitrary>], iteration_bounds = array<i64: 1, 2, 1>, scalar_prefetch = 0 : i64, scratch_operands = 1 : i64, tpu.core_type = #tpu.core_type<tc>, window_params = [{transform_indices = @transform_0, window_bounds = array<i64: 32, 128>}, {transform_indices = @transform_1, window_bounds = array<i64: 128, 256>}, {transform_indices = @transform_2, window_bounds = array<i64: 1, 256>}, {transform_indices = @transform_3, window_bounds = array<i64: 32, 256>}, {transform_indices = @transform_4, window_bounds = array<i64: 32, 256>}]} {
    %c0_i32 = arith.constant 0 : i32
    %0 = arith.cmpi eq, %arg2, %c0_i32 : i32
    %1 = arith.extui %0 : i1 to i32
    %c0_i32_0 = arith.constant 0 : i32
    %2 = arith.cmpi ne, %1, %c0_i32_0 : i32
    scf.if %2 {
      %cst_10 = arith.constant 0.000000e+00 : f32
      %12 = vector.broadcast %cst_10 : f32 to vector<32x256xf32>
      %c0_11 = arith.constant 0 : index
      %c0_12 = arith.constant 0 : index
      %13 = vector.load %arg8[%c0_11, %c0_12] : memref<32x256xf32, #tpu.memory_space<vmem>>, vector<32x256xf32>
      tpu.vector_store %arg8[%c0_11, %c0_12], %12 {strides = array<i32>} : memref<32x256xf32, #tpu.memory_space<vmem>>, vector<32x256xf32>,
    } else {
    }
    %c0 = arith.constant 0 : index
    %c0_1 = arith.constant 0 : index
    %3 = vector.load %arg8[%c0, %c0_1] : memref<32x256xf32, #tpu.memory_space<vmem>>, vector<32x256xf32>
    %c0_2 = arith.constant 0 : index
    %c0_3 = arith.constant 0 : index
    %4 = vector.load %arg3[%c0_2, %c0_3] : memref<32x128xbf16, #tpu.memory_space<vmem>>, vector<32x128xbf16>
    %c0_4 = arith.constant 0 : index
    %c0_5 = arith.constant 0 : index
    %5 = vector.load %arg4[%c0_4, %c0_5] : memref<128x256xbf16, #tpu.memory_space<vmem>>, vector<128x256xbf16>
    %cst = arith.constant dense<0.000000e+00> : vector<32x256xf32>
    %6 = tpu.matmul %4, %5, %cst {dimension_numbers = #tpu.dot_dimension_numbers<[1], [0], [0], [1], [0, 0, 1, 1], [], []>} : vector<32x128xbf16>, vector<128x256xbf16>, vector<32x256xf32> -> vector<32x256xf32>
    %7 = arith.addf %3, %6 : vector<32x256xf32>
    %c0_6 = arith.constant 0 : index
    %c0_7 = arith.constant 0 : index
    %8 = vector.load %arg8[%c0_6, %c0_7] : memref<32x256xf32, #tpu.memory_space<vmem>>, vector<32x256xf32>
    tpu.vector_store %arg8[%c0_6, %c0_7], %7 {strides = array<i32>} : memref<32x256xf32, #tpu.memory_space<vmem>>, vector<32x256xf32>,
    %c0_i32_8 = arith.constant 0 : i32
    %9 = arith.cmpi eq, %arg2, %c0_i32_8 : i32
    %10 = arith.extui %9 : i1 to i32
    %c0_i32_9 = arith.constant 0 : i32
    %11 = arith.cmpi ne, %10, %c0_i32_9 : i32
    scf.if %11 {
      %c0_10 = arith.constant 0 : index
      %c0_11 = arith.constant 0 : index
      %12 = vector.load %arg8[%c0_10, %c0_11] : memref<32x256xf32, #tpu.memory_space<vmem>>, vector<32x256xf32>
      %c0_12 = arith.constant 0 : index
      %c0_13 = arith.constant 0 : index
      %13 = vector.load %arg5[%c0_12, %c0_13] : memref<1x256xf32, #tpu.memory_space<vmem>>, vector<1x256xf32>
      %14 = vector.broadcast %13 : vector<1x256xf32> to vector<32x256xf32>
      %15 = arith.addf %12, %14 : vector<32x256xf32>
      %c0_14 = arith.constant 0 : index
      %c0_15 = arith.constant 0 : index
      %16 = vector.load %arg6[%c0_14, %c0_15] : memref<32x256xbf16, #tpu.memory_space<vmem>>, vector<32x256xbf16>
      %17 = arith.extf %16 : vector<32x256xbf16> to vector<32x256xf32>
      %18 = arith.addf %15, %17 : vector<32x256xf32>
      %cst_16 = arith.constant 0.000000e+00 : f32
      %19 = vector.broadcast %cst_16 : f32 to vector<32x256xf32>
      %20 = arith.maximumf %18, %19 : vector<32x256xf32>
      %21 = arith.truncf %20 : vector<32x256xf32> to vector<32x256xbf16>
      %c0_17 = arith.constant 0 : index
      %c0_18 = arith.constant 0 : index
      %22 = vector.load %arg7[%c0_17, %c0_18] : memref<32x256xbf16, #tpu.memory_space<vmem>>, vector<32x256xbf16>
      tpu.vector_store %arg7[%c0_17, %c0_18], %21 {strides = array<i32>} : memref<32x256xbf16, #tpu.memory_space<vmem>>, vector<32x256xbf16>,
    } else {
    }
    return
  }
  func.func @transform_0(%arg0: i32, %arg1: i32, %arg2: i32) -> (i32, i32) {
    %c0_i32 = arith.constant 0 : i32
    return %arg0, %arg2 : i32, i32
  }
  func.func @transform_1(%arg0: i32, %arg1: i32, %arg2: i32) -> (i32, i32) {
    %c0_i32 = arith.constant 0 : i32
    return %arg2, %arg1 : i32, i32
  }
  func.func @transform_2(%arg0: i32, %arg1: i32, %arg2: i32) -> (i32, i32) {
    %c0_i32 = arith.constant 0 : i32
    %c0_i32_0 = arith.constant 0 : i32
    return %c0_i32, %arg1 : i32, i32
  }
  func.func @transform_3(%arg0: i32, %arg1: i32, %arg2: i32) -> (i32, i32) {
    %c0_i32 = arith.constant 0 : i32
    return %arg0, %arg1 : i32, i32
  }
  func.func @transform_4(%arg0: i32, %arg1: i32, %arg2: i32) -> (i32, i32) {
    %c0_i32 = arith.constant 0 : i32
    return %arg0, %arg1 : i32, i32
  }
}

</mosaic_0001>

<bundles_post_ra>
// kernel: _lambda_.25
= control target key start
LH: loop header
LB: loop body
LE: loop exit
PB: predicated region body
PF: predicated region fallthrough
CT: control target
= control target key end

     0   :  { %s1744_s12 = smov 0   ;;  %s1746_s13 = smov 0   ;;  %s1918_s0 = inlined_call_operand.vmem [shape: bf16[512,256], index: 0, kind: input, shape index: {}]   ;;  %s1919_s1 = inlined_call_operand.vmem [shape: bf16[256,128], index: 1, kind: input, shape index: {}]   ;;  %s1920_s2 = inlined_call_operand.vmem [shape: f32[1,128], index: 2, kind: input, shape index: {}]   ;;  %s1921_s3 = inlined_call_operand.vmem [shape: bf16[512,128], index: 3, kind: output, shape index: {}]  }
   0x1   :  { %s1748_s14 = smov 0  }
   0x2 LB: > { %s32_s15 = sadd.s32 1, %s1718_s13  ;;  %p1267_p0 = scmp.ge.s32.totalorder %s1722_s14, 1  ;;  %s1722_s14 = sphi %s1748_s14, %s13_s14   ;;  %s1718_s13 = sphi %s1746_s13, %s1923_s13   ;;  %s1714_s12 = sphi %s1744_s12, %s1922_s12  }
   0x3   : > { %p34_p1 = scmp.ge.s32.totalorder %s32_s15, 2  ;;  %p191_p2 = scmp.lt.s32.totalorder %s1722_s14, 3 }
   0x5   : > { %s1925_s15 = smov (%p34_p1, %s32_s15), 0  ;;  %p192_p3 = pnand %p1267_p0, %p191_p2 }
   0x6   : > { %v1636_v0 = vld [vmem:[%s1919_s1 + $0x40] sm:$0xff] (!%p192_p3)   ;;  %s1268_s18 = sshll.u32 (!%p192_p3), %s1714_s12, 5  ;;  %v1638_v2 = vld [vmem:[%s1919_s1 + $0x48] sm:$0xff] (!%p192_p3)   ;;  %v1640_v4 = vld [vmem:[%s1919_s1 + $0x50] sm:$0xff] (!%p192_p3)  }
   0x7   : > { %195 = sbr.rel (%p192_p3) target bundleno = 320 (0x140), region = 32  ;;  %v1637_v1 = vld [vmem:[%s1919_s1] sm:$0xff] (!%p192_p3)   ;;  %1484 = vmatprep.subr.bf16.mxu0 (!%p192_p3), %v1636_v0  ;;  %1596 = vmatprep.subr.bf16.mxu1 (!%p192_p3), %v1636_v0  ;;  %v1639_v3 = vld [vmem:[%s1919_s1 + $0x8] sm:$0xff] (!%p192_p3)   ;;  %p236_p4 = scmp.lt.s32.totalorder (!%p192_p3), %s1268_s18, 63  ;;  %v1641_v5 = vld [vmem:[%s1919_s1 + $0x10] sm:$0xff] (!%p192_p3)  }
   0x8   : > { %1485 = vmatpush3.bf16.msra.mxu0 (!%p192_p3), %v1637_v1  ;;  %1604 = vmatpush3.bf16.msra.mxu1 (!%p192_p3), %v1637_v1  ;;  %v1642_v6 = vld [vmem:[%s1919_s1 + $0x58] sm:$0xff] (!%p192_p3)   ;;  %v1644_v8 = vld [vmem:[%s1919_s1 + $0x60] sm:$0xff] (!%p192_p3)   ;;  %v1646_v10 = vld [vmem:[%s1919_s1 + $0x68] sm:$0xff] (!%p192_p3)  }
   0x9   : > { %1486 = vmatprep.subr.bf16.mxu0 (!%p192_p3), %v1638_v2  ;;  %1597 = vmatprep.subr.bf16.mxu1 (!%p192_p3), %v1638_v2  ;;  %v1643_v7 = vld [vmem:[%s1919_s1 + $0x18] sm:$0xff] (!%p192_p3)   ;;  %v1645_v9 = vld [vmem:[%s1919_s1 + $0x20] sm:$0xff] (!%p192_p3)   ;;  %v1647_v13 = vld [vmem:[%s1919_s1 + $0x28] sm:$0xff] (!%p192_p3)  }
   0xa   : > { %v1648_v14 = vld [vmem:[%s1919_s1 + $0x70] sm:$0xff] (!%p192_p3)   ;;  %v1650_v16 = vld [vmem:[%s1919_s1 + $0x78] sm:$0xff] (!%p192_p3)   ;;  %v1853_v51 = vld [vmem:[%s1920_s2] ss:$0 sm:$0xff] (!%p192_p3) }
   0xb   : > { %v1649_v15 = vld [vmem:[%s1919_s1 + $0x30] sm:$0xff] (!%p192_p3)   ;;  %v1651_v17 = vld [vmem:[%s1919_s1 + $0x38] sm:$0xff] (!%p192_p3)  }
   0xc   : > { %1487 = vmatpush3.bf16.msra.mxu0 (!%p192_p3), %v1639_v3  ;;  %1605 = vmatpush3.bf16.msra.mxu1 (!%p192_p3), %v1639_v3 }
   0xd   : > { %1488 = vmatprep.subr.bf16.mxu0 (!%p192_p3), %v1640_v4  ;;  %1598 = vmatprep.subr.bf16.mxu1 (!%p192_p3), %v1640_v4 }
   0xe   : > { %s1927_s18 = smov (!%p236_p4, %s1268_s18), 63 }
   0xf   : > { %s1356_s6 = sshll.u32 %s1927_s18, 3  ;;  %s1272_s5 = sshll.u32 %s1927_s18, 2 }
  0x10   : > { %1489 = vmatpush3.bf16.msra.mxu0 %v1641_v5  ;;  %1606 = vmatpush3.bf16.msra.mxu1 %v1641_v5  ;;  %s1795_s11 = scalar_lea.vmem %s1918_s0, %s1356_s6  ;;  %s1863_s8 = scalar_lea.vmem %s1921_s3, %s1272_s5 }
  0x11   : > { %1490 = vmatprep.subr.bf16.mxu0 %v1642_v6  ;;  %1599 = vmatprep.subr.bf16.mxu1 %v1642_v6  ;;  %v1654_v11 = vld [vmem:[%s1795_s11 + $0x4] ss:$8 sps:$4 sm:$0xff]   ;;  %v1652_v18 = vld [vmem:[%s1795_s11] ss:$8 sps:$4 sm:$0xff]   ;;  %v1658_v20 = vld [vmem:[%s1795_s11 + $0x14] ss:$8 sps:$4 sm:$0xff]  }
  0x12   : > { %v1657_v12 = vld [vmem:[%s1795_s11 + $0x84] ss:$8 sps:$4 sm:$0xff]   ;;  %688 = vmatprep.mubr.bf16.mxu0 %v1654_v11  ;;  %v1655_v19 = vld [vmem:[%s1795_s11 + $0x80] ss:$8 sps:$4 sm:$0xff]   ;;  %v1660_v21 = vld [vmem:[%s1795_s11 + $0x94] ss:$8 sps:$4 sm:$0xff]  }
  0x13   : > { %752 = vmatprep.mubr.bf16.mxu1 %v1657_v12  ;;  %v1662_v22 = vld [vmem:[%s1795_s11 + $0x10] ss:$8 sps:$4 sm:$0xff]   ;;  %v1664_v24 = vld [vmem:[%s1795_s11 + $0x24] ss:$8 sps:$4 sm:$0xff]   ;;  %v1668_v26 = vld [vmem:[%s1795_s11 + $0x20] ss:$8 sps:$4 sm:$0xff]  }
  0x14   : > { %1491 = vmatpush3.bf16.msra.mxu0 %v1643_v7  ;;  %1607 = vmatpush3.bf16.msra.mxu1 %v1643_v7  ;;  %v1663_v23 = vld [vmem:[%s1795_s11 + $0x90] ss:$8 sps:$4 sm:$0xff]   ;;  %v1666_v25 = vld [vmem:[%s1795_s11 + $0xa4] ss:$8 sps:$4 sm:$0xff]   ;;  %v1669_v27 = vld [vmem:[%s1795_s11 + $0xa0] ss:$8 sps:$4 sm:$0xff]  }
  0x15   : > { %1492 = vmatprep.subr.bf16.mxu0 %v1644_v8  ;;  %1600 = vmatprep.subr.bf16.mxu1 %v1644_v8  ;;  %v1670_v28 = vld [vmem:[%s1795_s11 + $0x34] ss:$8 sps:$4 sm:$0xff]   ;;  %v1674_v30 = vld [vmem:[%s1795_s11 + $0x30] ss:$8 sps:$4 sm:$0xff]   ;;  %v1676_v32 = vld [vmem:[%s1795_s11 + $0x44] ss:$8 sps:$4 sm:$0xff]  }
  0x16   : > { %v1672_v29 = vld [vmem:[%s1795_s11 + $0xb4] ss:$8 sps:$4 sm:$0xff]   ;;  %v1675_v31 = vld [vmem:[%s1795_s11 + $0xb0] ss:$8 sps:$4 sm:$0xff]   ;;  %v1678_v33 = vld [vmem:[%s1795_s11 + $0xc4] ss:$8 sps:$4 sm:$0xff]  }
  0x17   : > { %v1680_v34 = vld [vmem:[%s1795_s11 + $0x40] ss:$8 sps:$4 sm:$0xff]   ;;  %v1682_v36 = vld [vmem:[%s1795_s11 + $0x54] ss:$8 sps:$4 sm:$0xff]   ;;  %v1686_v38 = vld [vmem:[%s1795_s11 + $0x50] ss:$8 sps:$4 sm:$0xff]  }
  0x18   : > { %1493 = vmatpush3.bf16.msra.mxu0 %v1645_v9  ;;  %1608 = vmatpush3.bf16.msra.mxu1 %v1645_v9  ;;  %v1681_v35 = vld [vmem:[%s1795_s11 + $0xc0] ss:$8 sps:$4 sm:$0xff]   ;;  %v1684_v37 = vld [vmem:[%s1795_s11 + $0xd4] ss:$8 sps:$4 sm:$0xff]   ;;  %v1687_v39 = vld [vmem:[%s1795_s11 + $0xd0] ss:$8 sps:$4 sm:$0xff]  }
  0x19   : > { %1494 = vmatprep.subr.bf16.mxu0 %v1646_v10  ;;  %1601 = vmatprep.subr.bf16.mxu1 %v1646_v10  ;;  %v1688_v40 = vld [vmem:[%s1795_s11 + $0x64] ss:$8 sps:$4 sm:$0xff]   ;;  %v1692_v42 = vld [vmem:[%s1795_s11 + $0x60] ss:$8 sps:$4 sm:$0xff]   ;;  %v1694_v44 = vld [vmem:[%s1795_s11 + $0x74] ss:$8 sps:$4 sm:$0xff]  }
  0x1a   : > { %v1690_v41 = vld [vmem:[%s1795_s11 + $0xe4] ss:$8 sps:$4 sm:$0xff]   ;;  %v1693_v43 = vld [vmem:[%s1795_s11 + $0xe0] ss:$8 sps:$4 sm:$0xff]   ;;  %v1696_v45 = vld [vmem:[%s1795_s11 + $0xf4] ss:$8 sps:$4 sm:$0xff]  }
  0x1b   : > { %v1698_v46 = vld [vmem:[%s1795_s11 + $0x70] ss:$8 sps:$4 sm:$0xff]  }
  0x1c   : > { %1495 = vmatpush3.bf16.msra.mxu0 %v1647_v13  ;;  %1609 = vmatpush3.bf16.msra.mxu1 %v1647_v13  ;;  %v1699_v47 = vld [vmem:[%s1795_s11 + $0xf0] ss:$8 sps:$4 sm:$0xff]  }
  0x1d   : > { %1496 = vmatprep.subr.bf16.mxu0 %v1648_v14  ;;  %1602 = vmatprep.subr.bf16.mxu1 %v1648_v14 }
  0x20   : > { %1497 = vmatpush3.bf16.msra.mxu0 %v1649_v15  ;;  %1610 = vmatpush3.bf16.msra.mxu1 %v1649_v15 }
  0x21   : > { %1498 = vmatprep.subr.bf16.mxu0 %v1650_v16  ;;  %1603 = vmatprep.subr.bf16.mxu1 %v1650_v16 }
  0x24   : > { %1499 = vmatpush3.bf16.msra.mxu0 %v1651_v17  ;;  %1611 = vmatpush3.bf16.msra.mxu1 %v1651_v17 }
  0x27   : > { %689 = vmatmul.mubr.bf16.vlgmr.msra.gmra.mrb[0].mxu0 %v1652_v18  ;;  %753 = vmatmul.mubr.bf16.vlgmr.msra.gmra.mrb[0].mxu1 %v1655_v19 }
  0x28   : > { %696 = vmatprep.mubr.bf16.mxu0 %v1658_v20  ;;  %760 = vmatprep.mubr.bf16.mxu1 %v1660_v21 }
  0x2f   : > { %697 = vmatmul.mubr.bf16.gmra.mrb[4].mxu0 %v1662_v22  ;;  %761 = vmatmul.mubr.bf16.gmra.mrb[4].mxu1 %v1663_v23 }
  0x30   : > { %704 = vmatprep.mubr.bf16.mxu0 %v1664_v24  ;;  %768 = vmatprep.mubr.bf16.mxu1 %v1666_v25 }
  0x37   : > { %705 = vmatmul.mubr.bf16.gmra.mrb[8].mxu0 %v1668_v26  ;;  %769 = vmatmul.mubr.bf16.gmra.mrb[8].mxu1 %v1669_v27 }
  0x38   : > { %712 = vmatprep.mubr.bf16.mxu0 %v1670_v28  ;;  %776 = vmatprep.mubr.bf16.mxu1 %v1672_v29 }
  0x3f   : > { %713 = vmatmul.mubr.bf16.gmra.mrb[12].mxu0 %v1674_v30  ;;  %777 = vmatmul.mubr.bf16.gmra.mrb[12].mxu1 %v1675_v31 }
  0x40   : > { %720 = vmatprep.mubr.bf16.mxu0 %v1676_v32  ;;  %784 = vmatprep.mubr.bf16.mxu1 %v1678_v33 }
  0x47   : > { %721 = vmatmul.mubr.bf16.gmra.mrb[16].mxu0 %v1680_v34  ;;  %785 = vmatmul.mubr.bf16.gmra.mrb[16].mxu1 %v1681_v35 }
  0x48   : > { %728 = vmatprep.mubr.bf16.mxu0 %v1682_v36  ;;  %792 = vmatprep.mubr.bf16.mxu1 %v1684_v37 }
  0x4f   : > { %729 = vmatmul.mubr.bf16.gmra.mrb[20].mxu0 %v1686_v38  ;;  %793 = vmatmul.mubr.bf16.gmra.mrb[20].mxu1 %v1687_v39 }
  0x50   : > { %736 = vmatprep.mubr.bf16.mxu0 %v1688_v40  ;;  %800 = vmatprep.mubr.bf16.mxu1 %v1690_v41 }
  0x57   : > { %737 = vmatmul.mubr.bf16.gmra.mrb[24].mxu0 %v1692_v42  ;;  %801 = vmatmul.mubr.bf16.gmra.mrb[24].mxu1 %v1693_v43 }
  0x58   : > { %744 = vmatprep.mubr.bf16.mxu0 %v1694_v44  ;;  %808 = vmatprep.mubr.bf16.mxu1 %v1696_v45 }
  0x5f   : > { %745 = vmatmul.mubr.bf16.gmra.mrb[28].mxu0 %v1698_v46  ;;  %809 = vmatmul.mubr.bf16.gmra.mrb[28].mxu1 %v1699_v47 }
  0xfa   : > { %v1500_v48 = vpop.f32.mrb[0].mxu0  ;;  %v1548_v49 = vpop.f32.mrb[0].mxu1 }
  0xfb   : > { %v1501_v50 = vpop.f32.mrb[1].mxu0  ;;  %v1549_v52 = vpop.f32.mrb[1].mxu1 }
  0xfc   : > { %v1502_v53 = vadd.f32 %v1501_v50, %v1500_v48  ;;  %v1550_v54 = vadd.f32 %v1549_v52, %v1548_v49  ;;  %v1503_v55 = vpop.f32.mrb[2].mxu0  ;;  %v1551_v56 = vpop.f32.mrb[2].mxu1 }
  0xfd   : > { %v1504_v57 = vpop.f32.mrb[3].mxu0  ;;  %v1552_v58 = vpop.f32.mrb[3].mxu1 }
  0xfe   : > { %v923_v59 = vadd.f32 %v1502_v53, %v1853_v51  ;;  %v939_v60 = vadd.f32 %v1550_v54, %v1853_v51  ;;  %v1505_v61 = vadd.f32 %v1504_v57, %v1503_v55  ;;  %v1553_v62 = vadd.f32 %v1552_v58, %v1551_v56 }
 0x100   : > { %v924_v63 = vadd.f32 %v1505_v61, %v1853_v51  ;;  %v940_v0 = vadd.f32 %v1553_v62, %v1853_v51  ;;  %v955_v1 = vmax.f32 %v923_v59, 0.0  ;;  %v971_v2 = vmax.f32 %v939_v60, 0.0 }
 0x102   : > { %v956_v3 = vmax.f32 %v924_v63, 0.0  ;;  %v972_v4 = vmax.f32 %v940_v0, 0.0  ;;  %v1506_v5 = vpop.f32.mrb[4].mxu0  ;;  %v1554_v6 = vpop.f32.mrb[4].mxu1 }
 0x103   : > { %v1507_v7 = vpop.f32.mrb[5].mxu0  ;;  %v1555_v8 = vpop.f32.mrb[5].mxu1 }
 0x104   : > { %v1392_v9 = vpack.c.bf16 %v956_v3, %v955_v1  ;;  %v1432_v10 = vpack.c.bf16 %v972_v4, %v971_v2  ;;  %v1508_v11 = vadd.f32 %v1507_v7, %v1506_v5  ;;  %v1556_v12 = vadd.f32 %v1555_v8, %v1554_v6  ;;  %v1509_v13 = vpop.f32.mrb[6].mxu0  ;;  %v1557_v14 = vpop.f32.mrb[6].mxu1 }
 0x105   : > { %v1510_v15 = vpop.f32.mrb[7].mxu0  ;;  %v1558_v16 = vpop.f32.mrb[7].mxu1 }
 0x106   : > { %1393 = vst [vmem:[%s1863_s8] sm:$0xff] %v1392_v9   ;;  %1476 = vst [vmem:[%s1863_s8 + $0x40] sm:$0xff] %v1432_v10   ;;  %v925_v17 = vadd.f32 %v1508_v11, %v1853_v51  ;;  %v941_v18 = vadd.f32 %v1556_v12, %v1853_v51  ;;  %v1511_v19 = vadd.f32 %v1510_v15, %v1509_v13 }
 0x107   : > { %v1559_v20 = vadd.f32 %v1558_v16, %v1557_v14 }
 0x108   : > { %v926_v21 = vadd.f32 %v1511_v19, %v1853_v51  ;;  %v957_v23 = vmax.f32 %v925_v17, 0.0  ;;  %v973_v24 = vmax.f32 %v941_v18, 0.0 }
 0x109   : > { %v942_v22 = vadd.f32 %v1559_v20, %v1853_v51 }
 0x10a   : > { %v958_v25 = vmax.f32 %v926_v21, 0.0  ;;  %v1512_v27 = vpop.f32.mrb[8].mxu0  ;;  %v1560_v28 = vpop.f32.mrb[8].mxu1 }
 0x10b   : > { %v974_v26 = vmax.f32 %v942_v22, 0.0  ;;  %v1513_v29 = vpop.f32.mrb[9].mxu0  ;;  %v1561_v30 = vpop.f32.mrb[9].mxu1 }
 0x10c   : > { %v1397_v31 = vpack.c.bf16 %v958_v25, %v957_v23  ;;  %v1514_v33 = vadd.f32 %v1513_v29, %v1512_v27  ;;  %v1562_v34 = vadd.f32 %v1561_v30, %v1560_v28  ;;  %v1515_v35 = vpop.f32.mrb[10].mxu0  ;;  %v1563_v36 = vpop.f32.mrb[10].mxu1 }
 0x10d   : > { %v1437_v32 = vpack.c.bf16 %v974_v26, %v973_v24  ;;  %v1516_v37 = vpop.f32.mrb[11].mxu0  ;;  %v1564_v38 = vpop.f32.mrb[11].mxu1 }
 0x10e   : > { %1469 = vst [vmem:[%s1863_s8 + $0x8] sm:$0xff] %v1397_v31   ;;  %v927_v39 = vadd.f32 %v1514_v33, %v1853_v51  ;;  %v943_v40 = vadd.f32 %v1562_v34, %v1853_v51  ;;  %v1517_v41 = vadd.f32 %v1516_v37, %v1515_v35  ;;  %v1565_v42 = vadd.f32 %v1564_v38, %v1563_v36 }
 0x10f   : > { %1477 = vst [vmem:[%s1863_s8 + $0x48] sm:$0xff] %v1437_v32  }
 0x110   : > { %v928_v43 = vadd.f32 %v1517_v41, %v1853_v51  ;;  %v944_v44 = vadd.f32 %v1565_v42, %v1853_v51  ;;  %v959_v45 = vmax.f32 %v927_v39, 0.0  ;;  %v975_v46 = vmax.f32 %v943_v40, 0.0 }
 0x112   : > { %v960_v47 = vmax.f32 %v928_v43, 0.0  ;;  %v976_v48 = vmax.f32 %v944_v44, 0.0  ;;  %v1518_v49 = vpop.f32.mrb[12].mxu0  ;;  %v1566_v50 = vpop.f32.mrb[12].mxu1 }
 0x113   : > { %v1519_v52 = vpop.f32.mrb[13].mxu0  ;;  %v1567_v53 = vpop.f32.mrb[13].mxu1 }
 0x114   : > { %v1402_v54 = vpack.c.bf16 %v960_v47, %v959_v45  ;;  %v1442_v55 = vpack.c.bf16 %v976_v48, %v975_v46  ;;  %v1520_v56 = vadd.f32 %v1519_v52, %v1518_v49  ;;  %v1568_v57 = vadd.f32 %v1567_v53, %v1566_v50  ;;  %v1521_v58 = vpop.f32.mrb[14].mxu0  ;;  %v1569_v59 = vpop.f32.mrb[14].mxu1 }
 0x115   : > { %v1522_v60 = vpop.f32.mrb[15].mxu0  ;;  %v1570_v61 = vpop.f32.mrb[15].mxu1 }
 0x116   : > { %1470 = vst [vmem:[%s1863_s8 + $0x10] sm:$0xff] %v1402_v54   ;;  %1478 = vst [vmem:[%s1863_s8 + $0x50] sm:$0xff] %v1442_v55   ;;  %v929_v62 = vadd.f32 %v1520_v56, %v1853_v51  ;;  %v945_v63 = vadd.f32 %v1568_v57, %v1853_v51  ;;  %v1523_v0 = vadd.f32 %v1522_v60, %v1521_v58 }
 0x117   : > { %v1571_v1 = vadd.f32 %v1570_v61, %v1569_v59 }
 0x118   : > { %v930_v2 = vadd.f32 %v1523_v0, %v1853_v51  ;;  %v961_v4 = vmax.f32 %v929_v62, 0.0  ;;  %v977_v5 = vmax.f32 %v945_v63, 0.0 }
 0x119   : > { %v946_v3 = vadd.f32 %v1571_v1, %v1853_v51 }
 0x11a   : > { %v962_v6 = vmax.f32 %v930_v2, 0.0  ;;  %v1524_v8 = vpop.f32.mrb[16].mxu0  ;;  %v1572_v9 = vpop.f32.mrb[16].mxu1 }
 0x11b   : > { %v978_v7 = vmax.f32 %v946_v3, 0.0  ;;  %v1525_v10 = vpop.f32.mrb[17].mxu0  ;;  %v1573_v11 = vpop.f32.mrb[17].mxu1 }
 0x11c   : > { %v1407_v12 = vpack.c.bf16 %v962_v6, %v961_v4  ;;  %v1526_v14 = vadd.f32 %v1525_v10, %v1524_v8  ;;  %v1574_v15 = vadd.f32 %v1573_v11, %v1572_v9  ;;  %v1527_v16 = vpop.f32.mrb[18].mxu0  ;;  %v1575_v17 = vpop.f32.mrb[18].mxu1 }
 0x11d   : > { %v1447_v13 = vpack.c.bf16 %v978_v7, %v977_v5  ;;  %v1528_v18 = vpop.f32.mrb[19].mxu0  ;;  %v1576_v19 = vpop.f32.mrb[19].mxu1 }
 0x11e   : > { %1471 = vst [vmem:[%s1863_s8 + $0x18] sm:$0xff] %v1407_v12   ;;  %v931_v20 = vadd.f32 %v1526_v14, %v1853_v51  ;;  %v947_v21 = vadd.f32 %v1574_v15, %v1853_v51  ;;  %v1529_v22 = vadd.f32 %v1528_v18, %v1527_v16  ;;  %v1577_v23 = vadd.f32 %v1576_v19, %v1575_v17 }
 0x11f   : > { %1479 = vst [vmem:[%s1863_s8 + $0x58] sm:$0xff] %v1447_v13  }
 0x120   : > { %v932_v24 = vadd.f32 %v1529_v22, %v1853_v51  ;;  %v948_v25 = vadd.f32 %v1577_v23, %v1853_v51  ;;  %v963_v26 = vmax.f32 %v931_v20, 0.0  ;;  %v979_v27 = vmax.f32 %v947_v21, 0.0 }
 0x122   : > { %v964_v28 = vmax.f32 %v932_v24, 0.0  ;;  %v980_v29 = vmax.f32 %v948_v25, 0.0  ;;  %v1530_v30 = vpop.f32.mrb[20].mxu0  ;;  %v1578_v31 = vpop.f32.mrb[20].mxu1 }
 0x123   : > { %v1531_v32 = vpop.f32.mrb[21].mxu0  ;;  %v1579_v33 = vpop.f32.mrb[21].mxu1 }
 0x124   : > { %v1412_v34 = vpack.c.bf16 %v964_v28, %v963_v26  ;;  %v1452_v35 = vpack.c.bf16 %v980_v29, %v979_v27  ;;  %v1532_v36 = vadd.f32 %v1531_v32, %v1530_v30  ;;  %v1580_v37 = vadd.f32 %v1579_v33, %v1578_v31  ;;  %v1533_v38 = vpop.f32.mrb[22].mxu0  ;;  %v1581_v39 = vpop.f32.mrb[22].mxu1 }
 0x125   : > { %v1534_v40 = vpop.f32.mrb[23].mxu0  ;;  %v1582_v41 = vpop.f32.mrb[23].mxu1 }
 0x126   : > { %1472 = vst [vmem:[%s1863_s8 + $0x20] sm:$0xff] %v1412_v34   ;;  %1480 = vst [vmem:[%s1863_s8 + $0x60] sm:$0xff] %v1452_v35   ;;  %v933_v42 = vadd.f32 %v1532_v36, %v1853_v51  ;;  %v949_v43 = vadd.f32 %v1580_v37, %v1853_v51  ;;  %v1535_v44 = vadd.f32 %v1534_v40, %v1533_v38 }
 0x127   : > { %v1583_v45 = vadd.f32 %v1582_v41, %v1581_v39 }
 0x128   : > { %v934_v46 = vadd.f32 %v1535_v44, %v1853_v51  ;;  %v965_v48 = vmax.f32 %v933_v42, 0.0  ;;  %v981_v49 = vmax.f32 %v949_v43, 0.0 }
 0x129   : > { %v950_v47 = vadd.f32 %v1583_v45, %v1853_v51 }
 0x12a   : > { %v966_v50 = vmax.f32 %v934_v46, 0.0  ;;  %v1536_v53 = vpop.f32.mrb[24].mxu0  ;;  %v1584_v54 = vpop.f32.mrb[24].mxu1 }
 0x12b   : > { %v982_v52 = vmax.f32 %v950_v47, 0.0  ;;  %v1537_v55 = vpop.f32.mrb[25].mxu0  ;;  %v1585_v56 = vpop.f32.mrb[25].mxu1 }
 0x12c   : > { %v1417_v57 = vpack.c.bf16 %v966_v50, %v965_v48  ;;  %v1538_v59 = vadd.f32 %v1537_v55, %v1536_v53  ;;  %v1586_v60 = vadd.f32 %v1585_v56, %v1584_v54  ;;  %v1539_v61 = vpop.f32.mrb[26].mxu0  ;;  %v1587_v62 = vpop.f32.mrb[26].mxu1 }
 0x12d   : > { %v1457_v58 = vpack.c.bf16 %v982_v52, %v981_v49  ;;  %v1540_v63 = vpop.f32.mrb[27].mxu0  ;;  %v1588_v0 = vpop.f32.mrb[27].mxu1 }
 0x12e   : > { %1473 = vst [vmem:[%s1863_s8 + $0x28] sm:$0xff] %v1417_v57   ;;  %v935_v1 = vadd.f32 %v1538_v59, %v1853_v51  ;;  %v951_v2 = vadd.f32 %v1586_v60, %v1853_v51  ;;  %v1541_v3 = vadd.f32 %v1540_v63, %v1539_v61  ;;  %v1589_v4 = vadd.f32 %v1588_v0, %v1587_v62 }
 0x12f   : > { %1481 = vst [vmem:[%s1863_s8 + $0x68] sm:$0xff] %v1457_v58  }
 0x130   : > { %v936_v5 = vadd.f32 %v1541_v3, %v1853_v51  ;;  %v952_v6 = vadd.f32 %v1589_v4, %v1853_v51  ;;  %v967_v7 = vmax.f32 %v935_v1, 0.0  ;;  %v983_v8 = vmax.f32 %v951_v2, 0.0 }
 0x132   : > { %v968_v9 = vmax.f32 %v936_v5, 0.0  ;;  %v984_v10 = vmax.f32 %v952_v6, 0.0  ;;  %v1542_v11 = vpop.f32.mrb[28].mxu0  ;;  %v1590_v12 = vpop.f32.mrb[28].mxu1 }
 0x133   : > { %v1543_v13 = vpop.f32.mrb[29].mxu0  ;;  %v1591_v14 = vpop.f32.mrb[29].mxu1 }
 0x134   : > { %v1422_v15 = vpack.c.bf16 %v968_v9, %v967_v7  ;;  %v1462_v16 = vpack.c.bf16 %v984_v10, %v983_v8  ;;  %v1544_v17 = vadd.f32 %v1543_v13, %v1542_v11  ;;  %v1592_v18 = vadd.f32 %v1591_v14, %v1590_v12  ;;  %v1545_v19 = vpop.f32.mrb[30].mxu0  ;;  %v1593_v20 = vpop.f32.mrb[30].mxu1 }
 0x135   : > { %v1546_v21 = vpop.f32.mrb[31].mxu0  ;;  %v1594_v22 = vpop.f32.mrb[31].mxu1 }
 0x136   : > { %1474 = vst [vmem:[%s1863_s8 + $0x30] sm:$0xff] %v1422_v15   ;;  %1482 = vst [vmem:[%s1863_s8 + $0x70] sm:$0xff] %v1462_v16   ;;  %v937_v23 = vadd.f32 %v1544_v17, %v1853_v51  ;;  %v953_v24 = vadd.f32 %v1592_v18, %v1853_v51  ;;  %v1547_v25 = vadd.f32 %v1546_v21, %v1545_v19 }
 0x137   : > { %v1595_v26 = vadd.f32 %v1594_v22, %v1593_v20 }
 0x138   : > { %v938_v27 = vadd.f32 %v1547_v25, %v1853_v51  ;;  %v969_v29 = vmax.f32 %v937_v23, 0.0  ;;  %v985_v30 = vmax.f32 %v953_v24, 0.0 }
 0x139   : > { %v954_v28 = vadd.f32 %v1595_v26, %v1853_v51 }
 0x13a   : > { %v970_v31 = vmax.f32 %v938_v27, 0.0 }
 0x13b   : > { %v986_v32 = vmax.f32 %v954_v28, 0.0 }
 0x13c   : > { %v1427_v33 = vpack.c.bf16 %v970_v31, %v969_v29 }
 0x13d   : > { %v1467_v34 = vpack.c.bf16 %v986_v32, %v985_v30 }
 0x13e   : > { %1475 = vst [vmem:[%s1863_s8 + $0x38] sm:$0xff] %v1427_v33  }
 0x13f   : > { %1483 = vst [vmem:[%s1863_s8 + $0x78] sm:$0xff] %v1467_v34  }
 0x140 PF: > { %s13_s14 = sadd.s32 1, %s1722_s14   ;;  %s1922_s12 = smov %s1718_s13 }
 0x141   : > { %p10_p5 = scmp.ge.s32.totalorder %s13_s14, 4   ;;  %s1923_s13 = smov %s1925_s15 }
 0x143   :  { %12 = sbr.rel (!%p10_p5) target bundleno = 2 (0x2), region = 76 }

// kernel: _lambda_.26
= control target key start
LH: loop header
LB: loop body
LE: loop exit
PB: predicated region body
PF: predicated region fallthrough
CT: control target
= control target key end

     0   :  { %s1145_s6 = smov 0   ;;  %s1147_s7 = smov 0   ;;  %s1528_s0 = inlined_call_operand.vmem [shape: bf16[4,2,9,9,64], index: 0, kind: input, shape index: {}]   ;;  %s1529_s1 = inlined_call_operand.vmem [shape: bf16[2,8,8,64], index: 1, kind: output, shape index: {}]  }
   0x1   :  { %s1149_s8 = smov 0  }
   0x2 LB: > { %s1017_s9 = sadd.s32 4294967295, %s1133_s8   ;;  %s1162_s10 = sadd.s32 1, %s1133_s8   ;;  %s1133_s8 = sphi %s1149_s8, %s1535_s8   ;;  %s1129_s7 = sphi %s1147_s7, %s1534_s7   ;;  %s1125_s6 = sphi %s1145_s6, %s1533_s6  }
   0x3   : > { %s15_s11 = ssub.s32 %s1133_s8, %s1162_s10  ;;  %s18_s12 = sadd.s32 1, %s1129_s7 }
   0x4   : > { %p16_p0 = scmp.eq.s32.totalorder %s15_s11, 0  ;;  %p25_p1 = scmp.ne.s32.totalorder %s1129_s7, %s1125_s6 }
   0x5   : > { %p26_p2 = scmp.eq.s32.totalorder %s1133_s8, 0  ;;  %p1020_p4 = scmp.ge.s32.totalorder %s1133_s8, 2 }
   0x6   : > { %s1171_s13 = scalar_select %p16_p0, %s1129_s7, %s18_s12  }
   0x7   : > { %p27_p3 = por %p26_p2, %p25_p1  ;;  %77 = sbr.rel (%p1020_p4) target bundleno = 37 (0x25), region = 16 }
   0xe   : > { %80 = sbr.rel (!%p27_p3) target bundleno = 37 (0x25), region = 20  ;;  %s82_s14 = sand.u32 (%p27_p3), 1, %s1129_s7  }
   0xf   : > { %s1085_s15 = smul.u32 (%p27_p3), 72, %s1133_s8 }
  0x10   : > { %s1084_s16 = smul.u32 (%p27_p3), 288, %s82_s14 }
  0x11   : > { %s1179_s19 = scalar_lea.vmem (%p27_p3), %s1528_s0, %s1085_s15 }
  0x12   : > { %v103_v0 = vld [vmem:[%s1179_s19] sm:$0xff] (%p27_p3)   ;;  %v107_v1 = vld [vmem:[%s1179_s19 + $0x8] sm:$0xff] (%p27_p3)   ;;  %v111_v2 = vld [vmem:[%s1179_s19 + $0x10] sm:$0xff] (%p27_p3)   ;;  %s1184_s20 = scalar_lea.vmem (%p27_p3), [#allocation2], %s1084_s16 }
  0x13   : > { %104 = vst [vmem:[%s1184_s20] sm:$0xff] (%p27_p3), %v103_v0   ;;  %108 = vst [vmem:[%s1184_s20 + $0x8] sm:$0xff] (%p27_p3), %v107_v1   ;;  %v115_v3 = vld [vmem:[%s1179_s19 + $0x18] sm:$0xff] (%p27_p3)   ;;  %v119_v4 = vld [vmem:[%s1179_s19 + $0x20] sm:$0xff] (%p27_p3)  }
  0x14   : > { %112 = vst [vmem:[%s1184_s20 + $0x10] sm:$0xff] (%p27_p3), %v111_v2   ;;  %v123_v5 = vld [vmem:[%s1179_s19 + $0x28] sm:$0xff] (%p27_p3)   ;;  %116 = vst [vmem:[%s1184_s20 + $0x18] sm:$0xff] (%p27_p3), %v115_v3   ;;  %v127_v6 = vld [vmem:[%s1179_s19 + $0x30] sm:$0xff] (%p27_p3)  }
  0x15   : > { %120 = vst [vmem:[%s1184_s20 + $0x20] sm:$0xff] %v119_v4   ;;  %124 = vst [vmem:[%s1184_s20 + $0x28] sm:$0xff] %v123_v5   ;;  %v131_v7 = vld [vmem:[%s1179_s19 + $0x38] sm:$0xff]   ;;  %v135_v8 = vld [vmem:[%s1179_s19 + $0x40] sm:$0xff]  }
  0x16   : > { %128 = vst [vmem:[%s1184_s20 + $0x30] sm:$0xff] %v127_v6   ;;  %132 = vst [vmem:[%s1184_s20 + $0x38] sm:$0xff] %v131_v7   ;;  %v139_v9 = vld [vmem:[%s1179_s19 + $0x90] sm:$0xff]   ;;  %v143_v10 = vld [vmem:[%s1179_s19 + $0x98] sm:$0xff]  }
  0x17   : > { %136 = vst [vmem:[%s1184_s20 + $0x40] sm:$0xff] %v135_v8   ;;  %v147_v11 = vld [vmem:[%s1179_s19 + $0xa0] sm:$0xff]   ;;  %140 = vst [vmem:[%s1184_s20 + $0x48] sm:$0xff] %v139_v9   ;;  %v151_v12 = vld [vmem:[%s1179_s19 + $0xa8] sm:$0xff]  }
  0x18   : > { %144 = vst [vmem:[%s1184_s20 + $0x50] sm:$0xff] %v143_v10   ;;  %148 = vst [vmem:[%s1184_s20 + $0x58] sm:$0xff] %v147_v11   ;;  %v155_v13 = vld [vmem:[%s1179_s19 + $0xb0] sm:$0xff]   ;;  %v159_v14 = vld [vmem:[%s1179_s19 + $0xb8] sm:$0xff]  }
  0x19   : > { %152 = vst [vmem:[%s1184_s20 + $0x60] sm:$0xff] %v151_v12   ;;  %156 = vst [vmem:[%s1184_s20 + $0x68] sm:$0xff] %v155_v13   ;;  %v163_v15 = vld [vmem:[%s1179_s19 + $0xc0] sm:$0xff]   ;;  %v167_v16 = vld [vmem:[%s1179_s19 + $0xc8] sm:$0xff]  }
  0x1a   : > { %160 = vst [vmem:[%s1184_s20 + $0x70] sm:$0xff] %v159_v14   ;;  %v171_v17 = vld [vmem:[%s1179_s19 + $0xd0] sm:$0xff]   ;;  %164 = vst [vmem:[%s1184_s20 + $0x78] sm:$0xff] %v163_v15   ;;  %v175_v18 = vld [vmem:[%s1179_s19 + $0x120] sm:$0xff]  }
  0x1b   : > { %168 = vst [vmem:[%s1184_s20 + $0x80] sm:$0xff] %v167_v16   ;;  %172 = vst [vmem:[%s1184_s20 + $0x88] sm:$0xff] %v171_v17   ;;  %v179_v19 = vld [vmem:[%s1179_s19 + $0x128] sm:$0xff]   ;;  %v183_v20 = vld [vmem:[%s1179_s19 + $0x130] sm:$0xff]  }
  0x1c   : > { %176 = vst [vmem:[%s1184_s20 + $0x90] sm:$0xff] %v175_v18   ;;  %180 = vst [vmem:[%s1184_s20 + $0x98] sm:$0xff] %v179_v19   ;;  %v187_v21 = vld [vmem:[%s1179_s19 + $0x138] sm:$0xff]   ;;  %v191_v22 = vld [vmem:[%s1179_s19 + $0x140] sm:$0xff]  }
  0x1d   : > { %184 = vst [vmem:[%s1184_s20 + $0xa0] sm:$0xff] %v183_v20   ;;  %v195_v23 = vld [vmem:[%s1179_s19 + $0x148] sm:$0xff]   ;;  %188 = vst [vmem:[%s1184_s20 + $0xa8] sm:$0xff] %v187_v21   ;;  %v199_v24 = vld [vmem:[%s1179_s19 + $0x150] sm:$0xff]  }
  0x1e   : > { %192 = vst [vmem:[%s1184_s20 + $0xb0] sm:$0xff] %v191_v22   ;;  %196 = vst [vmem:[%s1184_s20 + $0xb8] sm:$0xff] %v195_v23   ;;  %v203_v25 = vld [vmem:[%s1179_s19 + $0x158] sm:$0xff]   ;;  %v207_v26 = vld [vmem:[%s1179_s19 + $0x160] sm:$0xff]  }
  0x1f   : > { %200 = vst [vmem:[%s1184_s20 + $0xc0] sm:$0xff] %v199_v24   ;;  %204 = vst [vmem:[%s1184_s20 + $0xc8] sm:$0xff] %v203_v25   ;;  %v211_v27 = vld [vmem:[%s1179_s19 + $0x1b0] sm:$0xff]   ;;  %v215_v28 = vld [vmem:[%s1179_s19 + $0x1b8] sm:$0xff]  }
  0x20   : > { %208 = vst [vmem:[%s1184_s20 + $0xd0] sm:$0xff] %v207_v26   ;;  %v219_v29 = vld [vmem:[%s1179_s19 + $0x1c0] sm:$0xff]   ;;  %212 = vst [vmem:[%s1184_s20 + $0xd8] sm:$0xff] %v211_v27   ;;  %v223_v30 = vld [vmem:[%s1179_s19 + $0x1c8] sm:$0xff]  }
  0x21   : > { %216 = vst [vmem:[%s1184_s20 + $0xe0] sm:$0xff] %v215_v28   ;;  %220 = vst [vmem:[%s1184_s20 + $0xe8] sm:$0xff] %v219_v29   ;;  %v227_v31 = vld [vmem:[%s1179_s19 + $0x1d0] sm:$0xff]   ;;  %v231_v32 = vld [vmem:[%s1179_s19 + $0x1d8] sm:$0xff]  }
  0x22   : > { %224 = vst [vmem:[%s1184_s20 + $0xf0] sm:$0xff] %v223_v30   ;;  %228 = vst [vmem:[%s1184_s20 + $0xf8] sm:$0xff] %v227_v31   ;;  %v235_v33 = vld [vmem:[%s1179_s19 + $0x1e0] sm:$0xff]   ;;  %v239_v34 = vld [vmem:[%s1179_s19 + $0x1e8] sm:$0xff]  }
  0x23   : > { %232 = vst [vmem:[%s1184_s20 + $0x100] sm:$0xff] %v231_v32   ;;  %v243_v35 = vld [vmem:[%s1179_s19 + $0x1f0] sm:$0xff]   ;;  %236 = vst [vmem:[%s1184_s20 + $0x108] sm:$0xff] %v235_v33  }
  0x24   : > { %240 = vst [vmem:[%s1184_s20 + $0x110] sm:$0xff] %v239_v34   ;;  %244 = vst [vmem:[%s1184_s20 + $0x118] sm:$0xff] %v243_v35  }
  0x25 PF: > { %p1022_p5 = scmp.ge.s32.totalorder %s1133_s8, 1  ;;  %p412_p6 = scmp.lt.s32.totalorder %s1133_s8, 3 }
  0x27   : > { %p413_p7 = pnand %p1022_p5, %p412_p6 }
  0x28   : > { %s419_s21 = sand.u32 (!%p413_p7), 1, %s1125_s6   ;;  %vm476_vm0 = vsmask.f32 (!%p413_p7), 3328  ;;  %vm477_vm1 = vsmask.f32 (!%p413_p7), 7440  ;;  %p1287_p8 = scmp.lt.s32.totalorder (!%p413_p7), %s1017_s9, 1 }
  0x29   : > { %416 = sbr.rel (%p413_p7) target bundleno = 129 (0x81), region = 61  ;;  %vm1273_vm2 = vmor (!%p413_p7), %vm476_vm0, %vm477_vm1  ;;  %vm947_vm3 = vcmask (!%p413_p7), 519168  }
  0x2a   : > { %s1086_s22 = smul.u32 (!%p413_p7), 288, %s419_s21 }
  0x2c   : > { %s1258_s23 = scalar_lea.vmem (!%p413_p7), [#allocation2], %s1086_s22 }
  0x2d   : > { %v443_v36 = vld [vmem:[%s1258_s23] sm:$0xf] (!%p413_p7)  ;;  %v468_v37 = vld [vmem:[%s1258_s23 + $0x4] sm:$0x1] (!%p413_p7)  ;;  %v1033_v40 = vld [vmem:[%s1258_s23 + $0x90] sm:$0xf] (!%p413_p7) }
  0x2e   : > { %v480_v38 = vshrl.u32 (!%p413_p7), %v443_v36, 16  ;;  %v483_v39 = vshll.u32 (!%p413_p7), %v443_v36, 16  ;;  %v1025_v41 = vld [vmem:[%s1258_s23 + $0x48] sm:$0xf] (!%p413_p7)  ;;  %v489_v42 = vshll.u32 (!%p413_p7), %v468_v37, 16  ;;  %v650_v44 = vshrl.u32 (!%p413_p7), %v1033_v40, 16 }
  0x2f   : > { %v1049_v43 = vld [vmem:[%s1258_s23 + $0x94] sm:$0x1] (!%p413_p7)  ;;  %v653_v47 = vshll.u32 (!%p413_p7), %v1033_v40, 16  ;;  %v1266_v49 = vld [vmem:[%s1258_s23 + $0x8] sm:$0xf] (!%p413_p7)  ;;  %v460_v58 = vmax.bf16 (!%p413_p7), %v1025_v41, %v443_v36 }
  0x30   : > { %v482_v45 = vrot.slane %v480_v38, 4  ;;  %v485_v46 = vrot.slane %v483_v39, 5  ;;  %v659_v48 = vshll.u32 %v1049_v43, 16  ;;  %v491_v50 = vrot.slane %v489_v42, 5  ;;  %v1073_v52 = vld [vmem:[%s1258_s23 + $0xc] sm:$0x1] }
  0x31   : > { %v652_v51 = vrot.slane %v650_v44, 4  ;;  %v655_v54 = vrot.slane %v653_v47, 5  ;;  %v820_v56 = vshrl.u32 %v1266_v49, 16  ;;  %v444_v57 = vld [vmem:[%s1258_s23 + $0x8] sm:$0xf]  ;;  %v823_v60 = vshll.u32 %v1266_v49, 16 }
  0x32   : > { %v486_v53 = vor.u32 %v485_v46, %v482_v45  ;;  %v661_v55 = vrot.slane %v659_v48, 5  ;;  %v829_v61 = vshll.u32 %v1073_v52, 16  ;;  %v1026_v62 = vld [vmem:[%s1258_s23 + $0x50] sm:$0xf]  ;;  %v469_v63 = vld [vmem:[%s1258_s23 + $0xc] sm:$0x1] }
  0x33   : > { %v656_v1 = vor.u32 %v655_v54, %v652_v51  ;;  %v822_v2 = vrot.slane %v820_v56, 4  ;;  %v461_v3 = vmax.bf16 %v1026_v62, %v444_v57  ;;  %v1281_v4 = vld [vmem:[%s1258_s23 + $0x98] sm:$0xf]  ;;  %v825_v5 = vrot.slane %v823_v60, 5  ;;  %v1050_v12 = vld [vmem:[%s1258_s23 + $0x9c] sm:$0x1] }
  0x34   : > { %v487_v0 = vrot.slane %v486_v53, 4  ;;  %v1283_v6 = vrot.slane %v829_v61, 5  ;;  %v494_v7 = vshrl.u32 %v444_v57, 16  ;;  %v497_v8 = vshll.u32 %v444_v57, 16  ;;  %v1296_v18 = vld [vmem:[%s1258_s23 + $0x10] sm:$0xf] }
  0x35   : > { %v657_v10 = vrot.slane %v656_v1, 4  ;;  %v503_v11 = vshll.u32 %v469_v63, 16  ;;  %v664_v13 = vshrl.u32 %v1281_v4, 16  ;;  %v826_v15 = vor.u32 %v825_v5, %v822_v2  ;;  %v1074_v19 = vld [vmem:[%s1258_s23 + $0x14] sm:$0x1]  ;;  %s1537_s9 = smov (!%p1287_p8, %s1017_s9), 1 }
  0x36   : > { %v492_v9 = vsel %vm1273_vm2, %v487_v0, %v491_v50  ;;  %v496_v16 = vrot.slane %v494_v7, 4  ;;  %v499_v17 = vrot.slane %v497_v8, 5  ;;  %v1041_v20 = vld [vmem:[%s1258_s23 + $0xd8] sm:$0xf]  ;;  %v667_v24 = vshll.u32 %v1281_v4, 16  ;;  %s1083_s25 = sshll.u32 %s1537_s9, 5 }
  0x37   : > { %v599_v14 = vmax.bf16 %v492_v9, %v460_v58  ;;  %v662_v21 = vsel %vm1273_vm2, %v657_v10, %v661_v55  ;;  %v505_v22 = vrot.slane %v503_v11, 5  ;;  %v666_v23 = vrot.slane %v664_v13, 4  ;;  %v1306_v33 = vld [vmem:[%s1258_s23 + $0x10] sm:$0xf]  ;;  %v470_v37 = vld [vmem:[%s1258_s23 + $0x14] sm:$0x1]  ;;  %s1345_s28 = scalar_lea.vmem %s1529_s1, %s1083_s25 }
  0x38   : > { %v827_v26 = vrot.slane %v826_v15, 4  ;;  %v500_v27 = vor.u32 %v499_v17, %v496_v16  ;;  %v673_v28 = vshll.u32 %v1050_v12, 16  ;;  %v669_v29 = vrot.slane %v667_v24, 5  ;;  %v1319_v42 = vld [vmem:[%s1258_s23 + $0xa0] sm:$0xf] }
  0x39   : > { %v616_v25 = vmax.bf16 %v1033_v40, %v599_v14  ;;  %v834_v30 = vshrl.u32 %v1296_v18, 16  ;;  %v837_v31 = vshll.u32 %v1296_v18, 16  ;;  %v843_v32 = vshll.u32 %v1074_v19, 16  ;;  %v1027_v46 = vld [vmem:[%s1258_s23 + $0x58] sm:$0xf] }
  0x3a   : > { %v832_v35 = vsel %vm1273_vm2, %v827_v26, %v1283_v6  ;;  %v501_v36 = vrot.slane %v500_v27, 4  ;;  %v670_v38 = vor.u32 %v669_v29, %v666_v23  ;;  %v675_v39 = vrot.slane %v673_v28, 5  ;;  %v1065_v48 = vld [vmem:[%s1258_s23 + $0x50] sm:$0xf]  ;;  %v1042_v51 = vld [vmem:[%s1258_s23 + $0xe0] sm:$0xf] }
  0x3b   : > { %v633_v34 = vmax.bf16 %v1041_v20, %v616_v25  ;;  %v836_v40 = vrot.slane %v834_v30, 4  ;;  %v839_v41 = vrot.slane %v837_v31, 5  ;;  %v1323_v45 = vrot.slane %v843_v32, 5  ;;  %v1051_v58 = vld [vmem:[%s1258_s23 + $0xa4] sm:$0x1] }
  0x3c   : > { %v506_v44 = vsel %vm1273_vm2, %v501_v36, %v505_v22  ;;  %v508_v47 = vshrl.u32 %v1306_v33, 16  ;;  %v671_v52 = vrot.slane %v670_v38, 4  ;;  %v511_v54 = vshll.u32 %v1306_v33, 16  ;;  %v1337_v1 = vld [vmem:[%s1258_s23 + $0x18] sm:$0xf] }
  0x3d   : > { %v769_v43 = vmax.bf16 %v662_v21, %v633_v34  ;;  %v600_v50 = vmax.bf16 %v506_v44, %v461_v3  ;;  %v840_v53 = vor.u32 %v839_v41, %v836_v40  ;;  %v517_v57 = vshll.u32 %v470_v37, 16  ;;  %v1075_v9 = vld [vmem:[%s1258_s23 + $0x1c] sm:$0x1]  ;;  %v1349_v10 = vld [vmem:[%s1258_s23 + $0x18] sm:$0xf] }
  0x3e   : > { %v510_v56 = vrot.slane %v508_v47, 4  ;;  %v678_v60 = vshrl.u32 %v1319_v42, 16  ;;  %v462_v63 = vmax.bf16 %v1027_v46, %v1306_v33  ;;  %v513_v0 = vrot.slane %v511_v54, 5  ;;  %v1354_v15 = vld [vmem:[%s1258_s23 + $0x60] sm:$0xf] }
  0x3f   : > { %v786_v55 = vmax.bf16 %v1266_v49, %v769_v43  ;;  %v617_v61 = vmax.bf16 %v1281_v4, %v600_v50  ;;  %v841_v62 = vrot.slane %v840_v53, 4  ;;  %v676_v49 = vsel %vm1273_vm2, %v671_v52, %v675_v39  ;;  %v1066_v17 = vld [vmem:[%s1258_s23 + $0x58] sm:$0xf]  ;;  %v471_v22 = vld [vmem:[%s1258_s23 + $0x1c] sm:$0x1] }
  0x40   : > { %v680_v3 = vrot.slane %v678_v60, 4  ;;  %v681_v5 = vshll.u32 %v1319_v42, 16  ;;  %v514_v6 = vor.u32 %v513_v0, %v510_v56  ;;  %v519_v7 = vrot.slane %v517_v57, 5  ;;  %v1364_v27 = vld [vmem:[%s1258_s23 + $0xa8] sm:$0xf] }
  0x41   : > { %v803_v2 = vmax.bf16 %v1065_v48, %v786_v55  ;;  %v634_v4 = vmax.bf16 %v1042_v51, %v617_v61  ;;  %v687_v8 = vshll.u32 %v1051_v58, 16  ;;  %v848_v13 = vshrl.u32 %v1337_v1, 16  ;;  %v1043_v33 = vld [vmem:[%s1258_s23 + $0xe8] sm:$0xf]  ;;  %v1052_v37 = vld [vmem:[%s1258_s23 + $0xac] sm:$0x1] }
  0x42   : > { %v683_v12 = vrot.slane %v681_v5, 5  ;;  %v851_v14 = vshll.u32 %v1337_v1, 16  ;;  %v846_v19 = vsel %vm1273_vm2, %v841_v62, %v1323_v45  ;;  %v515_v20 = vrot.slane %v514_v6, 4  ;;  %v1377_v41 = vld [vmem:[%s1258_s23 + $0x20] sm:$0xf] }
  0x43   : > { %v939_v11 = vmax.bf16 %v832_v35, %v803_v2  ;;  %v770_v16 = vmax.bf16 %v676_v49, %v634_v4  ;;  %v689_v21 = vrot.slane %v687_v8, 5  ;;  %v850_v24 = vrot.slane %v848_v13, 4  ;;  %v1076_v47 = vld [vmem:[%s1258_s23 + $0x24] sm:$0x1]  ;;  %v447_v61 = vld [vmem:[%s1258_s23 + $0x20] sm:$0xf] }
  0x44   : > { %v684_v23 = vor.u32 %v683_v12, %v680_v3  ;;  %v853_v25 = vrot.slane %v851_v14, 5  ;;  %v857_v26 = vshll.u32 %v1075_v9, 16  ;;  %v520_v29 = vsel %vm1273_vm2, %v515_v20, %v519_v7  ;;  %v472_v3 = vld [vmem:[%s1258_s23 + $0x24] sm:$0x1]  ;;  %v1396_v8 = vld [vmem:[%s1258_s23 + $0xb0] sm:$0xf] }
  0x45   : > { %948 = vst.msk [vmem:[%s1345_s28] sm:$0xf] %vm947_vm3, %v939_v11  ;;  %v787_v28 = vmax.bf16 %v1296_v18, %v770_v16  ;;  %v463_v30 = vmax.bf16 %v1354_v15, %v1349_v10  ;;  %v522_v31 = vshrl.u32 %v1349_v10, 16  ;;  %v601_v32 = vmax.bf16 %v520_v29, %v462_v63  ;;  %v1067_v63 = vld [vmem:[%s1258_s23 + $0x60] sm:$0xf] }
  0x46   : > { %v685_v34 = vrot.slane %v684_v23, 4  ;;  %v854_v35 = vor.u32 %v853_v25, %v850_v24  ;;  %v525_v36 = vshll.u32 %v1349_v10, 16  ;;  %v531_v40 = vshll.u32 %v471_v22, 16  ;;  %v1044_v11 = vld [vmem:[%s1258_s23 + $0xf0] sm:$0xf] }
  0x47   : > { %v804_v38 = vmax.bf16 %v1066_v17, %v787_v28  ;;  %v524_v39 = vrot.slane %v522_v31, 4  ;;  %v692_v18 = vshrl.u32 %v1364_v27, 16  ;;  %v618_v43 = vmax.bf16 %v1319_v42, %v601_v32  ;;  %v1029_v17 = vld [vmem:[%s1258_s23 + $0x68] sm:$0xf]  ;;  %v1053_v20 = vld [vmem:[%s1258_s23 + $0xb4] sm:$0x1] }
  0x48   : > { %v855_v44 = vrot.slane %v854_v35, 4  ;;  %v859_v45 = vrot.slane %v857_v26, 5  ;;  %v527_v46 = vrot.slane %v525_v36, 5  ;;  %v690_v50 = vsel %vm1273_vm2, %v685_v34, %v689_v21 }
  0x49   : > { %v940_v48 = vmax.bf16 %v846_v19, %v804_v38  ;;  %v694_v51 = vrot.slane %v692_v18, 4  ;;  %v695_v52 = vshll.u32 %v1364_v27, 16  ;;  %v635_v53 = vmax.bf16 %v1043_v33, %v618_v43  ;;  %v448_v43 = vld [vmem:[%s1258_s23 + $0x28] sm:$0xf] }
  0x4a   : > { %v528_v54 = vor.u32 %v527_v46, %v524_v39  ;;  %v533_v55 = vrot.slane %v531_v40, 5  ;;  %v701_v56 = vshll.u32 %v1052_v37, 16  ;;  %v862_v57 = vshrl.u32 %v1377_v41, 16 }
  0x4b   : > { %949 = vst.msk [vmem:[%s1345_s28 + $0x4] sm:$0xf] %vm947_vm3, %v940_v48  ;;  %v697_v42 = vrot.slane %v695_v52, 5  ;;  %v865_v58 = vshll.u32 %v1377_v41, 16  ;;  %v871_v60 = vshll.u32 %v1076_v47, 16  ;;  %v771_v62 = vmax.bf16 %v690_v50, %v635_v53 }
  0x4c   : > { %v860_v0 = vsel %vm1273_vm2, %v855_v44, %v859_v45  ;;  %v529_v2 = vrot.slane %v528_v54, 4  ;;  %v703_v49 = vrot.slane %v701_v56, 5  ;;  %v864_v4 = vrot.slane %v862_v57, 4  ;;  %v473_v48 = vld [vmem:[%s1258_s23 + $0x2c] sm:$0x1] }
  0x4d   : > { %v698_v5 = vor.u32 %v697_v42, %v694_v51  ;;  %v867_v6 = vrot.slane %v865_v58, 5  ;;  %v1393_v7 = vrot.slane %v871_v60, 5  ;;  %v788_v9 = vmax.bf16 %v1337_v1, %v771_v62  ;;  %v1406_v1 = vld [vmem:[%s1258_s23 + $0x28] sm:$0xf]  ;;  %v1423_v50 = vld [vmem:[%s1258_s23 + $0xb8] sm:$0xf] }
  0x4e   : > { %v534_v10 = vsel %vm1273_vm2, %v529_v2, %v533_v55  ;;  %v536_v12 = vshrl.u32 %v447_v61, 16  ;;  %v539_v13 = vshll.u32 %v447_v61, 16  ;;  %v545_v19 = vshll.u32 %v472_v3, 16  ;;  %v1068_v51 = vld [vmem:[%s1258_s23 + $0x68] sm:$0xf] }
  0x4f   : > { %v602_v14 = vmax.bf16 %v534_v10, %v463_v30  ;;  %v699_v15 = vrot.slane %v698_v5, 4  ;;  %v868_v16 = vor.u32 %v867_v6, %v864_v4  ;;  %v805_v21 = vmax.bf16 %v1067_v63, %v788_v9  ;;  %v1077_v30 = vld [vmem:[%s1258_s23 + $0x2c] sm:$0x1]  ;;  %v1045_v57 = vld [vmem:[%s1258_s23 + $0xf8] sm:$0xf] }
  0x50   : > { %v538_v22 = vrot.slane %v536_v12, 4  ;;  %v541_v23 = vrot.slane %v539_v13, 5  ;;  %v706_v24 = vshrl.u32 %v1396_v8, 16  ;;  %v547_v29 = vrot.slane %v545_v19, 5  ;;  %v1030_v63 = vld [vmem:[%s1258_s23 + $0x70] sm:$0xf] }
  0x51   : > { %v619_v25 = vmax.bf16 %v1364_v27, %v602_v14  ;;  %v704_v26 = vsel %vm1273_vm2, %v699_v15, %v703_v49  ;;  %v869_v28 = vrot.slane %v868_v16, 4  ;;  %v941_v31 = vmax.bf16 %v860_v0, %v805_v21  ;;  %v1054_v6 = vld [vmem:[%s1258_s23 + $0xbc] sm:$0x1]  ;;  %v1078_v12 = vld [vmem:[%s1258_s23 + $0x34] sm:$0x1] }
  0x52   : > { %v542_v32 = vor.u32 %v541_v23, %v538_v22  ;;  %v708_v33 = vrot.slane %v706_v24, 4  ;;  %v709_v34 = vshll.u32 %v1396_v8, 16  ;;  %v464_v36 = vmax.bf16 %v1029_v17, %v447_v61  ;;  %v1069_v16 = vld [vmem:[%s1258_s23 + $0x70] sm:$0xf] }
  0x53   : > { %v636_v35 = vmax.bf16 %v1044_v11, %v619_v25  ;;  %v715_v37 = vshll.u32 %v1053_v20, 16  ;;  %v876_v27 = vshrl.u32 %v1406_v1, 16  ;;  %950 = vst.msk [vmem:[%s1345_s28 + $0x8] sm:$0xf] %vm947_vm3, %v941_v31  ;;  %v879_v40 = vshll.u32 %v1406_v1, 16 }
  0x54   : > { %v543_v38 = vrot.slane %v542_v32, 4  ;;  %v711_v39 = vrot.slane %v709_v34, 5  ;;  %v885_v18 = vshll.u32 %v1077_v30, 16  ;;  %v874_v45 = vsel %vm1273_vm2, %v869_v28, %v1393_v7  ;;  %v1447_v22 = vld [vmem:[%s1258_s23 + $0x30] sm:$0xf] }
  0x55   : > { %v772_v44 = vmax.bf16 %v704_v26, %v636_v35  ;;  %v717_v46 = vrot.slane %v715_v37, 5  ;;  %v878_v47 = vrot.slane %v876_v27, 4  ;;  %v881_v54 = vrot.slane %v879_v40, 5  ;;  %v474_v28 = vld [vmem:[%s1258_s23 + $0x34] sm:$0x1] }
  0x56   : > { %v548_v52 = vsel %vm1273_vm2, %v543_v38, %v547_v29  ;;  %v712_v53 = vor.u32 %v711_v39, %v708_v33  ;;  %v1428_v55 = vrot.slane %v885_v18, 5  ;;  %v550_v58 = vshrl.u32 %v448_v43, 16  ;;  %v1456_v33 = vld [vmem:[%s1258_s23 + $0xc0] sm:$0xf]  ;;  %v1031_v40 = vld [vmem:[%s1258_s23 + $0x78] sm:$0xf] }
  0x57   : > { %v789_v56 = vmax.bf16 %v1377_v41, %v772_v44  ;;  %v603_v42 = vmax.bf16 %v548_v52, %v464_v36  ;;  %v553_v60 = vshll.u32 %v448_v43, 16  ;;  %v882_v62 = vor.u32 %v881_v54, %v878_v47  ;;  %v1437_v41 = vld [vmem:[%s1258_s23 + $0x30] sm:$0xf]  ;;  %v1046_v38 = vld [vmem:[%s1258_s23 + $0x100] sm:$0xf] }
  0x58   : > { %v713_v61 = vrot.slane %v712_v53, 4  ;;  %v559_v0 = vshll.u32 %v473_v48, 16  ;;  %v720_v2 = vshrl.u32 %v1423_v50, 16  ;;  %v552_v5 = vrot.slane %v550_v58, 4  ;;  %v1471_v54 = vld [vmem:[%s1258_s23 + $0x38] sm:$0xf] }
  0x59   : > { %v806_v49 = vmax.bf16 %v1068_v51, %v789_v56  ;;  %v620_v3 = vmax.bf16 %v1396_v8, %v603_v42  ;;  %v555_v4 = vrot.slane %v553_v60, 5  ;;  %v883_v9 = vrot.slane %v882_v62, 4  ;;  %v1079_v62 = vld [vmem:[%s1258_s23 + $0x3c] sm:$0x1] }
  0x5a   : > { %v718_v7 = vsel %vm1273_vm2, %v713_v61, %v717_v46  ;;  %v561_v10 = vrot.slane %v559_v0, 5  ;;  %v722_v11 = vrot.slane %v720_v2, 4  ;;  %v723_v8 = vshll.u32 %v1423_v50, 16 }
  0x5b   : > { %v942_v13 = vmax.bf16 %v874_v45, %v806_v49  ;;  %v637_v14 = vmax.bf16 %v1045_v57, %v620_v3  ;;  %v556_v15 = vor.u32 %v555_v4, %v552_v5  ;;  %v465_v17 = vmax.bf16 %v1030_v63, %v448_v43  ;;  %v450_v49 = vld [vmem:[%s1258_s23 + $0x38] sm:$0xf] }
  0x5c   : > { %v729_v19 = vshll.u32 %v1054_v6, 16  ;;  %v890_v20 = vshrl.u32 %v1437_v41, 16  ;;  %v893_v21 = vshll.u32 %v1437_v41, 16  ;;  %v725_v25 = vrot.slane %v723_v8, 5  ;;  %v1070_v5 = vld [vmem:[%s1258_s23 + $0x78] sm:$0xf] }
  0x5d   : > { %951 = vst.msk [vmem:[%s1345_s28 + $0xc] sm:$0xf] %vm947_vm3, %v942_v13  ;;  %v773_v23 = vmax.bf16 %v718_v7, %v637_v14  ;;  %v557_v24 = vrot.slane %v556_v15, 4  ;;  %v899_v26 = vshll.u32 %v1078_v12, 16  ;;  %v888_v29 = vsel %vm1273_vm2, %v883_v9, %v1428_v55  ;;  %v475_v9 = vld [vmem:[%s1258_s23 + $0x3c] sm:$0x1] }
  0x5e   : > { %v731_v30 = vrot.slane %v729_v19, 5  ;;  %v892_v31 = vrot.slane %v890_v20, 4  ;;  %v895_v32 = vrot.slane %v893_v21, 5  ;;  %v726_v36 = vor.u32 %v725_v25, %v722_v11  ;;  %v1040_v14 = vld [vmem:[%s1258_s23 + $0xc8] sm:$0xf] }
  0x5f   : > { %v790_v34 = vmax.bf16 %v1406_v1, %v773_v23  ;;  %v562_v35 = vsel %vm1273_vm2, %v557_v24, %v561_v10  ;;  %v1461_v37 = vrot.slane %v899_v26, 5  ;;  %v564_v18 = vshrl.u32 %v1447_v22, 16  ;;  %v1055_v1 = vld [vmem:[%s1258_s23 + $0xc4] sm:$0x1]  ;;  %v1047_v21 = vld [vmem:[%s1258_s23 + $0x108] sm:$0xf] }
  0x60   : > { %v604_v27 = vmax.bf16 %v562_v35, %v465_v17  ;;  %v896_v39 = vor.u32 %v895_v32, %v892_v31  ;;  %v567_v43 = vshll.u32 %v1447_v22, 16  ;;  %v727_v45 = vrot.slane %v726_v36, 4  ;;  %v1032_v17 = vld [vmem:[%s1258_s23 + $0x80] sm:$0xf] }
  0x61   : > { %v807_v44 = vmax.bf16 %v1069_v16, %v790_v34  ;;  %v573_v46 = vshll.u32 %v474_v28, 16  ;;  %v734_v47 = vshrl.u32 %v1456_v33, 16  ;;  %v566_v52 = vrot.slane %v564_v18, 4  ;;  %v1064_v35 = vld [vmem:[%s1258_s23 + $0x40] sm:$0xf] }
  0x62   : > { %v621_v48 = vmax.bf16 %v1423_v50, %v604_v27  ;;  %v897_v51 = vrot.slane %v896_v39, 4  ;;  %v569_v53 = vrot.slane %v567_v43, 5  ;;  %v732_v56 = vsel %vm1273_vm2, %v727_v45, %v731_v30 }
  0x63   : > { %v943_v55 = vmax.bf16 %v888_v29, %v807_v44  ;;  %v575_v42 = vrot.slane %v573_v46, 5  ;;  %v736_v60 = vrot.slane %v734_v47, 4  ;;  %v737_v61 = vshll.u32 %v1456_v33, 16  ;;  %v1056_v29 = vld [vmem:[%s1258_s23 + $0xcc] sm:$0x1] }
  0x64   : > { %v638_v57 = vmax.bf16 %v1046_v38, %v621_v48  ;;  %v570_v58 = vor.u32 %v569_v53, %v566_v52  ;;  %v466_v50 = vmax.bf16 %v1031_v40, %v1447_v22  ;;  %v743_v63 = vshll.u32 %v1055_v1, 16  ;;  %v1071_v48 = vld [vmem:[%s1258_s23 + $0x80] sm:$0xf]  ;;  %v1080_v52 = vld [vmem:[%s1258_s23 + $0x44] sm:$0x1] }
  0x65   : > { %952 = vst.msk [vmem:[%s1345_s28 + $0x10] sm:$0xf] %vm947_vm3, %v943_v55  ;;  %v904_v0 = vshrl.u32 %v1471_v54, 16  ;;  %v907_v2 = vshll.u32 %v1471_v54, 16  ;;  %v902_v4 = vsel %vm1273_vm2, %v897_v51, %v1461_v37  ;;  %v739_v7 = vrot.slane %v737_v61, 5 }
  0x66   : > { %v774_v3 = vmax.bf16 %v732_v56, %v638_v57  ;;  %v571_v6 = vrot.slane %v570_v58, 4  ;;  %v745_v10 = vrot.slane %v743_v63, 5  ;;  %v913_v13 = vshll.u32 %v1079_v62, 16 }
  0x67   : > { %v906_v11 = vrot.slane %v904_v0, 4  ;;  %v909_v12 = vrot.slane %v907_v2, 5  ;;  %v740_v16 = vor.u32 %v739_v7, %v736_v60  ;;  %v578_v19 = vshrl.u32 %v450_v49, 16  ;;  %v1072_v7 = vld [vmem:[%s1258_s23 + $0x88] sm:$0xf] }
  0x68   : > { %v791_v15 = vmax.bf16 %v1437_v41, %v774_v3  ;;  %v576_v8 = vsel %vm1273_vm2, %v571_v6, %v575_v42  ;;  %v581_v23 = vshll.u32 %v450_v49, 16  ;;  %v587_v24 = vshll.u32 %v475_v9, 16 }
  0x69   : > { %v605_v20 = vmax.bf16 %v576_v8, %v466_v50  ;;  %v910_v22 = vor.u32 %v909_v12, %v906_v11  ;;  %v741_v26 = vrot.slane %v740_v16, 4  ;;  %v580_v28 = vrot.slane %v578_v19, 4  ;;  %v1048_v50 = vld [vmem:[%s1258_s23 + $0x110] sm:$0xf] }
  0x6a   : > { %v808_v25 = vmax.bf16 %v1070_v5, %v791_v15  ;;  %v748_v30 = vshrl.u32 %v1040_v14, 16  ;;  %v915_v31 = vrot.slane %v913_v13, 5  ;;  %v467_v32 = vmax.bf16 %v1032_v17, %v450_v49 }
  0x6b   : > { %v622_v41 = vmax.bf16 %v1456_v33, %v605_v20  ;;  %v583_v34 = vrot.slane %v581_v23, 5  ;;  %v746_v37 = vsel %vm1273_vm2, %v741_v26, %v745_v10  ;;  %v751_v38 = vshll.u32 %v1040_v14, 16 }
  0x6c   : > { %v944_v36 = vmax.bf16 %v902_v4, %v808_v25  ;;  %v750_v27 = vrot.slane %v748_v30, 4  ;;  %v589_v18 = vrot.slane %v587_v24, 5  ;;  %v757_v43 = vshll.u32 %v1056_v29, 16 }
  0x6d   : > { %v639_v39 = vmax.bf16 %v1047_v21, %v622_v41  ;;  %v584_v40 = vor.u32 %v583_v34, %v580_v28  ;;  %v911_v44 = vrot.slane %v910_v22, 4  ;;  %v753_v33 = vrot.slane %v751_v38, 5 }
  0x6e   : > { %953 = vst.msk [vmem:[%s1345_s28 + $0x14] sm:$0xf] %vm947_vm3, %v944_v36  ;;  %v918_v45 = vshrl.u32 %v1064_v35, 16  ;;  %v921_v46 = vshll.u32 %v1064_v35, 16  ;;  %v759_v57 = vrot.slane %v757_v43, 5  ;;  %v927_v0 = vshll.u32 %v1080_v52, 16 }
  0x6f   : > { %v775_v1 = vmax.bf16 %v746_v37, %v639_v39  ;;  %v585_v47 = vrot.slane %v584_v40, 4  ;;  %v754_v51 = vor.u32 %v753_v33, %v750_v27  ;;  %v916_v58 = vsel %vm1273_vm2, %v911_v44, %v915_v31 }
  0x70   : > { %v920_v53 = vrot.slane %v918_v45, 4  ;;  %v923_v55 = vrot.slane %v921_v46, 5  ;;  %v929_v4 = vrot.slane %v927_v0, 5 }
  0x71   : > { %v792_v56 = vmax.bf16 %v1471_v54, %v775_v1  ;;  %v590_v42 = vsel %vm1273_vm2, %v585_v47, %v589_v18  ;;  %v755_v61 = vrot.slane %v754_v51, 4 }
  0x72   : > { %v606_v60 = vmax.bf16 %v590_v42, %v467_v32  ;;  %v924_v63 = vor.u32 %v923_v55, %v920_v53 }
  0x73   : > { %v809_v62 = vmax.bf16 %v1071_v48, %v792_v56  ;;  %v760_v54 = vsel %vm1273_vm2, %v755_v61, %v759_v57 }
  0x74   : > { %v623_v2 = vmax.bf16 %v1040_v14, %v606_v60  ;;  %v925_v5 = vrot.slane %v924_v63, 4 }
  0x75   : > { %v945_v49 = vmax.bf16 %v916_v58, %v809_v62 }
  0x76   : > { %v640_v3 = vmax.bf16 %v1048_v50, %v623_v2  ;;  %v930_v10 = vsel %vm1273_vm2, %v925_v5, %v929_v4 }
  0x77   : > { %954 = vst.msk [vmem:[%s1345_s28 + $0x18] sm:$0xf] %vm947_vm3, %v945_v49 }
  0x78   : > { %v776_v6 = vmax.bf16 %v760_v54, %v640_v3 }
  0x7a   : > { %v793_v9 = vmax.bf16 %v1064_v35, %v776_v6 }
  0x7c   : > { %v810_v11 = vmax.bf16 %v1072_v7, %v793_v9 }
  0x7e   : > { %v946_v12 = vmax.bf16 %v930_v10, %v810_v11 }
  0x80   : > { %955 = vst.msk [vmem:[%s1345_s28 + $0x1c] sm:$0xf] %vm947_vm3, %v946_v12 }
  0x81 PF: > { %p8_p9 = scmp.ge.s32.totalorder %s1162_s10, 4   ;;  %s1533_s6 = smov %s1129_s7 }
  0x82   : > { %s1534_s7 = smov %s1171_s13  ;;  %s1535_s8 = smov %s1162_s10 }
  0x83   :  { %10 = sbr.rel (!%p8_p9) target bundleno = 2 (0x2), region = 105 }

// kernel: _lambda_.27
= control target key start
LH: loop header
LB: loop body
LE: loop exit
PB: predicated region body
PF: predicated region fallthrough
CT: control target
= control target key end

     0   :  { %s721_s1 = inlined_call_operand.vmem [shape: bf16[128,128], index: 1, kind: input, shape index: {}]   ;;  %s722_s0 = inlined_call_operand.vmem [shape: bf16[128,128], index: 0, kind: input, shape index: {}]   ;;  %s723_s2 = inlined_call_operand.vmem [shape: f32[1,128], index: 2, kind: input, shape index: {}]   ;;  %s724_s3 = inlined_call_operand.vmem [shape: bf16[128,128], index: 3, kind: output, shape index: {}]  }
   0x1   :  { %v610_v0 = vld [vmem:[%s721_s1] sm:$0xff]   ;;  %v611_v1 = vld [vmem:[%s721_s1 + $0x8] sm:$0xff]   ;;  %v612_v2 = vld [vmem:[%s721_s1 + $0x10] sm:$0xff]  }
   0x2   :  { %562 = vmatprep.subr.bf16.mxu0 %v610_v0  ;;  %594 = vmatprep.subr.bf16.mxu1 %v610_v0  ;;  %v613_v3 = vld [vmem:[%s721_s1 + $0x18] sm:$0xff]   ;;  %v618_v4 = vld [vmem:[%s722_s0] sm:$0xff]   ;;  %v615_v7 = vld [vmem:[%s721_s1 + $0x28] sm:$0xff]  }
   0x3   :  { %563 = vmatpush3.bf16.msra.mxu0 %v610_v0  ;;  %602 = vmatpush3.bf16.msra.mxu1 %v610_v0  ;;  %v619_v5 = vld [vmem:[%s722_s0 + $0x20] sm:$0xff]   ;;  %v616_v8 = vld [vmem:[%s721_s1 + $0x30] sm:$0xff]   ;;  %v617_v9 = vld [vmem:[%s721_s1 + $0x38] sm:$0xff]  }
   0x4   :  { %564 = vmatprep.subr.bf16.mxu0 %v611_v1  ;;  %595 = vmatprep.subr.bf16.mxu1 %v611_v1  ;;  %v614_v6 = vld [vmem:[%s721_s1 + $0x20] sm:$0xff]   ;;  %v620_v10 = vld [vmem:[%s722_s0 + $0x8] sm:$0xff]   ;;  %v622_v12 = vld [vmem:[%s722_s0 + $0x10] sm:$0xff]  }
   0x5   :  { %578 = vmatprep.mubr.bf16.mxu0 %v618_v4  ;;  %586 = vmatprep.mubr.bf16.mxu1 %v619_v5  ;;  %v621_v11 = vld [vmem:[%s722_s0 + $0x28] sm:$0xff]   ;;  %v623_v13 = vld [vmem:[%s722_s0 + $0x30] sm:$0xff]   ;;  %v624_v14 = vld [vmem:[%s722_s0 + $0x18] sm:$0xff]  }
   0x6   :  { %v625_v15 = vld [vmem:[%s722_s0 + $0x38] sm:$0xff]   ;;  %v466_v16 = vld [vmem:[%s723_s2] ss:$0 sm:$0xff] }
   0x7   :  { %565 = vmatpush3.bf16.msra.mxu0 %v611_v1  ;;  %603 = vmatpush3.bf16.msra.mxu1 %v611_v1 }
   0x8   :  { %566 = vmatprep.subr.bf16.mxu0 %v612_v2  ;;  %596 = vmatprep.subr.bf16.mxu1 %v612_v2 }
   0xb   :  { %567 = vmatpush3.bf16.msra.mxu0 %v612_v2  ;;  %604 = vmatpush3.bf16.msra.mxu1 %v612_v2 }
   0xc   :  { %568 = vmatprep.subr.bf16.mxu0 %v613_v3  ;;  %597 = vmatprep.subr.bf16.mxu1 %v613_v3 }
   0xf   :  { %569 = vmatpush3.bf16.msra.mxu0 %v613_v3  ;;  %605 = vmatpush3.bf16.msra.mxu1 %v613_v3 }
  0x10   :  { %570 = vmatprep.subr.bf16.mxu0 %v614_v6  ;;  %598 = vmatprep.subr.bf16.mxu1 %v614_v6 }
  0x13   :  { %571 = vmatpush3.bf16.msra.mxu0 %v614_v6  ;;  %606 = vmatpush3.bf16.msra.mxu1 %v614_v6 }
  0x14   :  { %572 = vmatprep.subr.bf16.mxu0 %v615_v7  ;;  %599 = vmatprep.subr.bf16.mxu1 %v615_v7 }
  0x17   :  { %573 = vmatpush3.bf16.msra.mxu0 %v615_v7  ;;  %607 = vmatpush3.bf16.msra.mxu1 %v615_v7 }
  0x18   :  { %574 = vmatprep.subr.bf16.mxu0 %v616_v8  ;;  %600 = vmatprep.subr.bf16.mxu1 %v616_v8 }
  0x1b   :  { %575 = vmatpush3.bf16.msra.mxu0 %v616_v8  ;;  %608 = vmatpush3.bf16.msra.mxu1 %v616_v8 }
  0x1c   :  { %576 = vmatprep.subr.bf16.mxu0 %v617_v9  ;;  %601 = vmatprep.subr.bf16.mxu1 %v617_v9 }
  0x1f   :  { %577 = vmatpush3.bf16.msra.mxu0 %v617_v9  ;;  %609 = vmatpush3.bf16.msra.mxu1 %v617_v9 }
  0x22   :  { %579 = vmatmul.mubr.bf16.vlgmr.msra.gmra.mrb[0].mxu0 %v620_v10  ;;  %587 = vmatmul.mubr.bf16.vlgmr.msra.gmra.mrb[0].mxu1 %v621_v11 }
  0x23   :  { %582 = vmatprep.mubr.bf16.mxu0 %v622_v12  ;;  %590 = vmatprep.mubr.bf16.mxu1 %v623_v13 }
  0x2a   :  { %583 = vmatmul.mubr.bf16.gmra.mrb[4].mxu0 %v624_v14  ;;  %591 = vmatmul.mubr.bf16.gmra.mrb[4].mxu1 %v625_v15 }
  0xf5   :  { %v580_v17 = vpop.f32.mrb[0].mxu0  ;;  %v588_v18 = vpop.f32.mrb[0].mxu1 }
  0xf6   :  { %v336_v19 = vadd.f32 %v580_v17, %v466_v16  ;;  %v344_v20 = vadd.f32 %v588_v18, %v466_v16  ;;  %v213_v21 = vpop.f32.mrb[1].mxu0  ;;  %v245_v22 = vpop.f32.mrb[1].mxu1 }
  0xf7   :  { %v334_v23 = vadd.f32 %v466_v16, %v213_v21  ;;  %v342_v24 = vadd.f32 %v466_v16, %v245_v22  ;;  %v581_v25 = vpop.f32.mrb[2].mxu0  ;;  %v589_v26 = vpop.f32.mrb[2].mxu1 }
  0xf8   :  { %v337_v27 = vadd.f32 %v581_v25, %v466_v16  ;;  %v345_v28 = vadd.f32 %v589_v26, %v466_v16  ;;  %v216_v29 = vpop.f32.mrb[3].mxu0  ;;  %v248_v30 = vpop.f32.mrb[3].mxu1  ;;  %v352_v33 = vmax.f32 %v336_v19, 0.0  ;;  %v360_v34 = vmax.f32 %v344_v20, 0.0 }
  0xf9   :  { %v335_v31 = vadd.f32 %v466_v16, %v216_v29  ;;  %v343_v32 = vadd.f32 %v466_v16, %v248_v30  ;;  %v350_v37 = vmax.f32 %v334_v23, 0.0  ;;  %v358_v38 = vmax.f32 %v342_v24, 0.0 }
  0xfa   :  { %v353_v35 = vmax.f32 %v337_v27, 0.0  ;;  %v361_v36 = vmax.f32 %v345_v28, 0.0 }
  0xfb   :  { %v351_v39 = vmax.f32 %v335_v31, 0.0  ;;  %v359_v40 = vmax.f32 %v343_v32, 0.0 }
  0xfc   :  { %v507_v41 = vpack.c.bf16 %v353_v35, %v352_v33  ;;  %v527_v42 = vpack.c.bf16 %v361_v36, %v360_v34 }
  0xfd   :  { %v502_v43 = vpack.c.bf16 %v351_v39, %v350_v37  ;;  %v522_v44 = vpack.c.bf16 %v359_v40, %v358_v38  ;;  %v584_v45 = vpop.f32.mrb[4].mxu0  ;;  %v592_v46 = vpop.f32.mrb[4].mxu1 }
  0xfe   :  { %539 = vst [vmem:[%s724_s3 + $0x8] sm:$0xff] %v507_v41   ;;  %543 = vst [vmem:[%s724_s3 + $0x28] sm:$0xff] %v527_v42   ;;  %v340_v47 = vadd.f32 %v584_v45, %v466_v16  ;;  %v348_v48 = vadd.f32 %v592_v46, %v466_v16  ;;  %v229_v49 = vpop.f32.mrb[5].mxu0  ;;  %v261_v50 = vpop.f32.mrb[5].mxu1 }
  0xff   :  { %503 = vst [vmem:[%s724_s3] sm:$0xff] %v502_v43   ;;  %542 = vst [vmem:[%s724_s3 + $0x20] sm:$0xff] %v522_v44   ;;  %v338_v51 = vadd.f32 %v466_v16, %v229_v49  ;;  %v346_v52 = vadd.f32 %v466_v16, %v261_v50  ;;  %v585_v53 = vpop.f32.mrb[6].mxu0  ;;  %v593_v54 = vpop.f32.mrb[6].mxu1 }
 0x100   :  { %v341_v55 = vadd.f32 %v585_v53, %v466_v16  ;;  %v349_v56 = vadd.f32 %v593_v54, %v466_v16  ;;  %v232_v57 = vpop.f32.mrb[7].mxu0  ;;  %v264_v58 = vpop.f32.mrb[7].mxu1  ;;  %v356_v61 = vmax.f32 %v340_v47, 0.0  ;;  %v364_v62 = vmax.f32 %v348_v48, 0.0 }
 0x101   :  { %v339_v59 = vadd.f32 %v466_v16, %v232_v57  ;;  %v347_v60 = vadd.f32 %v466_v16, %v264_v58  ;;  %v354_v1 = vmax.f32 %v338_v51, 0.0  ;;  %v362_v2 = vmax.f32 %v346_v52, 0.0 }
 0x102   :  { %v357_v63 = vmax.f32 %v341_v55, 0.0  ;;  %v365_v0 = vmax.f32 %v349_v56, 0.0 }
 0x103   :  { %v355_v3 = vmax.f32 %v339_v59, 0.0  ;;  %v363_v4 = vmax.f32 %v347_v60, 0.0 }
 0x104   :  { %v517_v5 = vpack.c.bf16 %v357_v63, %v356_v61  ;;  %v537_v6 = vpack.c.bf16 %v365_v0, %v364_v62 }
 0x105   :  { %v512_v7 = vpack.c.bf16 %v355_v3, %v354_v1  ;;  %v532_v8 = vpack.c.bf16 %v363_v4, %v362_v2 }
 0x106   :  { %541 = vst [vmem:[%s724_s3 + $0x18] sm:$0xff] %v517_v5   ;;  %545 = vst [vmem:[%s724_s3 + $0x38] sm:$0xff] %v537_v6  }
 0x107   :  { %540 = vst [vmem:[%s724_s3 + $0x10] sm:$0xff] %v512_v7   ;;  %544 = vst [vmem:[%s724_s3 + $0x30] sm:$0xff] %v532_v8  }

// kernel: _lambda_.28
= control target key start
LH: loop header
LB: loop body
LE: loop exit
PB: predicated region body
PF: predicated region fallthrough
CT: control target
= control target key end

     0   :  { %s1190_s12 = smov 0   ;;  %s1192_s13 = smov 0   ;;  %s1322_s0 = inlined_call_operand.vmem [shape: bf16[128,640], index: 0, kind: input, shape index: {}]   ;;  %s1323_s1 = inlined_call_operand.vmem [shape: bf16[640,128], index: 1, kind: input, shape index: {}]   ;;  %s1324_s2 = inlined_call_operand.vmem [shape: f32[1,128], index: 2, kind: input, shape index: {}]   ;;  %s1325_s3 = inlined_call_operand.vmem [shape: bf16[128,128], index: 3, kind: output, shape index: {}]  }
   0x1   :  { %s1194_s14 = smov 0   ;;  %s1196_s15 = smov 0  }
   0x2   :  { %s1198_s16 = smov 0  }
   0x3 LB: > { %s25_s17 = sadd.s32 1, %s1163_s15  ;;  %p48_p1 = scmp.ne.s32.totalorder %s1155_s13, %s1151_s12  ;;  %s1167_s16 = sphi %s1198_s16, %s13_s16   ;;  %s1163_s15 = sphi %s1196_s15, %s1329_s15   ;;  %s1159_s14 = sphi %s1194_s14, %s1328_s14   ;;  %s1155_s13 = sphi %s1192_s13, %s1327_s13   ;;  %s1151_s12 = sphi %s1190_s12, %s1326_s12  }
   0x4   : > { %p26_p0 = scmp.ge.s32.totalorder %s25_s17, 5  ;;  %p49_p2 = scmp.eq.s32.totalorder %s1167_s16, 0 }
   0x5   : > { %s41_s19 = sadd.s32 1, %s1155_s13  ;;  %p899_p5 = scmp.ge.s32.totalorder %s1167_s16, 5 }
   0x6   : > { %s1331_s17 = smov (%p26_p0, %s25_s17), 0  ;;  %p50_p3 = por %p49_p2, %p48_p1 }
   0x7   : > { %s37_s18 = ssub.s32 %s1163_s15, %s1331_s17  ;;  %162 = sbr.rel (%p899_p5) target bundleno = 28 (0x1c), region = 20 }
   0x8   : > { %p39_p4 = scmp.eq.s32.totalorder %s37_s18, 0 }
   0xa   : > { %s1225_s20 = scalar_select %p39_p4, %s1155_s13, %s41_s19  }
   0xe   : > { %165 = sbr.rel (!%p50_p3) target bundleno = 28 (0x1c), region = 24  ;;  %s167_s21 = sand.u32 (%p50_p3), 1, %s1155_s13  }
   0xf   : > { %s901_s22 = sshll.u32 (%p50_p3), %s1163_s15, 2  ;;  %s900_s23 = sshll.u32 (%p50_p3), %s167_s21, 6 }
  0x10   : > { %s1233_s26 = scalar_lea.vmem (%p50_p3), %s1322_s0, %s901_s22  ;;  %s169_s27 = scalar_lea.vmem (%p50_p3), [#allocation3], %s900_s23 }
  0x11   : > { %v190_v0 = vld [vmem:[%s1233_s26] sm:$0xf] (%p50_p3)  ;;  %v192_v1 = vld [vmem:[%s1233_s26 + $0x14] sm:$0xf] (%p50_p3)  ;;  %v194_v2 = vld [vmem:[%s1233_s26 + $0x28] sm:$0xf] (%p50_p3) }
  0x12   : > { %191 = vst [vmem:[%s169_s27] sm:$0xf] (%p50_p3), %v190_v0  ;;  %193 = vst [vmem:[%s169_s27 + $0x4] sm:$0xf] (%p50_p3), %v192_v1  ;;  %v196_v3 = vld [vmem:[%s1233_s26 + $0x3c] sm:$0xf] (%p50_p3) }
  0x13   : > { %v198_v4 = vld [vmem:[%s1233_s26 + $0x50] sm:$0xf] (%p50_p3)  ;;  %195 = vst [vmem:[%s169_s27 + $0x8] sm:$0xf] (%p50_p3), %v194_v2  ;;  %197 = vst [vmem:[%s169_s27 + $0xc] sm:$0xf] (%p50_p3), %v196_v3 }
  0x14   : > { %199 = vst [vmem:[%s169_s27 + $0x10] sm:$0xf] (%p50_p3), %v198_v4  ;;  %v200_v5 = vld [vmem:[%s1233_s26 + $0x64] sm:$0xf] (%p50_p3)  ;;  %v202_v6 = vld [vmem:[%s1233_s26 + $0x78] sm:$0xf] (%p50_p3) }
  0x15   : > { %v204_v7 = vld [vmem:[%s1233_s26 + $0x8c] sm:$0xf]  ;;  %201 = vst [vmem:[%s169_s27 + $0x14] sm:$0xf] %v200_v5  ;;  %203 = vst [vmem:[%s169_s27 + $0x18] sm:$0xf] %v202_v6 }
  0x16   : > { %205 = vst [vmem:[%s169_s27 + $0x1c] sm:$0xf] %v204_v7  ;;  %v206_v8 = vld [vmem:[%s1233_s26 + $0xa0] sm:$0xf]  ;;  %v208_v9 = vld [vmem:[%s1233_s26 + $0xb4] sm:$0xf] }
  0x17   : > { %v210_v10 = vld [vmem:[%s1233_s26 + $0xc8] sm:$0xf]  ;;  %207 = vst [vmem:[%s169_s27 + $0x20] sm:$0xf] %v206_v8  ;;  %209 = vst [vmem:[%s169_s27 + $0x24] sm:$0xf] %v208_v9 }
  0x18   : > { %211 = vst [vmem:[%s169_s27 + $0x28] sm:$0xf] %v210_v10  ;;  %v212_v11 = vld [vmem:[%s1233_s26 + $0xdc] sm:$0xf]  ;;  %v214_v12 = vld [vmem:[%s1233_s26 + $0xf0] sm:$0xf] }
  0x19   : > { %v216_v13 = vld [vmem:[%s1233_s26 + $0x104] sm:$0xf]  ;;  %213 = vst [vmem:[%s169_s27 + $0x2c] sm:$0xf] %v212_v11  ;;  %215 = vst [vmem:[%s169_s27 + $0x30] sm:$0xf] %v214_v12 }
  0x1a   : > { %217 = vst [vmem:[%s169_s27 + $0x34] sm:$0xf] %v216_v13  ;;  %v218_v14 = vld [vmem:[%s1233_s26 + $0x118] sm:$0xf]  ;;  %v220_v15 = vld [vmem:[%s1233_s26 + $0x12c] sm:$0xf] }
  0x1b   : > { %219 = vst [vmem:[%s169_s27 + $0x38] sm:$0xf] %v218_v14  ;;  %221 = vst [vmem:[%s169_s27 + $0x3c] sm:$0xf] %v220_v15 }
  0x1c PF: > { %p902_p6 = scmp.ge.s32.totalorder %s1167_s16, 1  ;;  %p287_p7 = scmp.lt.s32.totalorder %s1167_s16, 6 }
  0x1e   : > { %p288_p8 = pnand %p902_p6, %p287_p7 }
  0x1f   : > { %s294_s28 = sand.u32 (!%p288_p8), 1, %s1151_s12   ;;  %s904_s29 = sshll.u32 (!%p288_p8), %s1159_s14, 4 }
  0x20   : > { %291 = sbr.rel (%p288_p8) target bundleno = 323 (0x143), region = 69  ;;  %s903_s30 = sshll.u32 (!%p288_p8), %s294_s28, 6 }
  0x21   : > { %p333_p9 = scmp.lt.s32.totalorder (!%p288_p8), %s904_s29, 79  ;;  %s1260_s8 = scalar_lea.vmem (!%p288_p8), [#allocation3], %s903_s30 }
  0x22   : > { %p906_p10 = scmp.ne.s32.totalorder (!%p288_p8), %s1159_s14, 0 }
  0x27   : > { %s1333_s29 = smov (!%p333_p9, %s904_s29), 79  ;;  %357 = sbr.rel (%p906_p10) target bundleno = 49 (0x31), region = 77 }
  0x28   : > { %s905_s4 = sshll.u32 %s1333_s29, 2  ;;  %v1169_v16 = vmov (!%p906_p10), 0.0  }
  0x29   : > { %s1258_s7 = scalar_lea.vmem %s1323_s1, %s905_s4  ;;  %358 = vst [vmem:[#allocation2] sm:$0xff] (!%p906_p10), %v1169_v16  ;;  %359 = vst [vmem:[#allocation2 + $0x8] sm:$0xff] (!%p906_p10), %v1169_v16 }
  0x2a   : > { %360 = vst [vmem:[#allocation2 + $0x10] sm:$0xff] (!%p906_p10), %v1169_v16  ;;  %361 = vst [vmem:[#allocation2 + $0x18] sm:$0xff] (!%p906_p10), %v1169_v16 }
  0x2b   : > { %362 = vst [vmem:[#allocation2 + $0x20] sm:$0xff] (!%p906_p10), %v1169_v16  ;;  %363 = vst [vmem:[#allocation2 + $0x28] sm:$0xff] (!%p906_p10), %v1169_v16 }
  0x2c   : > { %364 = vst [vmem:[#allocation2 + $0x30] sm:$0xff] (!%p906_p10), %v1169_v16  ;;  %365 = vst [vmem:[#allocation2 + $0x38] sm:$0xff] (!%p906_p10), %v1169_v16 }
  0x2d   : > { %366 = vst [vmem:[#allocation2 + $0x40] sm:$0xff] (!%p906_p10), %v1169_v16  ;;  %367 = vst [vmem:[#allocation2 + $0x48] sm:$0xff] (!%p906_p10), %v1169_v16 }
  0x2e   : > { %368 = vst [vmem:[#allocation2 + $0x50] sm:$0xff] %v1169_v16  ;;  %369 = vst [vmem:[#allocation2 + $0x58] sm:$0xff] %v1169_v16 }
  0x2f   : > { %370 = vst [vmem:[#allocation2 + $0x60] sm:$0xff] %v1169_v16  ;;  %371 = vst [vmem:[#allocation2 + $0x68] sm:$0xff] %v1169_v16 }
  0x30   : > { %372 = vst [vmem:[#allocation2 + $0x70] sm:$0xff] %v1169_v16  ;;  %373 = vst [vmem:[#allocation2 + $0x78] sm:$0xff] %v1169_v16 }
  0x31 PF: > { %v1113_v17 = vld [vmem:[%s1258_s7] sm:$0xff]   ;;  %v1114_v18 = vld [vmem:[%s1258_s7 + $0x8] sm:$0xff]   ;;  %v1115_v19 = vld [vmem:[%s1258_s7 + $0x10] sm:$0xff]   ;;  %p923_p11 = scmp.ne.s32.totalorder %s1159_s14, 4 }
  0x32   : > { %1024 = vmatprep.subr.bf16.mxu0 %v1113_v17  ;;  %1056 = vmatprep.subr.bf16.mxu1 %v1113_v17  ;;  %v1116_v20 = vld [vmem:[%s1258_s7 + $0x18] sm:$0xff]   ;;  %v1121_v21 = vld [vmem:[%s1260_s8] sm:$0xff]   ;;  %v1118_v24 = vld [vmem:[%s1258_s7 + $0x28] sm:$0xff]  }
  0x33   : > { %1025 = vmatpush3.bf16.msra.mxu0 %v1113_v17  ;;  %1064 = vmatpush3.bf16.msra.mxu1 %v1113_v17  ;;  %v1122_v22 = vld [vmem:[%s1260_s8 + $0x20] sm:$0xff]   ;;  %v1119_v25 = vld [vmem:[%s1258_s7 + $0x30] sm:$0xff]   ;;  %v1120_v26 = vld [vmem:[%s1258_s7 + $0x38] sm:$0xff]  }
  0x34   : > { %1026 = vmatprep.subr.bf16.mxu0 %v1114_v18  ;;  %1057 = vmatprep.subr.bf16.mxu1 %v1114_v18  ;;  %v1117_v23 = vld [vmem:[%s1258_s7 + $0x20] sm:$0xff]   ;;  %v1123_v27 = vld [vmem:[%s1260_s8 + $0x8] sm:$0xff]   ;;  %v1125_v29 = vld [vmem:[%s1260_s8 + $0x10] sm:$0xff]  }
  0x35   : > { %1040 = vmatprep.mubr.bf16.mxu0 %v1121_v21  ;;  %1048 = vmatprep.mubr.bf16.mxu1 %v1122_v22  ;;  %v1124_v28 = vld [vmem:[%s1260_s8 + $0x28] sm:$0xff]   ;;  %v1126_v30 = vld [vmem:[%s1260_s8 + $0x30] sm:$0xff]   ;;  %v1127_v31 = vld [vmem:[%s1260_s8 + $0x18] sm:$0xff]  }
  0x36   : > { %v1128_v32 = vld [vmem:[%s1260_s8 + $0x38] sm:$0xff]   ;;  %v376_v33 = vld [vmem:[#allocation2 + $0x10] sm:$0xff]  ;;  %v374_v35 = vld [vmem:[#allocation2] sm:$0xff] }
  0x37   : > { %1027 = vmatpush3.bf16.msra.mxu0 %v1114_v18  ;;  %1065 = vmatpush3.bf16.msra.mxu1 %v1114_v18  ;;  %v384_v34 = vld [vmem:[#allocation2 + $0x50] sm:$0xff]  ;;  %v382_v36 = vld [vmem:[#allocation2 + $0x40] sm:$0xff]  ;;  %v377_v39 = vld [vmem:[#allocation2 + $0x18] sm:$0xff] }
  0x38   : > { %1028 = vmatprep.subr.bf16.mxu0 %v1115_v19  ;;  %1058 = vmatprep.subr.bf16.mxu1 %v1115_v19  ;;  %v385_v40 = vld [vmem:[#allocation2 + $0x58] sm:$0xff]  ;;  %v375_v45 = vld [vmem:[#allocation2 + $0x8] sm:$0xff]  ;;  %v380_v57 = vld [vmem:[#allocation2 + $0x30] sm:$0xff] }
  0x39   : > { %v383_v46 = vld [vmem:[#allocation2 + $0x48] sm:$0xff]  ;;  %v388_v58 = vld [vmem:[#allocation2 + $0x70] sm:$0xff]  ;;  %v378_v59 = vld [vmem:[#allocation2 + $0x20] sm:$0xff] }
  0x3a   : > { %v386_v60 = vld [vmem:[#allocation2 + $0x60] sm:$0xff]  ;;  %v381_v63 = vld [vmem:[#allocation2 + $0x38] sm:$0xff]  ;;  %v379_v5 = vld [vmem:[#allocation2 + $0x28] sm:$0xff] }
  0x3b   : > { %1029 = vmatpush3.bf16.msra.mxu0 %v1115_v19  ;;  %1066 = vmatpush3.bf16.msra.mxu1 %v1115_v19  ;;  %v389_v0 = vld [vmem:[#allocation2 + $0x78] sm:$0xff]  ;;  %v387_v6 = vld [vmem:[#allocation2 + $0x68] sm:$0xff]  ;;  %v924_v19 = vld [vmem:[%s1324_s2] ss:$0 sm:$0xff] (!%p923_p11) }
  0x3c   : > { %1030 = vmatprep.subr.bf16.mxu0 %v1116_v20  ;;  %1059 = vmatprep.subr.bf16.mxu1 %v1116_v20 }
  0x3f   : > { %1031 = vmatpush3.bf16.msra.mxu0 %v1116_v20  ;;  %1067 = vmatpush3.bf16.msra.mxu1 %v1116_v20 }
  0x40   : > { %1032 = vmatprep.subr.bf16.mxu0 %v1117_v23  ;;  %1060 = vmatprep.subr.bf16.mxu1 %v1117_v23 }
  0x43   : > { %1033 = vmatpush3.bf16.msra.mxu0 %v1117_v23  ;;  %1068 = vmatpush3.bf16.msra.mxu1 %v1117_v23 }
  0x44   : > { %1034 = vmatprep.subr.bf16.mxu0 %v1118_v24  ;;  %1061 = vmatprep.subr.bf16.mxu1 %v1118_v24 }
  0x47   : > { %1035 = vmatpush3.bf16.msra.mxu0 %v1118_v24  ;;  %1069 = vmatpush3.bf16.msra.mxu1 %v1118_v24 }
  0x48   : > { %1036 = vmatprep.subr.bf16.mxu0 %v1119_v25  ;;  %1062 = vmatprep.subr.bf16.mxu1 %v1119_v25 }
  0x4b   : > { %1037 = vmatpush3.bf16.msra.mxu0 %v1119_v25  ;;  %1070 = vmatpush3.bf16.msra.mxu1 %v1119_v25 }
  0x4c   : > { %1038 = vmatprep.subr.bf16.mxu0 %v1120_v26  ;;  %1063 = vmatprep.subr.bf16.mxu1 %v1120_v26 }
  0x4f   : > { %1039 = vmatpush3.bf16.msra.mxu0 %v1120_v26  ;;  %1071 = vmatpush3.bf16.msra.mxu1 %v1120_v26 }
  0x52   : > { %1041 = vmatmul.mubr.bf16.vlgmr.msra.gmra.mrb[0].mxu0 %v1123_v27  ;;  %1049 = vmatmul.mubr.bf16.vlgmr.msra.gmra.mrb[0].mxu1 %v1124_v28 }
  0x53   : > { %1044 = vmatprep.mubr.bf16.mxu0 %v1125_v29  ;;  %1052 = vmatprep.mubr.bf16.mxu1 %v1126_v30 }
  0x5a   : > { %1045 = vmatmul.mubr.bf16.gmra.mrb[4].mxu0 %v1127_v31  ;;  %1053 = vmatmul.mubr.bf16.gmra.mrb[4].mxu1 %v1128_v32 }
 0x125   : > { %v1042_v37 = vpop.f32.mrb[0].mxu0  ;;  %v1050_v38 = vpop.f32.mrb[0].mxu1 }
 0x126   : > { %v617_v41 = vadd.f32 %v1042_v37, %v376_v33  ;;  %v625_v42 = vadd.f32 %v1050_v38, %v384_v34  ;;  %v552_v43 = vpop.f32.mrb[1].mxu0  ;;  %v584_v44 = vpop.f32.mrb[1].mxu1 }
 0x127   : > { %v615_v47 = vadd.f32 %v552_v43, %v374_v35  ;;  %v623_v48 = vadd.f32 %v584_v44, %v382_v36  ;;  %v1043_v49 = vpop.f32.mrb[2].mxu0  ;;  %v1051_v50 = vpop.f32.mrb[2].mxu1 }
 0x128   : > { %633 = vst [vmem:[#allocation2 + $0x10] sm:$0xff] %v617_v41  ;;  %641 = vst [vmem:[#allocation2 + $0x50] sm:$0xff] %v625_v42  ;;  %v618_v51 = vadd.f32 %v1043_v49, %v377_v39  ;;  %v626_v52 = vadd.f32 %v1051_v50, %v385_v40  ;;  %v555_v53 = vpop.f32.mrb[3].mxu0  ;;  %v587_v54 = vpop.f32.mrb[3].mxu1 }
 0x129   : > { %631 = vst [vmem:[#allocation2] sm:$0xff] %v615_v47  ;;  %639 = vst [vmem:[#allocation2 + $0x40] sm:$0xff] %v623_v48  ;;  %v616_v55 = vadd.f32 %v555_v53, %v375_v45  ;;  %v624_v56 = vadd.f32 %v587_v54, %v383_v46 }
 0x12a   : > { %634 = vst [vmem:[#allocation2 + $0x18] sm:$0xff] %v618_v51  ;;  %642 = vst [vmem:[#allocation2 + $0x58] sm:$0xff] %v626_v52 }
 0x12b   : > { %632 = vst [vmem:[#allocation2 + $0x8] sm:$0xff] %v616_v55  ;;  %640 = vst [vmem:[#allocation2 + $0x48] sm:$0xff] %v624_v56 }
 0x12d   : > { %v1046_v61 = vpop.f32.mrb[4].mxu0  ;;  %v1054_v62 = vpop.f32.mrb[4].mxu1  ;;  %650 = sbr.rel (%p923_p11) target bundleno = 323 (0x143), region = 81 }
 0x12e   : > { %v621_v1 = vadd.f32 %v1046_v61, %v380_v57  ;;  %v629_v2 = vadd.f32 %v1054_v62, %v388_v58  ;;  %v568_v3 = vpop.f32.mrb[5].mxu0  ;;  %v600_v4 = vpop.f32.mrb[5].mxu1 }
 0x12f   : > { %v619_v7 = vadd.f32 %v568_v3, %v378_v59  ;;  %v627_v8 = vadd.f32 %v600_v4, %v386_v60  ;;  %v1047_v9 = vpop.f32.mrb[6].mxu0  ;;  %v1055_v10 = vpop.f32.mrb[6].mxu1  ;;  %v653_v22 = vld [vmem:[#allocation2 + $0x10] sm:$0xff] (!%p923_p11) }
 0x130   : > { %637 = vst [vmem:[#allocation2 + $0x30] sm:$0xff] %v621_v1  ;;  %645 = vst [vmem:[#allocation2 + $0x70] sm:$0xff] %v629_v2  ;;  %v622_v11 = vadd.f32 %v1047_v9, %v381_v63  ;;  %v630_v12 = vadd.f32 %v1055_v10, %v389_v0  ;;  %v571_v13 = vpop.f32.mrb[7].mxu0  ;;  %v603_v14 = vpop.f32.mrb[7].mxu1  ;;  %v651_v17 = vld [vmem:[#allocation2] sm:$0xff] (!%p923_p11)  ;;  %v676_v25 = vadd.f32 (!%p923_p11), %v924_v19, %v653_v22  ;;  %v661_v37 = vld [vmem:[#allocation2 + $0x50] sm:$0xff] (!%p923_p11) }
 0x131   : > { %635 = vst [vmem:[#allocation2 + $0x20] sm:$0xff] %v619_v7  ;;  %643 = vst [vmem:[#allocation2 + $0x60] sm:$0xff] %v627_v8  ;;  %v620_v15 = vadd.f32 %v571_v13, %v379_v5  ;;  %v628_v16 = vadd.f32 %v603_v14, %v387_v6  ;;  %v674_v20 = vadd.f32 (!%p923_p11), %v924_v19, %v651_v17  ;;  %v654_v23 = vld [vmem:[#allocation2 + $0x18] sm:$0xff] (!%p923_p11)  ;;  %v659_v35 = vld [vmem:[#allocation2 + $0x40] sm:$0xff] (!%p923_p11) }
 0x132   : > { %638 = vst [vmem:[#allocation2 + $0x38] sm:$0xff] %v622_v11  ;;  %646 = vst [vmem:[#allocation2 + $0x78] sm:$0xff] %v630_v12  ;;  %v652_v18 = vld [vmem:[#allocation2 + $0x8] sm:$0xff] (!%p923_p11)  ;;  %v677_v26 = vadd.f32 (!%p923_p11), %v924_v19, %v654_v23  ;;  %v692_v38 = vmax.f32 (!%p923_p11), %v676_v25, 0.0  ;;  %v662_v42 = vld [vmem:[#allocation2 + $0x58] sm:$0xff] (!%p923_p11)  ;;  %v682_v47 = vadd.f32 (!%p923_p11), %v924_v19, %v659_v35  ;;  %v684_v52 = vadd.f32 (!%p923_p11), %v924_v19, %v661_v37 }
 0x133   : > { %636 = vst [vmem:[#allocation2 + $0x28] sm:$0xff] %v620_v15  ;;  %644 = vst [vmem:[#allocation2 + $0x68] sm:$0xff] %v628_v16  ;;  %v675_v21 = vadd.f32 (!%p923_p11), %v924_v19, %v652_v18  ;;  %v690_v31 = vmax.f32 (!%p923_p11), %v674_v20, 0.0  ;;  %v660_v36 = vld [vmem:[#allocation2 + $0x48] sm:$0xff] (!%p923_p11)  ;;  %v685_v57 = vadd.f32 (!%p923_p11), %v924_v19, %v662_v42 }
 0x134   : > { %v693_v39 = vmax.f32 %v677_v26, 0.0  ;;  %v683_v51 = vadd.f32 %v924_v19, %v660_v36  ;;  %v698_v56 = vmax.f32 %v682_v47, 0.0  ;;  %v700_v61 = vmax.f32 %v684_v52, 0.0 }
 0x135   : > { %v691_v32 = vmax.f32 %v675_v21, 0.0  ;;  %v701_v63 = vmax.f32 %v685_v57, 0.0 }
 0x136   : > { %v969_v49 = vpack.c.bf16 %v693_v39, %v692_v38  ;;  %v699_v60 = vmax.f32 %v683_v51, 0.0 }
 0x137   : > { %v657_v29 = vld [vmem:[#allocation2 + $0x30] sm:$0xff]  ;;  %v964_v44 = vpack.c.bf16 %v691_v32, %v690_v31  ;;  %v989_v5 = vpack.c.bf16 %v701_v63, %v700_v61 }
 0x138   : > { %v655_v24 = vld [vmem:[#allocation2 + $0x20] sm:$0xff]  ;;  %v680_v34 = vadd.f32 %v924_v19, %v657_v29  ;;  %v665_v53 = vld [vmem:[#allocation2 + $0x70] sm:$0xff]  ;;  %1001 = vst [vmem:[%s1325_s3 + $0x8] sm:$0xff] %v969_v49   ;;  %v984_v3 = vpack.c.bf16 %v699_v60, %v698_v56 }
 0x139   : > { %v678_v28 = vadd.f32 %v924_v19, %v655_v24  ;;  %v658_v30 = vld [vmem:[#allocation2 + $0x38] sm:$0xff]  ;;  %v663_v43 = vld [vmem:[#allocation2 + $0x60] sm:$0xff]  ;;  %965 = vst [vmem:[%s1325_s3] sm:$0xff] %v964_v44   ;;  %v688_v1 = vadd.f32 %v924_v19, %v665_v53  ;;  %1005 = vst [vmem:[%s1325_s3 + $0x28] sm:$0xff] %v989_v5  }
 0x13a   : > { %v656_v27 = vld [vmem:[#allocation2 + $0x28] sm:$0xff]  ;;  %v681_v41 = vadd.f32 %v924_v19, %v658_v30  ;;  %v696_v46 = vmax.f32 %v680_v34, 0.0  ;;  %v666_v54 = vld [vmem:[#allocation2 + $0x78] sm:$0xff]  ;;  %v686_v58 = vadd.f32 %v924_v19, %v663_v43  ;;  %1004 = vst [vmem:[%s1325_s3 + $0x20] sm:$0xff] %v984_v3  }
 0x13b   : > { %v679_v33 = vadd.f32 %v924_v19, %v656_v27  ;;  %v694_v40 = vmax.f32 %v678_v28, 0.0  ;;  %v664_v48 = vld [vmem:[#allocation2 + $0x68] sm:$0xff]  ;;  %v689_v2 = vadd.f32 %v924_v19, %v666_v54  ;;  %v704_v6 = vmax.f32 %v688_v1, 0.0 }
 0x13c   : > { %v697_v50 = vmax.f32 %v681_v41, 0.0  ;;  %v687_v62 = vadd.f32 %v924_v19, %v664_v48  ;;  %v702_v0 = vmax.f32 %v686_v58, 0.0 }
 0x13d   : > { %v695_v45 = vmax.f32 %v679_v33, 0.0  ;;  %v705_v7 = vmax.f32 %v689_v2, 0.0 }
 0x13e   : > { %v979_v59 = vpack.c.bf16 %v697_v50, %v696_v46  ;;  %v703_v4 = vmax.f32 %v687_v62, 0.0 }
 0x13f   : > { %v974_v55 = vpack.c.bf16 %v695_v45, %v694_v40  ;;  %v999_v9 = vpack.c.bf16 %v705_v7, %v704_v6 }
 0x140   : > { %1003 = vst [vmem:[%s1325_s3 + $0x18] sm:$0xff] %v979_v59   ;;  %v994_v8 = vpack.c.bf16 %v703_v4, %v702_v0 }
 0x141   : > { %1002 = vst [vmem:[%s1325_s3 + $0x10] sm:$0xff] %v974_v55   ;;  %1007 = vst [vmem:[%s1325_s3 + $0x38] sm:$0xff] %v999_v9  }
 0x142   : > { %1006 = vst [vmem:[%s1325_s3 + $0x30] sm:$0xff] %v994_v8  }
 0x143 PF: > { %s13_s16 = sadd.s32 1, %s1167_s16   ;;  %s1326_s12 = smov %s1155_s13 }
 0x144   : > { %p10_p12 = scmp.ge.s32.totalorder %s13_s16, 7   ;;  %s1327_s13 = smov %s1225_s20 }
 0x145   : > { %s1328_s14 = smov %s1163_s15  ;;  %s1329_s15 = smov %s1331_s17 }
 0x146   :  { %12 = sbr.rel (!%p10_p12) target bundleno = 3 (0x3), region = 122 }

// kernel: _lambda_.29
= control target key start
LH: loop header
LB: loop body
LE: loop exit
PB: predicated region body
PF: predicated region fallthrough
CT: control target
= control target key end

     0   :  { %v720_v1 = vmov 0   ;;  %v457_v25 = vlaneseq  ;;  %s908_s1 = inlined_call_operand.vmem [shape: bf16[128,256], index: 1, kind: input, shape index: {}]   ;;  %s909_s0 = inlined_call_operand.vmem [shape: bf16[128,128], index: 0, kind: input, shape index: {}]   ;;  %s910_s2 = inlined_call_operand.vmem [shape: f32[1,256], index: 2, kind: input, shape index: {}]   ;;  %s911_s3 = inlined_call_operand.vmem [shape: bf16[128,256], index: 3, kind: output, shape index: {}]  }
   0x1   :  { %v688_v0 = vld [vmem:[%s908_s1 + $0x4] ss:$8 sps:$4 sm:$0xff]   ;;  %275 = vmatprep.mubr.bf16.mxu0 %v720_v1  ;;  %315 = vmatprep.mubr.bf16.mxu1 %v720_v1  ;;  %v690_v2 = vld [vmem:[%s908_s1] ss:$8 sps:$4 sm:$0xff]   ;;  %v691_v3 = vld [vmem:[%s908_s1 + $0x14] ss:$8 sps:$4 sm:$0xff]  }
   0x2   :  { %243 = vmatprep.subr.bf16.mxu0 %v688_v0  ;;  %671 = vmatprep.subr.bf16.mxu1 %v688_v0  ;;  %v693_v4 = vld [vmem:[%s908_s1 + $0x10] ss:$8 sps:$4 sm:$0xff]   ;;  %v694_v5 = vld [vmem:[%s908_s1 + $0x24] ss:$8 sps:$4 sm:$0xff]   ;;  %v696_v6 = vld [vmem:[%s908_s1 + $0x20] ss:$8 sps:$4 sm:$0xff]  }
   0x3   :  { %244 = vmatpush1.bf16.msra.mxu0 %v690_v2  ;;  %679 = vmatpush1.bf16.msra.mxu1 %v690_v2  ;;  %v697_v7 = vld [vmem:[%s908_s1 + $0x34] ss:$8 sps:$4 sm:$0xff]   ;;  %v699_v8 = vld [vmem:[%s908_s1 + $0x30] ss:$8 sps:$4 sm:$0xff]   ;;  %v700_v9 = vld [vmem:[%s908_s1 + $0x44] ss:$8 sps:$4 sm:$0xff]  }
   0x4   :  { %245 = vmatprep.subr.bf16.mxu0 %v691_v3  ;;  %672 = vmatprep.subr.bf16.mxu1 %v691_v3  ;;  %v702_v10 = vld [vmem:[%s908_s1 + $0x40] ss:$8 sps:$4 sm:$0xff]   ;;  %v703_v11 = vld [vmem:[%s908_s1 + $0x54] ss:$8 sps:$4 sm:$0xff]   ;;  %v705_v12 = vld [vmem:[%s908_s1 + $0x50] ss:$8 sps:$4 sm:$0xff]  }
   0x5   :  { %v706_v13 = vld [vmem:[%s908_s1 + $0x64] ss:$8 sps:$4 sm:$0xff]   ;;  %v708_v14 = vld [vmem:[%s908_s1 + $0x60] ss:$8 sps:$4 sm:$0xff]   ;;  %v709_v15 = vld [vmem:[%s908_s1 + $0x74] ss:$8 sps:$4 sm:$0xff]  }
   0x6   :  { %v711_v16 = vld [vmem:[%s908_s1 + $0x70] ss:$8 sps:$4 sm:$0xff]   ;;  %v712_v17 = vld [vmem:[%s909_s0] sm:$0xff]   ;;  %v714_v19 = vld [vmem:[%s909_s0 + $0x8] sm:$0xff]   ;;  %v458_v26 = vshrl.u32 %v457_v25, 7 }
   0x7   :  { %246 = vmatpush1.bf16.msra.mxu0 %v693_v4  ;;  %680 = vmatpush1.bf16.msra.mxu1 %v693_v4  ;;  %v713_v18 = vld [vmem:[%s909_s0 + $0x20] sm:$0xff]   ;;  %v715_v20 = vld [vmem:[%s909_s0 + $0x28] sm:$0xff]   ;;  %v716_v21 = vld [vmem:[%s909_s0 + $0x10] sm:$0xff]  }
   0x8   :  { %247 = vmatprep.subr.bf16.mxu0 %v694_v5  ;;  %673 = vmatprep.subr.bf16.mxu1 %v694_v5  ;;  %v717_v22 = vld [vmem:[%s909_s0 + $0x30] sm:$0xff]   ;;  %v718_v23 = vld [vmem:[%s909_s0 + $0x18] sm:$0xff]   ;;  %v459_v27 = vsub.s32 0, %v458_v26  ;;  %v455_v28 = vld [vmem:[%s910_s2] sm:$0x3]  ;;  %v463_v29 = vsub.s32 1, %v458_v26 }
   0x9   :  { %v719_v24 = vld [vmem:[%s909_s0 + $0x38] sm:$0xff]  }
   0xa   :  { %v824_v30 = vrot.slane %v455_v28, %v459_v27  ;;  %v826_v31 = vrot.slane %v455_v28, %v463_v29 }
   0xb   :  { %248 = vmatpush1.bf16.msra.mxu0 %v696_v6  ;;  %681 = vmatpush1.bf16.msra.mxu1 %v696_v6 }
   0xc   :  { %249 = vmatprep.subr.bf16.mxu0 %v697_v7  ;;  %674 = vmatprep.subr.bf16.mxu1 %v697_v7 }
   0xf   :  { %250 = vmatpush1.bf16.msra.mxu0 %v699_v8  ;;  %682 = vmatpush1.bf16.msra.mxu1 %v699_v8 }
  0x10   :  { %251 = vmatprep.subr.bf16.mxu0 %v700_v9  ;;  %675 = vmatprep.subr.bf16.mxu1 %v700_v9 }
  0x13   :  { %252 = vmatpush1.bf16.msra.mxu0 %v702_v10  ;;  %683 = vmatpush1.bf16.msra.mxu1 %v702_v10 }
  0x14   :  { %253 = vmatprep.subr.bf16.mxu0 %v703_v11  ;;  %676 = vmatprep.subr.bf16.mxu1 %v703_v11 }
  0x17   :  { %254 = vmatpush1.bf16.msra.mxu0 %v705_v12  ;;  %684 = vmatpush1.bf16.msra.mxu1 %v705_v12 }
  0x18   :  { %255 = vmatprep.subr.bf16.mxu0 %v706_v13  ;;  %677 = vmatprep.subr.bf16.mxu1 %v706_v13 }
  0x1b   :  { %256 = vmatpush1.bf16.msra.mxu0 %v708_v14  ;;  %685 = vmatpush1.bf16.msra.mxu1 %v708_v14 }
  0x1c   :  { %257 = vmatprep.subr.bf16.mxu0 %v709_v15  ;;  %678 = vmatprep.subr.bf16.mxu1 %v709_v15 }
  0x1f   :  { %258 = vmatpush1.bf16.msra.mxu0 %v711_v16  ;;  %686 = vmatpush1.bf16.msra.mxu1 %v711_v16 }
  0x22   :  { %276 = vmatmul.mubr.bf16.vlgmr.msra.gmra.mrb[0].mxu0 %v712_v17  ;;  %316 = vmatmul.mubr.bf16.vlgmr.msra.gmra.mrb[0].mxu1 %v713_v18 }
  0x23   :  { %285 = vmatprep.mubr.bf16.mxu0 %v720_v1  ;;  %325 = vmatprep.mubr.bf16.mxu1 %v720_v1 }
  0x2a   :  { %286 = vmatmul.mubr.bf16.gmra.mrb[4].mxu0 %v714_v19  ;;  %326 = vmatmul.mubr.bf16.gmra.mrb[4].mxu1 %v715_v20 }
  0x2b   :  { %295 = vmatprep.mubr.bf16.mxu0 %v720_v1  ;;  %335 = vmatprep.mubr.bf16.mxu1 %v720_v1 }
  0x32   :  { %296 = vmatmul.mubr.bf16.gmra.mrb[8].mxu0 %v716_v21  ;;  %336 = vmatmul.mubr.bf16.gmra.mrb[8].mxu1 %v717_v22 }
  0x33   :  { %305 = vmatprep.mubr.bf16.mxu0 %v720_v1  ;;  %345 = vmatprep.mubr.bf16.mxu1 %v720_v1 }
  0x3a   :  { %306 = vmatmul.mubr.bf16.gmra.mrb[12].mxu0 %v718_v23  ;;  %346 = vmatmul.mubr.bf16.gmra.mrb[12].mxu1 %v719_v24 }
  0xf5   :  { %v277_v32 = vpop.f32.mrb[0].mxu0  ;;  %v317_v33 = vpop.f32.mrb[0].mxu1 }
  0xf6   :  { %v467_v34 = vadd.f32 %v824_v30, %v277_v32  ;;  %v483_v35 = vadd.f32 %v824_v30, %v317_v33  ;;  %v279_v36 = vpop.f32.mrb[1].mxu0  ;;  %v319_v37 = vpop.f32.mrb[1].mxu1 }
  0xf7   :  { %v468_v38 = vadd.f32 %v826_v31, %v279_v36  ;;  %v484_v39 = vadd.f32 %v826_v31, %v319_v37  ;;  %v281_v40 = vpop.f32.mrb[2].mxu0  ;;  %v321_v41 = vpop.f32.mrb[2].mxu1 }
  0xf8   :  { %v469_v42 = vadd.f32 %v824_v30, %v281_v40  ;;  %v485_v43 = vadd.f32 %v824_v30, %v321_v41  ;;  %v283_v44 = vpop.f32.mrb[3].mxu0  ;;  %v323_v45 = vpop.f32.mrb[3].mxu1 }
  0xf9   :  { %v655_v46 = vpack.c.bf16 %v468_v38, %v467_v34  ;;  %v663_v47 = vpack.c.bf16 %v484_v39, %v483_v35  ;;  %v470_v48 = vadd.f32 %v826_v31, %v283_v44  ;;  %v486_v49 = vadd.f32 %v826_v31, %v323_v45 }
  0xfb   :  { %595 = vst [vmem:[%s911_s3] sm:$0xff] %v655_v46  ;;  %603 = vst [vmem:[%s911_s3 + $0x40] sm:$0xff] %v663_v47  ;;  %v656_v50 = vpack.c.bf16 %v470_v48, %v469_v42  ;;  %v664_v51 = vpack.c.bf16 %v486_v49, %v485_v43 }
  0xfd   :  { %596 = vst [vmem:[%s911_s3 + $0x8] sm:$0xff] %v656_v50  ;;  %604 = vst [vmem:[%s911_s3 + $0x48] sm:$0xff] %v664_v51  ;;  %v287_v52 = vpop.f32.mrb[4].mxu0  ;;  %v327_v53 = vpop.f32.mrb[4].mxu1 }
  0xfe   :  { %v471_v54 = vadd.f32 %v824_v30, %v287_v52  ;;  %v487_v55 = vadd.f32 %v824_v30, %v327_v53  ;;  %v289_v56 = vpop.f32.mrb[5].mxu0  ;;  %v329_v57 = vpop.f32.mrb[5].mxu1 }
  0xff   :  { %v472_v58 = vadd.f32 %v826_v31, %v289_v56  ;;  %v488_v59 = vadd.f32 %v826_v31, %v329_v57  ;;  %v291_v60 = vpop.f32.mrb[6].mxu0  ;;  %v331_v61 = vpop.f32.mrb[6].mxu1 }
 0x100   :  { %v473_v62 = vadd.f32 %v824_v30, %v291_v60  ;;  %v489_v63 = vadd.f32 %v824_v30, %v331_v61  ;;  %v293_v0 = vpop.f32.mrb[7].mxu0  ;;  %v333_v1 = vpop.f32.mrb[7].mxu1 }
 0x101   :  { %v657_v2 = vpack.c.bf16 %v472_v58, %v471_v54  ;;  %v665_v3 = vpack.c.bf16 %v488_v59, %v487_v55  ;;  %v474_v4 = vadd.f32 %v826_v31, %v293_v0  ;;  %v490_v5 = vadd.f32 %v826_v31, %v333_v1 }
 0x103   :  { %597 = vst [vmem:[%s911_s3 + $0x10] sm:$0xff] %v657_v2  ;;  %605 = vst [vmem:[%s911_s3 + $0x50] sm:$0xff] %v665_v3  ;;  %v658_v6 = vpack.c.bf16 %v474_v4, %v473_v62  ;;  %v666_v7 = vpack.c.bf16 %v490_v5, %v489_v63 }
 0x105   :  { %598 = vst [vmem:[%s911_s3 + $0x18] sm:$0xff] %v658_v6  ;;  %606 = vst [vmem:[%s911_s3 + $0x58] sm:$0xff] %v666_v7  ;;  %v297_v8 = vpop.f32.mrb[8].mxu0  ;;  %v337_v9 = vpop.f32.mrb[8].mxu1 }
 0x106   :  { %v475_v10 = vadd.f32 %v824_v30, %v297_v8  ;;  %v491_v11 = vadd.f32 %v824_v30, %v337_v9  ;;  %v299_v12 = vpop.f32.mrb[9].mxu0  ;;  %v339_v13 = vpop.f32.mrb[9].mxu1 }
 0x107   :  { %v476_v14 = vadd.f32 %v826_v31, %v299_v12  ;;  %v492_v15 = vadd.f32 %v826_v31, %v339_v13  ;;  %v301_v16 = vpop.f32.mrb[10].mxu0  ;;  %v341_v17 = vpop.f32.mrb[10].mxu1 }
 0x108   :  { %v477_v18 = vadd.f32 %v824_v30, %v301_v16  ;;  %v493_v19 = vadd.f32 %v824_v30, %v341_v17  ;;  %v303_v20 = vpop.f32.mrb[11].mxu0  ;;  %v343_v21 = vpop.f32.mrb[11].mxu1 }
 0x109   :  { %v659_v22 = vpack.c.bf16 %v476_v14, %v475_v10  ;;  %v667_v23 = vpack.c.bf16 %v492_v15, %v491_v11  ;;  %v478_v24 = vadd.f32 %v826_v31, %v303_v20  ;;  %v494_v25 = vadd.f32 %v826_v31, %v343_v21 }
 0x10b   :  { %599 = vst [vmem:[%s911_s3 + $0x20] sm:$0xff] %v659_v22  ;;  %607 = vst [vmem:[%s911_s3 + $0x60] sm:$0xff] %v667_v23  ;;  %v660_v26 = vpack.c.bf16 %v478_v24, %v477_v18  ;;  %v668_v27 = vpack.c.bf16 %v494_v25, %v493_v19 }
 0x10d   :  { %600 = vst [vmem:[%s911_s3 + $0x28] sm:$0xff] %v660_v26  ;;  %608 = vst [vmem:[%s911_s3 + $0x68] sm:$0xff] %v668_v27  ;;  %v307_v28 = vpop.f32.mrb[12].mxu0  ;;  %v347_v29 = vpop.f32.mrb[12].mxu1 }
 0x10e   :  { %v479_v32 = vadd.f32 %v824_v30, %v307_v28  ;;  %v495_v33 = vadd.f32 %v824_v30, %v347_v29  ;;  %v309_v34 = vpop.f32.mrb[13].mxu0  ;;  %v349_v35 = vpop.f32.mrb[13].mxu1 }
 0x10f   :  { %v480_v36 = vadd.f32 %v826_v31, %v309_v34  ;;  %v496_v37 = vadd.f32 %v826_v31, %v349_v35  ;;  %v311_v38 = vpop.f32.mrb[14].mxu0  ;;  %v351_v39 = vpop.f32.mrb[14].mxu1 }
 0x110   :  { %v481_v40 = vadd.f32 %v824_v30, %v311_v38  ;;  %v497_v41 = vadd.f32 %v824_v30, %v351_v39  ;;  %v313_v42 = vpop.f32.mrb[15].mxu0  ;;  %v353_v43 = vpop.f32.mrb[15].mxu1 }
 0x111   :  { %v661_v44 = vpack.c.bf16 %v480_v36, %v479_v32  ;;  %v669_v45 = vpack.c.bf16 %v496_v37, %v495_v33  ;;  %v482_v46 = vadd.f32 %v826_v31, %v313_v42  ;;  %v498_v47 = vadd.f32 %v826_v31, %v353_v43 }
 0x113   :  { %601 = vst [vmem:[%s911_s3 + $0x30] sm:$0xff] %v661_v44  ;;  %609 = vst [vmem:[%s911_s3 + $0x70] sm:$0xff] %v669_v45  ;;  %v662_v48 = vpack.c.bf16 %v482_v46, %v481_v40  ;;  %v670_v49 = vpack.c.bf16 %v498_v47, %v497_v41 }
 0x115   :  { %602 = vst [vmem:[%s911_s3 + $0x38] sm:$0xff] %v662_v48  ;;  %610 = vst [vmem:[%s911_s3 + $0x78] sm:$0xff] %v670_v49 }

// kernel: _lambda_.31
= control target key start
LH: loop header
LB: loop body
LE: loop exit
PB: predicated region body
PF: predicated region fallthrough
CT: control target
= control target key end

     0   :  { %s939_s1 = inlined_call_operand.vmem [shape: bf16[256,128], index: 1, kind: input, shape index: {}]   ;;  %s940_s0 = inlined_call_operand.vmem [shape: bf16[128,256], index: 0, kind: input, shape index: {}]   ;;  %s941_s2 = inlined_call_operand.vmem [shape: f32[1,128], index: 2, kind: input, shape index: {}]   ;;  %s942_s3 = inlined_call_operand.vmem [shape: bf16[128,128], index: 3, kind: output, shape index: {}]  }
   0x1   :  { %v738_v0 = vld [vmem:[%s939_s1 + $0x40] sm:$0xff]   ;;  %v740_v2 = vld [vmem:[%s939_s1 + $0x48] sm:$0xff]   ;;  %v742_v4 = vld [vmem:[%s939_s1 + $0x50] sm:$0xff]  }
   0x2   :  { %v739_v1 = vld [vmem:[%s939_s1] sm:$0xff]   ;;  %658 = vmatprep.subr.bf16.mxu0 %v738_v0  ;;  %722 = vmatprep.subr.bf16.mxu1 %v738_v0  ;;  %v741_v3 = vld [vmem:[%s939_s1 + $0x8] sm:$0xff]   ;;  %v743_v5 = vld [vmem:[%s939_s1 + $0x10] sm:$0xff]  }
   0x3   :  { %659 = vmatpush3.bf16.msra.mxu0 %v739_v1  ;;  %730 = vmatpush3.bf16.msra.mxu1 %v739_v1  ;;  %v744_v6 = vld [vmem:[%s939_s1 + $0x58] sm:$0xff]   ;;  %v746_v8 = vld [vmem:[%s939_s1 + $0x60] sm:$0xff]   ;;  %v748_v10 = vld [vmem:[%s939_s1 + $0x68] sm:$0xff]  }
   0x4   :  { %660 = vmatprep.subr.bf16.mxu0 %v740_v2  ;;  %723 = vmatprep.subr.bf16.mxu1 %v740_v2  ;;  %v745_v7 = vld [vmem:[%s939_s1 + $0x18] sm:$0xff]   ;;  %v747_v9 = vld [vmem:[%s939_s1 + $0x20] sm:$0xff]   ;;  %v749_v13 = vld [vmem:[%s939_s1 + $0x28] sm:$0xff]  }
   0x5   :  { %v756_v11 = vld [vmem:[%s940_s0 + $0x4] ss:$8 sps:$4 sm:$0xff]   ;;  %v750_v14 = vld [vmem:[%s939_s1 + $0x70] sm:$0xff]   ;;  %v752_v16 = vld [vmem:[%s939_s1 + $0x78] sm:$0xff]  }
   0x6   :  { %v759_v12 = vld [vmem:[%s940_s0 + $0x44] ss:$8 sps:$4 sm:$0xff]   ;;  %307 = vmatprep.mubr.bf16.mxu0 %v756_v11  ;;  %v751_v15 = vld [vmem:[%s939_s1 + $0x30] sm:$0xff]   ;;  %v753_v17 = vld [vmem:[%s939_s1 + $0x38] sm:$0xff]  }
   0x7   :  { %661 = vmatpush3.bf16.msra.mxu0 %v741_v3  ;;  %731 = vmatpush3.bf16.msra.mxu1 %v741_v3  ;;  %v754_v18 = vld [vmem:[%s940_s0] ss:$8 sps:$4 sm:$0xff]   ;;  %v760_v20 = vld [vmem:[%s940_s0 + $0x14] ss:$8 sps:$4 sm:$0xff]   ;;  %v764_v22 = vld [vmem:[%s940_s0 + $0x10] ss:$8 sps:$4 sm:$0xff]  }
   0x8   :  { %662 = vmatprep.subr.bf16.mxu0 %v742_v4  ;;  %724 = vmatprep.subr.bf16.mxu1 %v742_v4  ;;  %v757_v19 = vld [vmem:[%s940_s0 + $0x40] ss:$8 sps:$4 sm:$0xff]   ;;  %v762_v21 = vld [vmem:[%s940_s0 + $0x54] ss:$8 sps:$4 sm:$0xff]   ;;  %v765_v23 = vld [vmem:[%s940_s0 + $0x50] ss:$8 sps:$4 sm:$0xff]  }
   0x9   :  { %339 = vmatprep.mubr.bf16.mxu1 %v759_v12  ;;  %v766_v24 = vld [vmem:[%s940_s0 + $0x24] ss:$8 sps:$4 sm:$0xff]   ;;  %v770_v26 = vld [vmem:[%s940_s0 + $0x20] ss:$8 sps:$4 sm:$0xff]   ;;  %v772_v28 = vld [vmem:[%s940_s0 + $0x34] ss:$8 sps:$4 sm:$0xff]  }
   0xa   :  { %v768_v25 = vld [vmem:[%s940_s0 + $0x64] ss:$8 sps:$4 sm:$0xff]   ;;  %v771_v27 = vld [vmem:[%s940_s0 + $0x60] ss:$8 sps:$4 sm:$0xff]   ;;  %v774_v29 = vld [vmem:[%s940_s0 + $0x74] ss:$8 sps:$4 sm:$0xff]  }
   0xb   :  { %663 = vmatpush3.bf16.msra.mxu0 %v743_v5  ;;  %732 = vmatpush3.bf16.msra.mxu1 %v743_v5  ;;  %v776_v30 = vld [vmem:[%s940_s0 + $0x30] ss:$8 sps:$4 sm:$0xff]   ;;  %v897_v35 = vld [vmem:[%s941_s2] ss:$0 sm:$0xff] }
   0xc   :  { %664 = vmatprep.subr.bf16.mxu0 %v744_v6  ;;  %725 = vmatprep.subr.bf16.mxu1 %v744_v6  ;;  %v777_v31 = vld [vmem:[%s940_s0 + $0x70] ss:$8 sps:$4 sm:$0xff]  }
   0xf   :  { %665 = vmatpush3.bf16.msra.mxu0 %v745_v7  ;;  %733 = vmatpush3.bf16.msra.mxu1 %v745_v7 }
  0x10   :  { %666 = vmatprep.subr.bf16.mxu0 %v746_v8  ;;  %726 = vmatprep.subr.bf16.mxu1 %v746_v8 }
  0x13   :  { %667 = vmatpush3.bf16.msra.mxu0 %v747_v9  ;;  %734 = vmatpush3.bf16.msra.mxu1 %v747_v9 }
  0x14   :  { %668 = vmatprep.subr.bf16.mxu0 %v748_v10  ;;  %727 = vmatprep.subr.bf16.mxu1 %v748_v10 }
  0x17   :  { %669 = vmatpush3.bf16.msra.mxu0 %v749_v13  ;;  %735 = vmatpush3.bf16.msra.mxu1 %v749_v13 }
  0x18   :  { %670 = vmatprep.subr.bf16.mxu0 %v750_v14  ;;  %728 = vmatprep.subr.bf16.mxu1 %v750_v14 }
  0x1b   :  { %671 = vmatpush3.bf16.msra.mxu0 %v751_v15  ;;  %736 = vmatpush3.bf16.msra.mxu1 %v751_v15 }
  0x1c   :  { %672 = vmatprep.subr.bf16.mxu0 %v752_v16  ;;  %729 = vmatprep.subr.bf16.mxu1 %v752_v16 }
  0x1f   :  { %673 = vmatpush3.bf16.msra.mxu0 %v753_v17  ;;  %737 = vmatpush3.bf16.msra.mxu1 %v753_v17 }
  0x22   :  { %308 = vmatmul.mubr.bf16.vlgmr.msra.gmra.mrb[0].mxu0 %v754_v18  ;;  %340 = vmatmul.mubr.bf16.vlgmr.msra.gmra.mrb[0].mxu1 %v757_v19 }
  0x23   :  { %315 = vmatprep.mubr.bf16.mxu0 %v760_v20  ;;  %347 = vmatprep.mubr.bf16.mxu1 %v762_v21 }
  0x2a   :  { %316 = vmatmul.mubr.bf16.gmra.mrb[4].mxu0 %v764_v22  ;;  %348 = vmatmul.mubr.bf16.gmra.mrb[4].mxu1 %v765_v23 }
  0x2b   :  { %323 = vmatprep.mubr.bf16.mxu0 %v766_v24  ;;  %355 = vmatprep.mubr.bf16.mxu1 %v768_v25 }
  0x32   :  { %324 = vmatmul.mubr.bf16.gmra.mrb[8].mxu0 %v770_v26  ;;  %356 = vmatmul.mubr.bf16.gmra.mrb[8].mxu1 %v771_v27 }
  0x33   :  { %331 = vmatprep.mubr.bf16.mxu0 %v772_v28  ;;  %363 = vmatprep.mubr.bf16.mxu1 %v774_v29 }
  0x3a   :  { %332 = vmatmul.mubr.bf16.gmra.mrb[12].mxu0 %v776_v30  ;;  %364 = vmatmul.mubr.bf16.gmra.mrb[12].mxu1 %v777_v31 }
  0xf5   :  { %v674_v32 = vpop.f32.mrb[0].mxu0  ;;  %v698_v33 = vpop.f32.mrb[0].mxu1 }
  0xf6   :  { %v675_v34 = vpop.f32.mrb[1].mxu0  ;;  %v699_v36 = vpop.f32.mrb[1].mxu1 }
  0xf7   :  { %v676_v37 = vadd.f32 %v675_v34, %v674_v32  ;;  %v700_v38 = vadd.f32 %v699_v36, %v698_v33  ;;  %v677_v39 = vpop.f32.mrb[2].mxu0  ;;  %v701_v40 = vpop.f32.mrb[2].mxu1 }
  0xf8   :  { %v678_v41 = vpop.f32.mrb[3].mxu0  ;;  %v702_v42 = vpop.f32.mrb[3].mxu1 }
  0xf9   :  { %v430_v43 = vadd.f32 %v676_v37, %v897_v35  ;;  %v438_v44 = vadd.f32 %v700_v38, %v897_v35  ;;  %v679_v45 = vadd.f32 %v678_v41, %v677_v39  ;;  %v703_v46 = vadd.f32 %v702_v42, %v701_v40 }
  0xfb   :  { %v431_v47 = vadd.f32 %v679_v45, %v897_v35  ;;  %v439_v48 = vadd.f32 %v703_v46, %v897_v35  ;;  %v446_v49 = vmax.f32 %v430_v43, 0.0  ;;  %v454_v50 = vmax.f32 %v438_v44, 0.0 }
  0xfd   :  { %v447_v51 = vmax.f32 %v431_v47, 0.0  ;;  %v455_v52 = vmax.f32 %v439_v48, 0.0  ;;  %v680_v53 = vpop.f32.mrb[4].mxu0  ;;  %v704_v54 = vpop.f32.mrb[4].mxu1 }
  0xfe   :  { %v681_v55 = vpop.f32.mrb[5].mxu0  ;;  %v705_v56 = vpop.f32.mrb[5].mxu1 }
  0xff   :  { %v614_v57 = vpack.c.bf16 %v447_v51, %v446_v49  ;;  %v634_v58 = vpack.c.bf16 %v455_v52, %v454_v50  ;;  %v682_v59 = vadd.f32 %v681_v55, %v680_v53  ;;  %v706_v60 = vadd.f32 %v705_v56, %v704_v54  ;;  %v683_v61 = vpop.f32.mrb[6].mxu0  ;;  %v707_v62 = vpop.f32.mrb[6].mxu1 }
 0x100   :  { %v684_v63 = vpop.f32.mrb[7].mxu0  ;;  %v708_v0 = vpop.f32.mrb[7].mxu1 }
 0x101   :  { %615 = vst [vmem:[%s942_s3] sm:$0xff] %v614_v57   ;;  %654 = vst [vmem:[%s942_s3 + $0x20] sm:$0xff] %v634_v58   ;;  %v432_v1 = vadd.f32 %v682_v59, %v897_v35  ;;  %v440_v2 = vadd.f32 %v706_v60, %v897_v35  ;;  %v685_v3 = vadd.f32 %v684_v63, %v683_v61 }
 0x102   :  { %v709_v4 = vadd.f32 %v708_v0, %v707_v62 }
 0x103   :  { %v433_v5 = vadd.f32 %v685_v3, %v897_v35  ;;  %v448_v7 = vmax.f32 %v432_v1, 0.0  ;;  %v456_v8 = vmax.f32 %v440_v2, 0.0 }
 0x104   :  { %v441_v6 = vadd.f32 %v709_v4, %v897_v35 }
 0x105   :  { %v449_v9 = vmax.f32 %v433_v5, 0.0  ;;  %v686_v11 = vpop.f32.mrb[8].mxu0  ;;  %v710_v12 = vpop.f32.mrb[8].mxu1 }
 0x106   :  { %v457_v10 = vmax.f32 %v441_v6, 0.0  ;;  %v687_v13 = vpop.f32.mrb[9].mxu0  ;;  %v711_v14 = vpop.f32.mrb[9].mxu1 }
 0x107   :  { %v619_v15 = vpack.c.bf16 %v449_v9, %v448_v7  ;;  %v688_v17 = vadd.f32 %v687_v13, %v686_v11  ;;  %v712_v18 = vadd.f32 %v711_v14, %v710_v12  ;;  %v689_v19 = vpop.f32.mrb[10].mxu0  ;;  %v713_v20 = vpop.f32.mrb[10].mxu1 }
 0x108   :  { %v639_v16 = vpack.c.bf16 %v457_v10, %v456_v8  ;;  %v690_v21 = vpop.f32.mrb[11].mxu0  ;;  %v714_v22 = vpop.f32.mrb[11].mxu1 }
 0x109   :  { %651 = vst [vmem:[%s942_s3 + $0x8] sm:$0xff] %v619_v15   ;;  %v434_v23 = vadd.f32 %v688_v17, %v897_v35  ;;  %v442_v24 = vadd.f32 %v712_v18, %v897_v35  ;;  %v691_v25 = vadd.f32 %v690_v21, %v689_v19  ;;  %v715_v26 = vadd.f32 %v714_v22, %v713_v20 }
 0x10a   :  { %655 = vst [vmem:[%s942_s3 + $0x28] sm:$0xff] %v639_v16  }
 0x10b   :  { %v435_v27 = vadd.f32 %v691_v25, %v897_v35  ;;  %v443_v28 = vadd.f32 %v715_v26, %v897_v35  ;;  %v450_v29 = vmax.f32 %v434_v23, 0.0  ;;  %v458_v30 = vmax.f32 %v442_v24, 0.0 }
 0x10d   :  { %v451_v31 = vmax.f32 %v435_v27, 0.0  ;;  %v459_v32 = vmax.f32 %v443_v28, 0.0  ;;  %v692_v33 = vpop.f32.mrb[12].mxu0  ;;  %v716_v34 = vpop.f32.mrb[12].mxu1 }
 0x10e   :  { %v693_v36 = vpop.f32.mrb[13].mxu0  ;;  %v717_v37 = vpop.f32.mrb[13].mxu1 }
 0x10f   :  { %v624_v38 = vpack.c.bf16 %v451_v31, %v450_v29  ;;  %v644_v39 = vpack.c.bf16 %v459_v32, %v458_v30  ;;  %v694_v40 = vadd.f32 %v693_v36, %v692_v33  ;;  %v718_v41 = vadd.f32 %v717_v37, %v716_v34  ;;  %v695_v42 = vpop.f32.mrb[14].mxu0  ;;  %v719_v43 = vpop.f32.mrb[14].mxu1 }
 0x110   :  { %v696_v44 = vpop.f32.mrb[15].mxu0  ;;  %v720_v45 = vpop.f32.mrb[15].mxu1 }
 0x111   :  { %652 = vst [vmem:[%s942_s3 + $0x10] sm:$0xff] %v624_v38   ;;  %656 = vst [vmem:[%s942_s3 + $0x30] sm:$0xff] %v644_v39   ;;  %v436_v46 = vadd.f32 %v694_v40, %v897_v35  ;;  %v444_v47 = vadd.f32 %v718_v41, %v897_v35  ;;  %v697_v48 = vadd.f32 %v696_v44, %v695_v42 }
 0x112   :  { %v721_v49 = vadd.f32 %v720_v45, %v719_v43 }
 0x113   :  { %v437_v50 = vadd.f32 %v697_v48, %v897_v35  ;;  %v452_v52 = vmax.f32 %v436_v46, 0.0  ;;  %v460_v53 = vmax.f32 %v444_v47, 0.0 }
 0x114   :  { %v445_v51 = vadd.f32 %v721_v49, %v897_v35 }
 0x115   :  { %v453_v54 = vmax.f32 %v437_v50, 0.0 }
 0x116   :  { %v461_v55 = vmax.f32 %v445_v51, 0.0 }
 0x117   :  { %v629_v56 = vpack.c.bf16 %v453_v54, %v452_v52 }
 0x118   :  { %v649_v57 = vpack.c.bf16 %v461_v55, %v460_v53 }
 0x119   :  { %653 = vst [vmem:[%s942_s3 + $0x18] sm:$0xff] %v629_v56  }
 0x11a   :  { %657 = vst [vmem:[%s942_s3 + $0x38] sm:$0xff] %v649_v57  }

// kernel: _lambda_.30
= control target key start
LH: loop header
LB: loop body
LE: loop exit
PB: predicated region body
PF: predicated region fallthrough
CT: control target
= control target key end

     0   :  { %v835_v1 = vmov 0   ;;  %v460_v25 = vlaneseq  ;;  %s1156_s1 = inlined_call_operand.vmem [shape: bf16[128,256], index: 1, kind: input, shape index: {}]   ;;  %s1157_s0 = inlined_call_operand.vmem [shape: bf16[128,128], index: 0, kind: input, shape index: {}]   ;;  %s1158_s2 = inlined_call_operand.vmem [shape: f32[1,256], index: 2, kind: input, shape index: {}]   ;;  %s1159_s3 = inlined_call_operand.vmem [shape: bf16[128,256], index: 3, kind: input, shape index: {}]   ;;  %s1160_s4 = inlined_call_operand.vmem [shape: bf16[128,256], index: 4, kind: output, shape index: {}]  }
   0x1   :  { %v803_v0 = vld [vmem:[%s1156_s1 + $0x4] ss:$8 sps:$4 sm:$0xff]   ;;  %278 = vmatprep.mubr.bf16.mxu0 %v835_v1  ;;  %318 = vmatprep.mubr.bf16.mxu1 %v835_v1  ;;  %v805_v2 = vld [vmem:[%s1156_s1] ss:$8 sps:$4 sm:$0xff]   ;;  %v806_v3 = vld [vmem:[%s1156_s1 + $0x14] ss:$8 sps:$4 sm:$0xff]  }
   0x2   :  { %246 = vmatprep.subr.bf16.mxu0 %v803_v0  ;;  %786 = vmatprep.subr.bf16.mxu1 %v803_v0  ;;  %v808_v4 = vld [vmem:[%s1156_s1 + $0x10] ss:$8 sps:$4 sm:$0xff]   ;;  %v809_v5 = vld [vmem:[%s1156_s1 + $0x24] ss:$8 sps:$4 sm:$0xff]   ;;  %v811_v6 = vld [vmem:[%s1156_s1 + $0x20] ss:$8 sps:$4 sm:$0xff]  }
   0x3   :  { %247 = vmatpush1.bf16.msra.mxu0 %v805_v2  ;;  %794 = vmatpush1.bf16.msra.mxu1 %v805_v2  ;;  %v812_v7 = vld [vmem:[%s1156_s1 + $0x34] ss:$8 sps:$4 sm:$0xff]   ;;  %v814_v8 = vld [vmem:[%s1156_s1 + $0x30] ss:$8 sps:$4 sm:$0xff]   ;;  %v815_v9 = vld [vmem:[%s1156_s1 + $0x44] ss:$8 sps:$4 sm:$0xff]  }
   0x4   :  { %248 = vmatprep.subr.bf16.mxu0 %v806_v3  ;;  %787 = vmatprep.subr.bf16.mxu1 %v806_v3  ;;  %v817_v10 = vld [vmem:[%s1156_s1 + $0x40] ss:$8 sps:$4 sm:$0xff]   ;;  %v818_v11 = vld [vmem:[%s1156_s1 + $0x54] ss:$8 sps:$4 sm:$0xff]   ;;  %v820_v12 = vld [vmem:[%s1156_s1 + $0x50] ss:$8 sps:$4 sm:$0xff]  }
   0x5   :  { %v821_v13 = vld [vmem:[%s1156_s1 + $0x64] ss:$8 sps:$4 sm:$0xff]   ;;  %v823_v14 = vld [vmem:[%s1156_s1 + $0x60] ss:$8 sps:$4 sm:$0xff]   ;;  %v824_v15 = vld [vmem:[%s1156_s1 + $0x74] ss:$8 sps:$4 sm:$0xff]  }
   0x6   :  { %v826_v16 = vld [vmem:[%s1156_s1 + $0x70] ss:$8 sps:$4 sm:$0xff]   ;;  %v827_v17 = vld [vmem:[%s1157_s0] sm:$0xff]   ;;  %v829_v19 = vld [vmem:[%s1157_s0 + $0x8] sm:$0xff]   ;;  %v461_v26 = vshrl.u32 %v460_v25, 7 }
   0x7   :  { %249 = vmatpush1.bf16.msra.mxu0 %v808_v4  ;;  %795 = vmatpush1.bf16.msra.mxu1 %v808_v4  ;;  %v828_v18 = vld [vmem:[%s1157_s0 + $0x20] sm:$0xff]   ;;  %v830_v20 = vld [vmem:[%s1157_s0 + $0x28] sm:$0xff]   ;;  %v831_v21 = vld [vmem:[%s1157_s0 + $0x10] sm:$0xff]  }
   0x8   :  { %250 = vmatprep.subr.bf16.mxu0 %v809_v5  ;;  %788 = vmatprep.subr.bf16.mxu1 %v809_v5  ;;  %v832_v22 = vld [vmem:[%s1157_s0 + $0x30] sm:$0xff]   ;;  %v833_v23 = vld [vmem:[%s1157_s0 + $0x18] sm:$0xff]   ;;  %v462_v27 = vsub.s32 0, %v461_v26  ;;  %v466_v28 = vsub.s32 1, %v461_v26  ;;  %v458_v29 = vld [vmem:[%s1158_s2] sm:$0x3] }
   0x9   :  { %v834_v24 = vld [vmem:[%s1157_s0 + $0x38] sm:$0xff]   ;;  %v502_v30 = vld [vmem:[%s1159_s3] sm:$0xff]  ;;  %v503_v32 = vld [vmem:[%s1159_s3 + $0x8] sm:$0xff] }
   0xa   :  { %v510_v31 = vld [vmem:[%s1159_s3 + $0x40] sm:$0xff]  ;;  %v511_v33 = vld [vmem:[%s1159_s3 + $0x48] sm:$0xff]  ;;  %v956_v34 = vrot.slane %v458_v29, %v462_v27  ;;  %v958_v35 = vrot.slane %v458_v29, %v466_v28  ;;  %v963_v36 = vld [vmem:[%s1159_s3 + $0x10] sm:$0xff]  ;;  %v518_v38 = vunpack.c.l.bf16 %v502_v30  ;;  %v519_v40 = vunpack.c.h.bf16 %v502_v30 }
   0xb   :  { %251 = vmatpush1.bf16.msra.mxu0 %v811_v6  ;;  %796 = vmatpush1.bf16.msra.mxu1 %v811_v6  ;;  %v968_v37 = vld [vmem:[%s1159_s3 + $0x50] sm:$0xff]  ;;  %v534_v39 = vunpack.c.l.bf16 %v510_v31  ;;  %v535_v41 = vunpack.c.h.bf16 %v510_v31  ;;  %v973_v42 = vld [vmem:[%s1159_s3 + $0x18] sm:$0xff]  ;;  %v520_v44 = vunpack.c.l.bf16 %v503_v32  ;;  %v536_v45 = vunpack.c.l.bf16 %v511_v33  ;;  %v983_v48 = vld [vmem:[%s1159_s3 + $0x20] sm:$0xff] }
   0xc   :  { %252 = vmatprep.subr.bf16.mxu0 %v812_v7  ;;  %789 = vmatprep.subr.bf16.mxu1 %v812_v7  ;;  %v978_v43 = vld [vmem:[%s1159_s3 + $0x58] sm:$0xff]  ;;  %v521_v46 = vunpack.c.h.bf16 %v503_v32  ;;  %v537_v47 = vunpack.c.h.bf16 %v511_v33  ;;  %v988_v49 = vld [vmem:[%s1159_s3 + $0x60] sm:$0xff]  ;;  %v522_v50 = vunpack.c.l.bf16 %v963_v36  ;;  %v538_v51 = vunpack.c.l.bf16 %v968_v37 }
   0xd   :  { %v523_v52 = vunpack.c.h.bf16 %v963_v36  ;;  %v539_v53 = vunpack.c.h.bf16 %v968_v37  ;;  %v524_v56 = vunpack.c.l.bf16 %v973_v42  ;;  %v540_v57 = vunpack.c.l.bf16 %v978_v43 }
   0xe   :  { %v525_v58 = vunpack.c.h.bf16 %v973_v42  ;;  %v541_v59 = vunpack.c.h.bf16 %v978_v43  ;;  %v526_v0 = vunpack.c.l.bf16 %v983_v48  ;;  %v527_v6 = vunpack.c.h.bf16 %v983_v48 }
   0xf   :  { %253 = vmatpush1.bf16.msra.mxu0 %v814_v8  ;;  %797 = vmatpush1.bf16.msra.mxu1 %v814_v8  ;;  %v543_v7 = vunpack.c.h.bf16 %v988_v49 }
  0x10   :  { %254 = vmatprep.subr.bf16.mxu0 %v815_v9  ;;  %790 = vmatprep.subr.bf16.mxu1 %v815_v9 }
  0x13   :  { %255 = vmatpush1.bf16.msra.mxu0 %v817_v10  ;;  %798 = vmatpush1.bf16.msra.mxu1 %v817_v10 }
  0x14   :  { %256 = vmatprep.subr.bf16.mxu0 %v818_v11  ;;  %791 = vmatprep.subr.bf16.mxu1 %v818_v11 }
  0x17   :  { %257 = vmatpush1.bf16.msra.mxu0 %v820_v12  ;;  %799 = vmatpush1.bf16.msra.mxu1 %v820_v12 }
  0x18   :  { %258 = vmatprep.subr.bf16.mxu0 %v821_v13  ;;  %792 = vmatprep.subr.bf16.mxu1 %v821_v13 }
  0x1b   :  { %259 = vmatpush1.bf16.msra.mxu0 %v823_v14  ;;  %800 = vmatpush1.bf16.msra.mxu1 %v823_v14 }
  0x1c   :  { %260 = vmatprep.subr.bf16.mxu0 %v824_v15  ;;  %793 = vmatprep.subr.bf16.mxu1 %v824_v15 }
  0x1f   :  { %261 = vmatpush1.bf16.msra.mxu0 %v826_v16  ;;  %801 = vmatpush1.bf16.msra.mxu1 %v826_v16 }
  0x22   :  { %279 = vmatmul.mubr.bf16.vlgmr.msra.gmra.mrb[0].mxu0 %v827_v17  ;;  %319 = vmatmul.mubr.bf16.vlgmr.msra.gmra.mrb[0].mxu1 %v828_v18  ;;  %v1013_v18 = vld [vmem:[%s1159_s3 + $0x28] sm:$0xff] }
  0x23   :  { %288 = vmatprep.mubr.bf16.mxu0 %v835_v1  ;;  %328 = vmatprep.mubr.bf16.mxu1 %v835_v1  ;;  %v528_v30 = vunpack.c.l.bf16 %v1013_v18 }
  0x2a   :  { %289 = vmatmul.mubr.bf16.gmra.mrb[4].mxu0 %v829_v19  ;;  %329 = vmatmul.mubr.bf16.gmra.mrb[4].mxu1 %v830_v20  ;;  %v1018_v19 = vld [vmem:[%s1159_s3 + $0x68] sm:$0xff] }
  0x2b   :  { %298 = vmatprep.mubr.bf16.mxu0 %v835_v1  ;;  %338 = vmatprep.mubr.bf16.mxu1 %v835_v1  ;;  %v544_v31 = vunpack.c.l.bf16 %v1018_v19 }
  0x32   :  { %299 = vmatmul.mubr.bf16.gmra.mrb[8].mxu0 %v831_v21  ;;  %339 = vmatmul.mubr.bf16.gmra.mrb[8].mxu1 %v832_v22 }
  0x33   :  { %308 = vmatprep.mubr.bf16.mxu0 %v835_v1  ;;  %348 = vmatprep.mubr.bf16.mxu1 %v835_v1  ;;  %v542_v1 = vunpack.c.l.bf16 %v988_v49 }
  0x3a   :  { %309 = vmatmul.mubr.bf16.gmra.mrb[12].mxu0 %v833_v23  ;;  %349 = vmatmul.mubr.bf16.gmra.mrb[12].mxu1 %v834_v24 }
  0xf5   :  { %v280_v54 = vpop.f32.mrb[0].mxu0  ;;  %v320_v55 = vpop.f32.mrb[0].mxu1 }
  0xf6   :  { %v470_v60 = vadd.f32 %v956_v34, %v280_v54  ;;  %v486_v61 = vadd.f32 %v956_v34, %v320_v55  ;;  %v282_v62 = vpop.f32.mrb[1].mxu0  ;;  %v322_v63 = vpop.f32.mrb[1].mxu1 }
  0xf7   :  { %v471_v2 = vadd.f32 %v958_v35, %v282_v62  ;;  %v487_v3 = vadd.f32 %v958_v35, %v322_v63  ;;  %v284_v4 = vpop.f32.mrb[2].mxu0  ;;  %v324_v5 = vpop.f32.mrb[2].mxu1 }
  0xf8   :  { %v550_v8 = vadd.f32 %v518_v38, %v470_v60  ;;  %v566_v9 = vadd.f32 %v534_v39, %v486_v61  ;;  %v472_v10 = vadd.f32 %v956_v34, %v284_v4  ;;  %v488_v11 = vadd.f32 %v956_v34, %v324_v5  ;;  %v286_v12 = vpop.f32.mrb[3].mxu0  ;;  %v326_v13 = vpop.f32.mrb[3].mxu1 }
  0xf9   :  { %v551_v14 = vadd.f32 %v519_v40, %v471_v2  ;;  %v567_v15 = vadd.f32 %v535_v41, %v487_v3  ;;  %v473_v16 = vadd.f32 %v958_v35, %v286_v12  ;;  %v489_v17 = vadd.f32 %v958_v35, %v326_v13 }
  0xfa   :  { %v582_v20 = vmax.f32 %v550_v8, 0.0  ;;  %v598_v21 = vmax.f32 %v566_v9, 0.0  ;;  %v552_v22 = vadd.f32 %v520_v44, %v472_v10  ;;  %v568_v23 = vadd.f32 %v536_v45, %v488_v11 }
  0xfb   :  { %v583_v24 = vmax.f32 %v551_v14, 0.0  ;;  %v599_v25 = vmax.f32 %v567_v15, 0.0  ;;  %v553_v26 = vadd.f32 %v521_v46, %v473_v16  ;;  %v569_v27 = vadd.f32 %v537_v47, %v489_v17  ;;  %v1055_v14 = vld [vmem:[%s1159_s3 + $0x30] sm:$0xff] }
  0xfc   :  { %v584_v28 = vmax.f32 %v552_v22, 0.0  ;;  %v600_v29 = vmax.f32 %v568_v23, 0.0  ;;  %v529_v46 = vunpack.c.h.bf16 %v1013_v18  ;;  %v545_v47 = vunpack.c.h.bf16 %v1018_v19  ;;  %v1060_v15 = vld [vmem:[%s1159_s3 + $0x70] sm:$0xff] }
  0xfd   :  { %v770_v32 = vpack.c.bf16 %v583_v24, %v582_v20  ;;  %v778_v33 = vpack.c.bf16 %v599_v25, %v598_v21  ;;  %v585_v38 = vmax.f32 %v553_v26, 0.0  ;;  %v601_v39 = vmax.f32 %v569_v27, 0.0  ;;  %v290_v40 = vpop.f32.mrb[4].mxu0  ;;  %v330_v41 = vpop.f32.mrb[4].mxu1 }
  0xfe   :  { %v474_v54 = vadd.f32 %v956_v34, %v290_v40  ;;  %v490_v44 = vadd.f32 %v956_v34, %v330_v41  ;;  %v292_v45 = vpop.f32.mrb[5].mxu0  ;;  %v332_v55 = vpop.f32.mrb[5].mxu1  ;;  %v530_v24 = vunpack.c.l.bf16 %v1055_v14  ;;  %v546_v25 = vunpack.c.l.bf16 %v1060_v15 }
  0xff   :  { %710 = vst [vmem:[%s1160_s4] sm:$0xff] %v770_v32  ;;  %718 = vst [vmem:[%s1160_s4 + $0x40] sm:$0xff] %v778_v33  ;;  %v771_v60 = vpack.c.bf16 %v585_v38, %v584_v28  ;;  %v779_v61 = vpack.c.bf16 %v601_v39, %v600_v29  ;;  %v475_v62 = vadd.f32 %v958_v35, %v292_v45  ;;  %v294_v2 = vpop.f32.mrb[6].mxu0  ;;  %v334_v3 = vpop.f32.mrb[6].mxu1  ;;  %v531_v43 = vunpack.c.h.bf16 %v1055_v14 }
 0x100   :  { %v491_v63 = vadd.f32 %v958_v35, %v332_v55  ;;  %v554_v4 = vadd.f32 %v522_v50, %v474_v54  ;;  %v570_v5 = vadd.f32 %v538_v51, %v490_v44  ;;  %v476_v8 = vadd.f32 %v956_v34, %v294_v2  ;;  %v296_v10 = vpop.f32.mrb[7].mxu0  ;;  %v336_v11 = vpop.f32.mrb[7].mxu1 }
 0x101   :  { %v492_v9 = vadd.f32 %v956_v34, %v334_v3  ;;  %711 = vst [vmem:[%s1160_s4 + $0x8] sm:$0xff] %v771_v60  ;;  %719 = vst [vmem:[%s1160_s4 + $0x48] sm:$0xff] %v779_v61  ;;  %v555_v50 = vadd.f32 %v523_v52, %v475_v62  ;;  %v477_v12 = vadd.f32 %v958_v35, %v296_v10 }
 0x102   :  { %v571_v51 = vadd.f32 %v539_v53, %v491_v63  ;;  %v493_v13 = vadd.f32 %v958_v35, %v336_v11  ;;  %v586_v16 = vmax.f32 %v554_v4, 0.0  ;;  %v602_v36 = vmax.f32 %v570_v5, 0.0  ;;  %v509_v4 = vld [vmem:[%s1159_s3 + $0x38] sm:$0xff] }
 0x103   :  { %v556_v37 = vadd.f32 %v524_v56, %v476_v8  ;;  %v572_v52 = vadd.f32 %v540_v57, %v492_v9  ;;  %v587_v53 = vmax.f32 %v555_v50, 0.0  ;;  %v557_v20 = vadd.f32 %v525_v58, %v477_v12  ;;  %v517_v5 = vld [vmem:[%s1159_s3 + $0x78] sm:$0xff] }
 0x104   :  { %v603_v17 = vmax.f32 %v571_v51, 0.0  ;;  %v573_v21 = vadd.f32 %v541_v59, %v493_v13  ;;  %v547_v59 = vunpack.c.h.bf16 %v1060_v15  ;;  %v532_v12 = vunpack.c.l.bf16 %v509_v4 }
 0x105   :  { %v588_v22 = vmax.f32 %v556_v37, 0.0  ;;  %v604_v23 = vmax.f32 %v572_v52, 0.0  ;;  %v772_v26 = vpack.c.bf16 %v587_v53, %v586_v16  ;;  %v589_v56 = vmax.f32 %v557_v20, 0.0  ;;  %v300_v29 = vpop.f32.mrb[8].mxu0  ;;  %v340_v57 = vpop.f32.mrb[8].mxu1 }
 0x106   :  { %v780_v27 = vpack.c.bf16 %v603_v17, %v602_v36  ;;  %v605_v28 = vmax.f32 %v573_v21, 0.0  ;;  %v478_v32 = vadd.f32 %v956_v34, %v300_v29  ;;  %v494_v42 = vadd.f32 %v956_v34, %v340_v57  ;;  %v302_v58 = vpop.f32.mrb[9].mxu0  ;;  %v342_v33 = vpop.f32.mrb[9].mxu1 }
 0x107   :  { %712 = vst [vmem:[%s1160_s4 + $0x10] sm:$0xff] %v772_v26  ;;  %v773_v38 = vpack.c.bf16 %v589_v56, %v588_v22  ;;  %v479_v40 = vadd.f32 %v958_v35, %v302_v58  ;;  %v495_v41 = vadd.f32 %v958_v35, %v342_v33  ;;  %v304_v54 = vpop.f32.mrb[10].mxu0  ;;  %v344_v44 = vpop.f32.mrb[10].mxu1  ;;  %v548_v13 = vunpack.c.l.bf16 %v517_v5 }
 0x108   :  { %720 = vst [vmem:[%s1160_s4 + $0x50] sm:$0xff] %v780_v27  ;;  %v781_v39 = vpack.c.bf16 %v605_v28, %v604_v23  ;;  %v558_v45 = vadd.f32 %v526_v0, %v478_v32  ;;  %v574_v55 = vadd.f32 %v542_v1, %v494_v42  ;;  %v480_v60 = vadd.f32 %v956_v34, %v304_v54  ;;  %v306_v62 = vpop.f32.mrb[11].mxu0  ;;  %v346_v63 = vpop.f32.mrb[11].mxu1 }
 0x109   :  { %v496_v61 = vadd.f32 %v956_v34, %v344_v44  ;;  %713 = vst [vmem:[%s1160_s4 + $0x18] sm:$0xff] %v773_v38  ;;  %v559_v0 = vadd.f32 %v527_v6, %v479_v40  ;;  %v575_v1 = vadd.f32 %v543_v7, %v495_v41  ;;  %v481_v2 = vadd.f32 %v958_v35, %v306_v62 }
 0x10a   :  { %721 = vst [vmem:[%s1160_s4 + $0x58] sm:$0xff] %v781_v39  ;;  %v497_v3 = vadd.f32 %v958_v35, %v346_v63  ;;  %v590_v8 = vmax.f32 %v558_v45, 0.0  ;;  %v606_v9 = vmax.f32 %v574_v55, 0.0  ;;  %v560_v48 = vadd.f32 %v528_v30, %v480_v60 }
 0x10b   :  { %v576_v49 = vadd.f32 %v544_v31, %v496_v61  ;;  %v591_v6 = vmax.f32 %v559_v0, 0.0  ;;  %v607_v7 = vmax.f32 %v575_v1, 0.0  ;;  %v561_v10 = vadd.f32 %v529_v46, %v481_v2 }
 0x10c   :  { %v577_v11 = vadd.f32 %v545_v47, %v497_v3  ;;  %v592_v50 = vmax.f32 %v560_v48, 0.0  ;;  %v533_v46 = vunpack.c.h.bf16 %v509_v4  ;;  %v549_v21 = vunpack.c.h.bf16 %v517_v5 }
 0x10d   :  { %v608_v51 = vmax.f32 %v576_v49, 0.0  ;;  %v774_v16 = vpack.c.bf16 %v591_v6, %v590_v8  ;;  %v782_v36 = vpack.c.bf16 %v607_v7, %v606_v9  ;;  %v593_v37 = vmax.f32 %v561_v10, 0.0  ;;  %v310_v30 = vpop.f32.mrb[12].mxu0  ;;  %v350_v53 = vpop.f32.mrb[12].mxu1 }
 0x10e   :  { %v609_v52 = vmax.f32 %v577_v11, 0.0  ;;  %v482_v31 = vadd.f32 %v956_v34, %v310_v30  ;;  %v498_v17 = vadd.f32 %v956_v34, %v350_v53  ;;  %v312_v20 = vpop.f32.mrb[13].mxu0  ;;  %v352_v18 = vpop.f32.mrb[13].mxu1 }
 0x10f   :  { %714 = vst [vmem:[%s1160_s4 + $0x20] sm:$0xff] %v774_v16  ;;  %722 = vst [vmem:[%s1160_s4 + $0x60] sm:$0xff] %v782_v36  ;;  %v775_v19 = vpack.c.bf16 %v593_v37, %v592_v50  ;;  %v483_v22 = vadd.f32 %v958_v35, %v312_v20  ;;  %v499_v23 = vadd.f32 %v958_v35, %v352_v18  ;;  %v314_v26 = vpop.f32.mrb[14].mxu0  ;;  %v354_v27 = vpop.f32.mrb[14].mxu1 }
 0x110   :  { %v783_v47 = vpack.c.bf16 %v609_v52, %v608_v51  ;;  %v562_v56 = vadd.f32 %v530_v24, %v482_v31  ;;  %v578_v28 = vadd.f32 %v546_v25, %v498_v17  ;;  %v484_v29 = vadd.f32 %v956_v34, %v314_v26  ;;  %v316_v32 = vpop.f32.mrb[15].mxu0  ;;  %v356_v42 = vpop.f32.mrb[15].mxu1 }
 0x111   :  { %v500_v57 = vadd.f32 %v956_v34, %v354_v27  ;;  %715 = vst [vmem:[%s1160_s4 + $0x28] sm:$0xff] %v775_v19  ;;  %v563_v24 = vadd.f32 %v531_v43, %v483_v22  ;;  %v579_v25 = vadd.f32 %v547_v59, %v499_v23  ;;  %v485_v58 = vadd.f32 %v958_v35, %v316_v32 }
 0x112   :  { %723 = vst [vmem:[%s1160_s4 + $0x68] sm:$0xff] %v783_v47  ;;  %v501_v34 = vadd.f32 %v958_v35, %v356_v42  ;;  %v594_v33 = vmax.f32 %v562_v56, 0.0  ;;  %v610_v38 = vmax.f32 %v578_v28, 0.0  ;;  %v564_v39 = vadd.f32 %v532_v12, %v484_v29 }
 0x113   :  { %v580_v40 = vadd.f32 %v548_v13, %v500_v57  ;;  %v595_v41 = vmax.f32 %v563_v24, 0.0  ;;  %v611_v54 = vmax.f32 %v579_v25, 0.0  ;;  %v565_v44 = vadd.f32 %v533_v46, %v485_v58 }
 0x114   :  { %v581_v45 = vadd.f32 %v549_v21, %v501_v34  ;;  %v596_v55 = vmax.f32 %v564_v39, 0.0 }
 0x115   :  { %v612_v60 = vmax.f32 %v580_v40, 0.0  ;;  %v776_v61 = vpack.c.bf16 %v595_v41, %v594_v33  ;;  %v784_v14 = vpack.c.bf16 %v611_v54, %v610_v38  ;;  %v597_v43 = vmax.f32 %v565_v44, 0.0 }
 0x116   :  { %v613_v62 = vmax.f32 %v581_v45, 0.0 }
 0x117   :  { %716 = vst [vmem:[%s1160_s4 + $0x30] sm:$0xff] %v776_v61  ;;  %724 = vst [vmem:[%s1160_s4 + $0x70] sm:$0xff] %v784_v14  ;;  %v777_v35 = vpack.c.bf16 %v597_v43, %v596_v55 }
 0x118   :  { %v785_v15 = vpack.c.bf16 %v613_v62, %v612_v60 }
 0x119   :  { %717 = vst [vmem:[%s1160_s4 + $0x38] sm:$0xff] %v777_v35 }
 0x11a   :  { %725 = vst [vmem:[%s1160_s4 + $0x78] sm:$0xff] %v785_v15 }

// kernel: _lambda_.38
= control target key start
LH: loop header
LB: loop body
LE: loop exit
PB: predicated region body
PF: predicated region fallthrough
CT: control target
= control target key end

     0   :  { %s1071_s12 = smov 0   ;;  %s1073_s13 = smov 0   ;;  %s1181_s0 = inlined_call_operand.vmem [shape: bf16[32,1152], index: 0, kind: input, shape index: {}]   ;;  %s1182_s1 = inlined_call_operand.vmem [shape: bf16[1152,128], index: 1, kind: input, shape index: {}]   ;;  %s1183_s2 = inlined_call_operand.vmem [shape: f32[1,128], index: 2, kind: input, shape index: {}]   ;;  %s1184_s3 = inlined_call_operand.vmem [shape: bf16[32,128], index: 3, kind: output, shape index: {}]  }
   0x1   :  { %s1075_s14 = smov 0   ;;  %s1077_s15 = smov 0  }
   0x2   :  { %s1079_s16 = smov 0  }
   0x3 LB: > { %s25_s17 = sadd.s32 1, %s1044_s15  ;;  %p48_p1 = scmp.ne.s32.totalorder %s1036_s13, %s1032_s12  ;;  %s1048_s16 = sphi %s1079_s16, %s13_s16   ;;  %s1044_s15 = sphi %s1077_s15, %s1188_s15   ;;  %s1040_s14 = sphi %s1075_s14, %s1187_s14   ;;  %s1036_s13 = sphi %s1073_s13, %s1186_s13   ;;  %s1032_s12 = sphi %s1071_s12, %s1185_s12  }
   0x4   : > { %p26_p0 = scmp.ge.s32.totalorder %s25_s17, 3  ;;  %p49_p2 = scmp.eq.s32.totalorder %s1048_s16, 0 }
   0x5   : > { %s41_s19 = sadd.s32 1, %s1036_s13  ;;  %p808_p5 = scmp.ge.s32.totalorder %s1048_s16, 3 }
   0x6   : > { %s1190_s17 = smov (%p26_p0, %s25_s17), 0  ;;  %p50_p3 = por %p49_p2, %p48_p1 }
   0x7   : > { %s37_s18 = ssub.s32 %s1044_s15, %s1190_s17  ;;  %162 = sbr.rel (%p808_p5) target bundleno = 23 (0x17), region = 20 }
   0x8   : > { %p39_p4 = scmp.eq.s32.totalorder %s37_s18, 0 }
   0xa   : > { %s1106_s20 = scalar_select %p39_p4, %s1036_s13, %s41_s19  }
   0xe   : > { %165 = sbr.rel (!%p50_p3) target bundleno = 23 (0x17), region = 24  ;;  %s167_s21 = sand.u32 (%p50_p3), 1, %s1036_s13  }
   0xf   : > { %s861_s22 = smul.u32 (%p50_p3), 12, %s1044_s15 }
  0x10   : > { %s935_s23 = smul.u32 (%p50_p3), 48, %s167_s21 }
  0x11   : > { %s175_s26 = scalar_lea.vmem (%p50_p3), %s1181_s0, %s861_s22 }
  0x12   : > { %v190_v0 = vld [vmem:[%s175_s26] sm:$0xff] (%p50_p3)  ;;  %v194_v2 = vld [vmem:[%s175_s26 + $0x48] sm:$0xff] (%p50_p3)  ;;  %s169_s27 = scalar_lea.vmem (%p50_p3), [#allocation3], %s935_s23  ;;  %v814_v6 = vld [vmem:[%s175_s26 + $0x50] sm:$0xf] (%p50_p3) }
  0x13   : > { %v192_v1 = vld [vmem:[%s175_s26 + $0x24] sm:$0xff] (%p50_p3)  ;;  %191 = vst [vmem:[%s169_s27] sm:$0xff] (%p50_p3), %v190_v0  ;;  %195 = vst [vmem:[%s169_s27 + $0x18] sm:$0xff] (%p50_p3), %v194_v2  ;;  %v196_v3 = vld [vmem:[%s175_s26 + $0x6c] sm:$0xff] (%p50_p3) }
  0x14   : > { %193 = vst [vmem:[%s169_s27 + $0xc] sm:$0xff] (%p50_p3), %v192_v1  ;;  %v810_v4 = vld [vmem:[%s175_s26 + $0x8] sm:$0xf] (%p50_p3)  ;;  %v812_v5 = vld [vmem:[%s175_s26 + $0x2c] sm:$0xf] (%p50_p3)  ;;  %197 = vst [vmem:[%s169_s27 + $0x24] sm:$0xff] (%p50_p3), %v196_v3 }
  0x15   : > { %811 = vst [vmem:[%s169_s27 + $0x8] sm:$0xf] %v810_v4  ;;  %813 = vst [vmem:[%s169_s27 + $0x14] sm:$0xf] %v812_v5  ;;  %v816_v7 = vld [vmem:[%s175_s26 + $0x74] sm:$0xf] }
  0x16   : > { %815 = vst [vmem:[%s169_s27 + $0x20] sm:$0xf] %v814_v6  ;;  %817 = vst [vmem:[%s169_s27 + $0x2c] sm:$0xf] %v816_v7 }
  0x17 PF: > { %p818_p6 = scmp.ge.s32.totalorder %s1048_s16, 1  ;;  %p229_p7 = scmp.lt.s32.totalorder %s1048_s16, 4 }
  0x19   : > { %p230_p8 = pnand %p818_p6, %p229_p7 }
  0x1a   : > { %s236_s28 = sand.u32 (!%p230_p8), 1, %s1032_s12   ;;  %s275_s29 = smul.u32 (!%p230_p8), 48, %s1040_s14 }
  0x1b   : > { %233 = sbr.rel (%p230_p8) target bundleno = 318 (0x13e), region = 54  ;;  %p820_p10 = scmp.ne.s32.totalorder (!%p230_p8), %s1040_s14, 0 }
  0x1c   : > { %s936_s30 = smul.u32 (!%p230_p8), 48, %s236_s28  ;;  %p276_p9 = scmp.lt.s32.totalorder (!%p230_p8), %s275_s29, 143 }
  0x1e   : > { %s1123_s8 = scalar_lea.vmem (!%p230_p8), [#allocation3], %s936_s30 }
  0x22   : > { %s1192_s29 = smov (!%p276_p9, %s275_s29), 143  ;;  %300 = sbr.rel (%p820_p10) target bundleno = 41 (0x29), region = 62 }
  0x23   : > { %s819_s4 = sshll.u32 %s1192_s29, 2  ;;  %v1050_v8 = vmov (!%p820_p10), 0.0  }
  0x24   : > { %s1121_s7 = scalar_lea.vmem %s1182_s1, %s819_s4  ;;  %301 = vst [vmem:[#allocation2] sm:$0xff] (!%p820_p10), %v1050_v8  ;;  %302 = vst [vmem:[#allocation2 + $0x8] sm:$0xff] (!%p820_p10), %v1050_v8 }
  0x25   : > { %303 = vst [vmem:[#allocation2 + $0x10] sm:$0xff] (!%p820_p10), %v1050_v8  ;;  %304 = vst [vmem:[#allocation2 + $0x18] sm:$0xff] (!%p820_p10), %v1050_v8 }
  0x29 PF: > { %v978_v9 = vld [vmem:[%s1121_s7 + $0x40] sm:$0xff]   ;;  %v981_v12 = vld [vmem:[%s1121_s7 + $0x48] sm:$0xff]   ;;  %v984_v15 = vld [vmem:[%s1121_s7 + $0x50] sm:$0xff]   ;;  %p851_p11 = scmp.ne.s32.totalorder %s1040_s14, 2 }
  0x2a   : > { %v979_v10 = vld [vmem:[%s1121_s7] sm:$0xff]   ;;  %877 = vmatprep.subr.bf16.mxu0 %v978_v9  ;;  %v982_v13 = vld [vmem:[%s1121_s7 + $0x8] sm:$0xff]   ;;  %v985_v16 = vld [vmem:[%s1121_s7 + $0x10] sm:$0xff]  }
  0x2b   : > { %v980_v11 = vld [vmem:[%s1121_s7 + $0x80] sm:$0xff]   ;;  %878 = vmatpush3.bf16.msra.mxu0 %v979_v10  ;;  %v983_v14 = vld [vmem:[%s1121_s7 + $0x88] sm:$0xff]   ;;  %v986_v17 = vld [vmem:[%s1121_s7 + $0x90] sm:$0xff]  }
  0x2c   : > { %915 = vmatprep.subr.bf16.mxu1 %v980_v11  ;;  %879 = vmatprep.subr.bf16.mxu0 %v981_v12  ;;  %v987_v18 = vld [vmem:[%s1121_s7 + $0x58] sm:$0xff]   ;;  %v990_v21 = vld [vmem:[%s1121_s7 + $0x60] sm:$0xff]   ;;  %v993_v24 = vld [vmem:[%s1121_s7 + $0x68] sm:$0xff]  }
  0x2d   : > { %916 = vmatpush3.bf16.msra.mxu1 %v980_v11  ;;  %v988_v19 = vld [vmem:[%s1121_s7 + $0x18] sm:$0xff]   ;;  %v992_v22 = vld [vmem:[%s1121_s7 + $0xa0] sm:$0xff]   ;;  %v995_v25 = vld [vmem:[%s1121_s7 + $0xa8] sm:$0xff]  }
  0x2e   : > { %917 = vmatprep.subr.bf16.mxu1 %v983_v14  ;;  %v989_v20 = vld [vmem:[%s1121_s7 + $0x98] sm:$0xff]   ;;  %v991_v23 = vld [vmem:[%s1121_s7 + $0x20] sm:$0xff]   ;;  %v994_v26 = vld [vmem:[%s1121_s7 + $0x28] sm:$0xff]  }
  0x2f   : > { %880 = vmatpush3.bf16.msra.mxu0 %v982_v13  ;;  %v996_v27 = vld [vmem:[%s1121_s7 + $0x70] sm:$0xff]   ;;  %v999_v30 = vld [vmem:[%s1121_s7 + $0x78] sm:$0xff]   ;;  %v305_v45 = vld [vmem:[#allocation2] sm:$0xff] }
  0x30   : > { %881 = vmatprep.subr.bf16.mxu0 %v984_v15  ;;  %v997_v28 = vld [vmem:[%s1121_s7 + $0x30] sm:$0xff]   ;;  %v1001_v31 = vld [vmem:[%s1121_s7 + $0xb8] sm:$0xff]   ;;  %v306_v50 = vld [vmem:[#allocation2 + $0x8] sm:$0xff] }
  0x31   : > { %918 = vmatpush3.bf16.msra.mxu1 %v983_v14  ;;  %v998_v29 = vld [vmem:[%s1121_s7 + $0xb0] sm:$0xff]   ;;  %v1000_v34 = vld [vmem:[%s1121_s7 + $0x38] sm:$0xff]   ;;  %v852_v5 = vld [vmem:[%s1183_s2] ss:$0 sm:$0xff] (!%p851_p11) }
  0x32   : > { %919 = vmatprep.subr.bf16.mxu1 %v986_v17  ;;  %v1004_v32 = vld [vmem:[%s1123_s8 + $0x4] ss:$12 sps:$4 sm:$0xff]   ;;  %v1005_v33 = vld [vmem:[%s1123_s8 + $0x8] ss:$12 sps:$4 sm:$0xff]   ;;  %v1002_v35 = vld [vmem:[%s1123_s8] ss:$12 sps:$4 sm:$0xff]  }
  0x33   : > { %882 = vmatpush3.bf16.msra.mxu0 %v985_v16  ;;  %573 = vmatprep.mubr.bf16.mxu0 %v1004_v32  ;;  %v1007_v36 = vld [vmem:[%s1123_s8 + $0x1c] ss:$12 sps:$4 sm:$0xff]   ;;  %v1006_v37 = vld [vmem:[%s1123_s8 + $0x20] ss:$12 sps:$4 sm:$0xff]   ;;  %v1009_v38 = vld [vmem:[%s1123_s8 + $0x18] ss:$12 sps:$4 sm:$0xff]  }
  0x34   : > { %883 = vmatprep.subr.bf16.mxu0 %v987_v18  ;;  %931 = vmatprep.mubr.bf16.mxu1 %v1005_v33  ;;  %v307_v59 = vld [vmem:[#allocation2 + $0x10] sm:$0xff]  ;;  %v308_v63 = vld [vmem:[#allocation2 + $0x18] sm:$0xff] }
  0x35   : > { %920 = vmatpush3.bf16.msra.mxu1 %v986_v17 }
  0x36   : > { %921 = vmatprep.subr.bf16.mxu1 %v989_v20 }
  0x37   : > { %884 = vmatpush3.bf16.msra.mxu0 %v988_v19 }
  0x38   : > { %885 = vmatprep.subr.bf16.mxu0 %v990_v21 }
  0x39   : > { %922 = vmatpush3.bf16.msra.mxu1 %v989_v20 }
  0x3a   : > { %923 = vmatprep.subr.bf16.mxu1 %v992_v22 }
  0x3b   : > { %886 = vmatpush3.bf16.msra.mxu0 %v991_v23 }
  0x3c   : > { %887 = vmatprep.subr.bf16.mxu0 %v993_v24 }
  0x3d   : > { %924 = vmatpush3.bf16.msra.mxu1 %v992_v22 }
  0x3e   : > { %925 = vmatprep.subr.bf16.mxu1 %v995_v25 }
  0x3f   : > { %888 = vmatpush3.bf16.msra.mxu0 %v994_v26 }
  0x40   : > { %889 = vmatprep.subr.bf16.mxu0 %v996_v27 }
  0x41   : > { %926 = vmatpush3.bf16.msra.mxu1 %v995_v25 }
  0x42   : > { %927 = vmatprep.subr.bf16.mxu1 %v998_v29 }
  0x43   : > { %890 = vmatpush3.bf16.msra.mxu0 %v997_v28 }
  0x44   : > { %891 = vmatprep.subr.bf16.mxu0 %v999_v30 }
  0x45   : > { %928 = vmatpush3.bf16.msra.mxu1 %v998_v29 }
  0x46   : > { %929 = vmatprep.subr.bf16.mxu1 %v1001_v31 }
  0x47   : > { %892 = vmatpush3.bf16.msra.mxu0 %v1000_v34 }
  0x49   : > { %930 = vmatpush3.bf16.msra.mxu1 %v1001_v31 }
  0x4a   : > { %574 = vmatmul.mubr.bf16.vlgmr.msra.gmra.mrb[0].mxu0 %v1002_v35 }
  0x4b   : > { %581 = vmatprep.mubr.bf16.mxu0 %v1007_v36 }
  0x4c   : > { %932 = vmatmul.mubr.bf16.vlgmr.msra.gmra.mrb[0].mxu1 %v1006_v37 }
  0x52   : > { %582 = vmatmul.mubr.bf16.gmra.mrb[4].mxu0 %v1009_v38 }
 0x11d   : > { %v893_v39 = vpop.f32.mrb[0].mxu0 }
 0x11e   : > { %v894_v40 = vpop.f32.mrb[1].mxu0 }
 0x11f   : > { %v895_v41 = vadd.f32 %v894_v40, %v893_v39  ;;  %v896_v42 = vpop.f32.mrb[2].mxu0  ;;  %v933_v43 = vpop.f32.mrb[0].mxu1 }
 0x120   : > { %v897_v44 = vpop.f32.mrb[3].mxu0  ;;  %v624_v46 = vpop.f32.mrb[1].mxu1 }
 0x121   : > { %v898_v47 = vadd.f32 %v897_v44, %v896_v42  ;;  %v625_v48 = vadd.f32 %v895_v41, %v624_v46  ;;  %v934_v49 = vpop.f32.mrb[2].mxu1 }
 0x122   : > { %v627_v51 = vpop.f32.mrb[3].mxu1 }
 0x123   : > { %v639_v52 = vadd.f32 %v625_v48, %v305_v45  ;;  %v628_v53 = vadd.f32 %v898_v47, %v627_v51 }
 0x125   : > { %643 = vst [vmem:[#allocation2] sm:$0xff] %v639_v52  ;;  %v640_v54 = vadd.f32 %v628_v53, %v306_v50  ;;  %v899_v55 = vpop.f32.mrb[4].mxu0 }
 0x126   : > { %v900_v56 = vpop.f32.mrb[5].mxu0 }
 0x127   : > { %644 = vst [vmem:[#allocation2 + $0x8] sm:$0xff] %v640_v54  ;;  %v901_v57 = vadd.f32 %v900_v56, %v899_v55  ;;  %v902_v58 = vpop.f32.mrb[6].mxu0 }
 0x128   : > { %v903_v60 = vpop.f32.mrb[7].mxu0 }
 0x129   : > { %v633_v61 = vadd.f32 %v933_v43, %v901_v57  ;;  %v904_v62 = vadd.f32 %v903_v60, %v902_v58  ;;  %650 = sbr.rel (%p851_p11) target bundleno = 318 (0x13e), region = 66 }
 0x12b   : > { %v641_v0 = vadd.f32 %v633_v61, %v307_v59  ;;  %v636_v1 = vadd.f32 %v934_v49, %v904_v62 }
 0x12c   : > { %v651_v3 = vld [vmem:[#allocation2] sm:$0xff] (!%p851_p11) }
 0x12d   : > { %645 = vst [vmem:[#allocation2 + $0x10] sm:$0xff] %v641_v0  ;;  %v642_v2 = vadd.f32 %v636_v1, %v308_v63  ;;  %v662_v6 = vadd.f32 (!%p851_p11), %v852_v5, %v651_v3 }
 0x12e   : > { %v652_v4 = vld [vmem:[#allocation2 + $0x8] sm:$0xff] (!%p851_p11) }
 0x12f   : > { %646 = vst [vmem:[#allocation2 + $0x18] sm:$0xff] %v642_v2  ;;  %v663_v7 = vadd.f32 (!%p851_p11), %v852_v5, %v652_v4  ;;  %v666_v12 = vmax.f32 (!%p851_p11), %v662_v6, 0.0 }
 0x131   : > { %v667_v13 = vmax.f32 %v663_v7, 0.0 }
 0x133   : > { %v869_v16 = vpack.c.bf16 %v667_v13, %v666_v12 }
 0x134   : > { %v653_v8 = vld [vmem:[#allocation2 + $0x10] sm:$0xff] }
 0x135   : > { %v664_v10 = vadd.f32 %v852_v5, %v653_v8  ;;  %870 = vst [vmem:[%s1184_s3] sm:$0xff] %v869_v16  }
 0x136   : > { %v654_v9 = vld [vmem:[#allocation2 + $0x18] sm:$0xff] }
 0x137   : > { %v665_v11 = vadd.f32 %v852_v5, %v654_v9  ;;  %v668_v14 = vmax.f32 %v664_v10, 0.0 }
 0x139   : > { %v669_v15 = vmax.f32 %v665_v11, 0.0 }
 0x13b   : > { %v874_v17 = vpack.c.bf16 %v669_v15, %v668_v14 }
 0x13d   : > { %876 = vst [vmem:[%s1184_s3 + $0x8] sm:$0xff] %v874_v17  }
 0x13e PF: > { %s13_s16 = sadd.s32 1, %s1048_s16   ;;  %s1185_s12 = smov %s1036_s13 }
 0x13f   : > { %p10_p12 = scmp.ge.s32.totalorder %s13_s16, 5   ;;  %s1186_s13 = smov %s1106_s20 }
 0x140   : > { %s1187_s14 = smov %s1044_s15  ;;  %s1188_s15 = smov %s1190_s17 }
 0x141   :  { %12 = sbr.rel (!%p10_p12) target bundleno = 3 (0x3), region = 113 }

// kernel: _lambda_.39
= control target key start
LH: loop header
LB: loop body
LE: loop exit
PB: predicated region body
PF: predicated region fallthrough
CT: control target
= control target key end

     0   :  { %s1188_s12 = smov 0   ;;  %s1190_s13 = smov 0   ;;  %s1382_s0 = inlined_call_operand.vmem [shape: bf16[32,256], index: 0, kind: input, shape index: {}]   ;;  %s1383_s1 = inlined_call_operand.vmem [shape: bf16[256,512], index: 1, kind: input, shape index: {}]   ;;  %s1384_s2 = inlined_call_operand.vmem [shape: f32[1,512], index: 2, kind: input, shape index: {}]   ;;  %s1385_s3 = inlined_call_operand.vmem [shape: bf16[32,512], index: 3, kind: output, shape index: {}]  }
   0x1   :  { %s1192_s14 = smov 0   ;;  %s1194_s15 = smov 0  }
   0x2   :  { %s1196_s16 = smov 0  }
   0x3 LB: > { %s28_s17 = sadd.s32 1, %s1162_s15  ;;  %s939_s18 = sadd.s32 4294967295, %s1166_s16   ;;  %s1166_s16 = sphi %s1196_s16, %s13_s16   ;;  %s1162_s15 = sphi %s1194_s15, %s1390_s15   ;;  %s1158_s14 = sphi %s1192_s14, %s1389_s14   ;;  %s1154_s13 = sphi %s1190_s13, %s1388_s13   ;;  %s1150_s12 = sphi %s1188_s12, %s1387_s12  }
   0x4   : > { %p30_p0 = scmp.ge.s32.totalorder %s28_s17, 2  ;;  %p76_p1 = scmp.ne.s32.totalorder %s1154_s13, %s1150_s12 }
   0x5   : > { %p77_p2 = scmp.eq.s32.totalorder %s1166_s16, 0  ;;  %p134_p4 = scmp.eq.s32.totalorder %s939_s18, 1 }
   0x6   : > { %s1392_s17 = smov (%p30_p0, %s28_s17), 0  ;;  %s69_s20 = sadd.s32 1, %s1154_s13 }
   0x7   : > { %p78_p3 = por %p77_p2, %p76_p1  ;;  %s65_s19 = ssub.s32 %s1162_s15, %s1392_s17 }
   0x8   : > { %p67_p5 = scmp.eq.s32.totalorder %s65_s19, 0  ;;  %p1223_p6 = por %p134_p4, %p76_p1 }
   0x9   : > { %p943_p7 = scmp.ge.s32.totalorder %s1166_s16, 2 }
   0xa   : > { %s1228_s22 = scalar_select %p67_p5, %s1154_s13, %s69_s20  }
   0xb   : > { %171 = sbr.rel (%p943_p7) target bundleno = 38 (0x26), region = 20 }
  0x12   : > { %174 = sbr.rel (!%p78_p3) target bundleno = 38 (0x26), region = 24  ;;  %s176_s23 = sand.u32 (%p78_p3), 1, %s1154_s13  }
  0x13   : > { %s996_s24 = sshll.u32 (%p78_p3), %s1162_s15, 3  ;;  %s944_s25 = sshll.u32 (%p78_p3), %s176_s23, 8 }
  0x14   : > { %s1236_s28 = scalar_lea.vmem (%p78_p3), %s1383_s1, %s996_s24  ;;  %s1241_s29 = scalar_lea.vmem (%p78_p3), [#allocation3], %s944_s25 }
  0x15   : > { %v274_v0 = vld [vmem:[%s1236_s28] sm:$0xff] (%p78_p3)  ;;  %v276_v1 = vld [vmem:[%s1236_s28 + $0x10] sm:$0xff] (%p78_p3) }
  0x16   : > { %v278_v2 = vld [vmem:[%s1236_s28 + $0x20] sm:$0xff] (%p78_p3)  ;;  %275 = vst [vmem:[%s1241_s29] sm:$0xff] (%p78_p3), %v274_v0  ;;  %277 = vst [vmem:[%s1241_s29 + $0x8] sm:$0xff] (%p78_p3), %v276_v1  ;;  %v280_v3 = vld [vmem:[%s1236_s28 + $0x30] sm:$0xff] (%p78_p3) }
  0x17   : > { %279 = vst [vmem:[%s1241_s29 + $0x10] sm:$0xff] (%p78_p3), %v278_v2  ;;  %v282_v4 = vld [vmem:[%s1236_s28 + $0x40] sm:$0xff] (%p78_p3)  ;;  %v284_v5 = vld [vmem:[%s1236_s28 + $0x50] sm:$0xff] (%p78_p3)  ;;  %281 = vst [vmem:[%s1241_s29 + $0x18] sm:$0xff] (%p78_p3), %v280_v3 }
  0x18   : > { %283 = vst [vmem:[%s1241_s29 + $0x20] sm:$0xff] (%p78_p3), %v282_v4  ;;  %285 = vst [vmem:[%s1241_s29 + $0x28] sm:$0xff] (%p78_p3), %v284_v5  ;;  %v286_v6 = vld [vmem:[%s1236_s28 + $0x60] sm:$0xff] (%p78_p3)  ;;  %v288_v7 = vld [vmem:[%s1236_s28 + $0x70] sm:$0xff] (%p78_p3) }
  0x19   : > { %v290_v8 = vld [vmem:[%s1236_s28 + $0x80] sm:$0xff]  ;;  %287 = vst [vmem:[%s1241_s29 + $0x30] sm:$0xff] %v286_v6  ;;  %289 = vst [vmem:[%s1241_s29 + $0x38] sm:$0xff] %v288_v7  ;;  %v292_v9 = vld [vmem:[%s1236_s28 + $0x90] sm:$0xff] }
  0x1a   : > { %291 = vst [vmem:[%s1241_s29 + $0x40] sm:$0xff] %v290_v8  ;;  %v294_v10 = vld [vmem:[%s1236_s28 + $0xa0] sm:$0xff]  ;;  %v296_v11 = vld [vmem:[%s1236_s28 + $0xb0] sm:$0xff]  ;;  %293 = vst [vmem:[%s1241_s29 + $0x48] sm:$0xff] %v292_v9 }
  0x1b   : > { %295 = vst [vmem:[%s1241_s29 + $0x50] sm:$0xff] %v294_v10  ;;  %297 = vst [vmem:[%s1241_s29 + $0x58] sm:$0xff] %v296_v11  ;;  %v298_v12 = vld [vmem:[%s1236_s28 + $0xc0] sm:$0xff]  ;;  %v300_v13 = vld [vmem:[%s1236_s28 + $0xd0] sm:$0xff] }
  0x1c   : > { %v302_v14 = vld [vmem:[%s1236_s28 + $0xe0] sm:$0xff]  ;;  %299 = vst [vmem:[%s1241_s29 + $0x60] sm:$0xff] %v298_v12  ;;  %301 = vst [vmem:[%s1241_s29 + $0x68] sm:$0xff] %v300_v13  ;;  %v304_v15 = vld [vmem:[%s1236_s28 + $0xf0] sm:$0xff] }
  0x1d   : > { %303 = vst [vmem:[%s1241_s29 + $0x70] sm:$0xff] %v302_v14  ;;  %v306_v16 = vld [vmem:[%s1236_s28 + $0x100] sm:$0xff]  ;;  %v308_v17 = vld [vmem:[%s1236_s28 + $0x110] sm:$0xff]  ;;  %305 = vst [vmem:[%s1241_s29 + $0x78] sm:$0xff] %v304_v15 }
  0x1e   : > { %307 = vst [vmem:[%s1241_s29 + $0x80] sm:$0xff] %v306_v16  ;;  %309 = vst [vmem:[%s1241_s29 + $0x88] sm:$0xff] %v308_v17  ;;  %v310_v18 = vld [vmem:[%s1236_s28 + $0x120] sm:$0xff]  ;;  %v312_v19 = vld [vmem:[%s1236_s28 + $0x130] sm:$0xff] }
  0x1f   : > { %v314_v20 = vld [vmem:[%s1236_s28 + $0x140] sm:$0xff]  ;;  %311 = vst [vmem:[%s1241_s29 + $0x90] sm:$0xff] %v310_v18  ;;  %313 = vst [vmem:[%s1241_s29 + $0x98] sm:$0xff] %v312_v19  ;;  %v316_v21 = vld [vmem:[%s1236_s28 + $0x150] sm:$0xff] }
  0x20   : > { %315 = vst [vmem:[%s1241_s29 + $0xa0] sm:$0xff] %v314_v20  ;;  %v318_v22 = vld [vmem:[%s1236_s28 + $0x160] sm:$0xff]  ;;  %v320_v23 = vld [vmem:[%s1236_s28 + $0x170] sm:$0xff]  ;;  %317 = vst [vmem:[%s1241_s29 + $0xa8] sm:$0xff] %v316_v21 }
  0x21   : > { %319 = vst [vmem:[%s1241_s29 + $0xb0] sm:$0xff] %v318_v22  ;;  %321 = vst [vmem:[%s1241_s29 + $0xb8] sm:$0xff] %v320_v23  ;;  %v322_v24 = vld [vmem:[%s1236_s28 + $0x180] sm:$0xff]  ;;  %v324_v25 = vld [vmem:[%s1236_s28 + $0x190] sm:$0xff] }
  0x22   : > { %v326_v26 = vld [vmem:[%s1236_s28 + $0x1a0] sm:$0xff]  ;;  %323 = vst [vmem:[%s1241_s29 + $0xc0] sm:$0xff] %v322_v24  ;;  %325 = vst [vmem:[%s1241_s29 + $0xc8] sm:$0xff] %v324_v25  ;;  %v328_v27 = vld [vmem:[%s1236_s28 + $0x1b0] sm:$0xff] }
  0x23   : > { %327 = vst [vmem:[%s1241_s29 + $0xd0] sm:$0xff] %v326_v26  ;;  %v330_v28 = vld [vmem:[%s1236_s28 + $0x1c0] sm:$0xff]  ;;  %v332_v29 = vld [vmem:[%s1236_s28 + $0x1d0] sm:$0xff]  ;;  %329 = vst [vmem:[%s1241_s29 + $0xd8] sm:$0xff] %v328_v27 }
  0x24   : > { %331 = vst [vmem:[%s1241_s29 + $0xe0] sm:$0xff] %v330_v28  ;;  %333 = vst [vmem:[%s1241_s29 + $0xe8] sm:$0xff] %v332_v29  ;;  %v334_v30 = vld [vmem:[%s1236_s28 + $0x1e0] sm:$0xff]  ;;  %v336_v31 = vld [vmem:[%s1236_s28 + $0x1f0] sm:$0xff] }
  0x25   : > { %335 = vst [vmem:[%s1241_s29 + $0xf0] sm:$0xff] %v334_v30  ;;  %337 = vst [vmem:[%s1241_s29 + $0xf8] sm:$0xff] %v336_v31 }
  0x26 PF: > { %p947_p8 = scmp.ge.s32.totalorder %s1166_s16, 1  ;;  %p350_p9 = scmp.lt.s32.totalorder %s1166_s16, 3 }
  0x28   : > { %p351_p10 = pnand %p947_p8, %p350_p9 }
  0x29   : > { %s357_s30 = sand.u32 (!%p351_p10), 1, %s1150_s12   ;;  %v1124_v32 = vld [vmem:[%s1382_s0 + $0x4] ss:$8 sps:$4 sm:$0xff] (!%p351_p10)   ;;  %v1127_v33 = vld [vmem:[%s1382_s0 + $0x14] ss:$8 sps:$4 sm:$0xff] (!%p351_p10)   ;;  %s950_s20 = sshll.u32 (!%p351_p10), %s1158_s14, 1  ;;  %v732_v4 = vlaneseq (!%p351_p10) }
  0x2a   : > { %354 = sbr.rel (%p351_p10) target bundleno = 337 (0x151), region = 66  ;;  %s948_s4 = sshll.u32 (!%p351_p10), %s357_s30, 8  ;;  %682 = vmatprep.mubr.bf16.mxu0 (!%p351_p10), %v1124_v32  ;;  %692 = vmatprep.mubr.bf16.mxu1 (!%p351_p10), %v1127_v33  ;;  %v1122_v2 = vld [vmem:[%s1382_s0] ss:$8 sps:$4 sm:$0xff] (!%p351_p10)   ;;  %v1125_v3 = vld [vmem:[%s1382_s0 + $0x10] ss:$8 sps:$4 sm:$0xff] (!%p351_p10)  }
  0x2b   : > { %s1315_s9 = scalar_lea.vmem (!%p351_p10), [#allocation3], %s948_s4  ;;  %p408_p11 = scmp.lt.s32.totalorder (!%p351_p10), %s950_s20, 3  ;;  %v733_v5 = vshrl.u32 (!%p351_p10), %v732_v4, 7 }
  0x2c   : > { %v1074_v34 = vld [vmem:[%s1315_s9 + $0x4] ss:$8 sps:$4 sm:$0xff] (!%p351_p10)   ;;  %v1076_v35 = vld [vmem:[%s1315_s9] ss:$8 sps:$4 sm:$0xff] (!%p351_p10)   ;;  %v1077_v36 = vld [vmem:[%s1315_s9 + $0x14] ss:$8 sps:$4 sm:$0xff] (!%p351_p10)  }
  0x2d   : > { %650 = vmatprep.subr.bf16.mxu0 (!%p351_p10), %v1074_v34  ;;  %1002 = vmatprep.subr.bf16.mxu1 (!%p351_p10), %v1074_v34  ;;  %v1079_v37 = vld [vmem:[%s1315_s9 + $0x10] ss:$8 sps:$4 sm:$0xff] (!%p351_p10)   ;;  %v1080_v38 = vld [vmem:[%s1315_s9 + $0x24] ss:$8 sps:$4 sm:$0xff] (!%p351_p10)   ;;  %v1082_v39 = vld [vmem:[%s1315_s9 + $0x20] ss:$8 sps:$4 sm:$0xff] (!%p351_p10)  }
  0x2e   : > { %651 = vmatpush1.bf16.msra.mxu0 (!%p351_p10), %v1076_v35  ;;  %1018 = vmatpush1.bf16.msra.mxu1 (!%p351_p10), %v1076_v35  ;;  %v1083_v40 = vld [vmem:[%s1315_s9 + $0x34] ss:$8 sps:$4 sm:$0xff] (!%p351_p10)   ;;  %v1085_v41 = vld [vmem:[%s1315_s9 + $0x30] ss:$8 sps:$4 sm:$0xff] (!%p351_p10)   ;;  %v1086_v42 = vld [vmem:[%s1315_s9 + $0x44] ss:$8 sps:$4 sm:$0xff] (!%p351_p10)  }
  0x2f   : > { %652 = vmatprep.subr.bf16.mxu0 (!%p351_p10), %v1077_v36  ;;  %1003 = vmatprep.subr.bf16.mxu1 (!%p351_p10), %v1077_v36  ;;  %v1088_v43 = vld [vmem:[%s1315_s9 + $0x40] ss:$8 sps:$4 sm:$0xff] (!%p351_p10)   ;;  %v1089_v44 = vld [vmem:[%s1315_s9 + $0x54] ss:$8 sps:$4 sm:$0xff] (!%p351_p10)   ;;  %v1091_v45 = vld [vmem:[%s1315_s9 + $0x50] ss:$8 sps:$4 sm:$0xff] (!%p351_p10)  }
  0x30   : > { %v1092_v46 = vld [vmem:[%s1315_s9 + $0x64] ss:$8 sps:$4 sm:$0xff] (!%p351_p10)   ;;  %v1094_v47 = vld [vmem:[%s1315_s9 + $0x60] ss:$8 sps:$4 sm:$0xff] (!%p351_p10)   ;;  %v1095_v48 = vld [vmem:[%s1315_s9 + $0x74] ss:$8 sps:$4 sm:$0xff] (!%p351_p10)  }
  0x31   : > { %v1097_v49 = vld [vmem:[%s1315_s9 + $0x70] ss:$8 sps:$4 sm:$0xff]   ;;  %v1098_v50 = vld [vmem:[%s1315_s9 + $0x84] ss:$8 sps:$4 sm:$0xff]   ;;  %v1100_v51 = vld [vmem:[%s1315_s9 + $0x80] ss:$8 sps:$4 sm:$0xff]  }
  0x32   : > { %653 = vmatpush1.bf16.msra.mxu0 %v1079_v37  ;;  %1019 = vmatpush1.bf16.msra.mxu1 %v1079_v37  ;;  %v1101_v52 = vld [vmem:[%s1315_s9 + $0x94] ss:$8 sps:$4 sm:$0xff]   ;;  %v1103_v53 = vld [vmem:[%s1315_s9 + $0x90] ss:$8 sps:$4 sm:$0xff]   ;;  %v1104_v54 = vld [vmem:[%s1315_s9 + $0xa4] ss:$8 sps:$4 sm:$0xff]  }
  0x33   : > { %654 = vmatprep.subr.bf16.mxu0 %v1080_v38  ;;  %1004 = vmatprep.subr.bf16.mxu1 %v1080_v38  ;;  %v1106_v55 = vld [vmem:[%s1315_s9 + $0xa0] ss:$8 sps:$4 sm:$0xff]   ;;  %v1107_v56 = vld [vmem:[%s1315_s9 + $0xb4] ss:$8 sps:$4 sm:$0xff]   ;;  %v1109_v57 = vld [vmem:[%s1315_s9 + $0xb0] ss:$8 sps:$4 sm:$0xff]  }
  0x34   : > { %v1110_v58 = vld [vmem:[%s1315_s9 + $0xc4] ss:$8 sps:$4 sm:$0xff]   ;;  %v1112_v59 = vld [vmem:[%s1315_s9 + $0xc0] ss:$8 sps:$4 sm:$0xff]   ;;  %v1113_v60 = vld [vmem:[%s1315_s9 + $0xd4] ss:$8 sps:$4 sm:$0xff]  }
  0x35   : > { %v1115_v61 = vld [vmem:[%s1315_s9 + $0xd0] ss:$8 sps:$4 sm:$0xff]   ;;  %v1116_v62 = vld [vmem:[%s1315_s9 + $0xe4] ss:$8 sps:$4 sm:$0xff]   ;;  %v1118_v63 = vld [vmem:[%s1315_s9 + $0xe0] ss:$8 sps:$4 sm:$0xff]  }
  0x36   : > { %655 = vmatpush1.bf16.msra.mxu0 %v1082_v39  ;;  %1020 = vmatpush1.bf16.msra.mxu1 %v1082_v39  ;;  %v1119_v0 = vld [vmem:[%s1315_s9 + $0xf4] ss:$8 sps:$4 sm:$0xff]   ;;  %v1121_v1 = vld [vmem:[%s1315_s9 + $0xf0] ss:$8 sps:$4 sm:$0xff]   ;;  %s1394_s20 = smov (!%p408_p11, %s950_s20), 3  ;;  %v734_v6 = vsub.s32 0, %v733_v5 }
  0x37   : > { %656 = vmatprep.subr.bf16.mxu0 %v1083_v40  ;;  %1005 = vmatprep.subr.bf16.mxu1 %v1083_v40  ;;  %s410_s25 = scalar_lea.vmem %s1384_s2, %s1394_s20  ;;  %v738_v8 = vsub.s32 1, %v733_v5  ;;  %s949_s26 = sshll.u32 %s357_s30, 5 }
  0x38   : > { %v730_v7 = vld [vmem:[%s410_s25] sm:$0x3]  ;;  %s392_s27 = scalar_lea.vmem [#allocation4], %s949_s26  ;;  %s1001_s12 = sshll.u32 (%p1223_p6), %s1158_s14, 3 }
  0x39   : > { %v735_v9 = vrot.slane %v730_v7, %v734_v6  ;;  %v739_v10 = vrot.slane %v730_v7, %v738_v8  ;;  %s790_s30 = scalar_lea.vmem (%p1223_p6), %s1385_s3, %s1001_s12 }
  0x3a   : > { %657 = vmatpush1.bf16.msra.mxu0 %v1085_v41  ;;  %1021 = vmatpush1.bf16.msra.mxu1 %v1085_v41 }
  0x3b   : > { %658 = vmatprep.subr.bf16.mxu0 %v1086_v42  ;;  %1006 = vmatprep.subr.bf16.mxu1 %v1086_v42 }
  0x3e   : > { %659 = vmatpush1.bf16.msra.mxu0 %v1088_v43  ;;  %1022 = vmatpush1.bf16.msra.mxu1 %v1088_v43 }
  0x3f   : > { %660 = vmatprep.subr.bf16.mxu0 %v1089_v44  ;;  %1007 = vmatprep.subr.bf16.mxu1 %v1089_v44 }
  0x42   : > { %661 = vmatpush1.bf16.msra.mxu0 %v1091_v45  ;;  %1023 = vmatpush1.bf16.msra.mxu1 %v1091_v45 }
  0x43   : > { %662 = vmatprep.subr.bf16.mxu0 %v1092_v46  ;;  %1008 = vmatprep.subr.bf16.mxu1 %v1092_v46 }
  0x46   : > { %663 = vmatpush1.bf16.msra.mxu0 %v1094_v47  ;;  %1024 = vmatpush1.bf16.msra.mxu1 %v1094_v47 }
  0x47   : > { %664 = vmatprep.subr.bf16.mxu0 %v1095_v48  ;;  %1009 = vmatprep.subr.bf16.mxu1 %v1095_v48 }
  0x4a   : > { %665 = vmatpush1.bf16.msra.mxu0 %v1097_v49  ;;  %1025 = vmatpush1.bf16.msra.mxu1 %v1097_v49 }
  0x4b   : > { %666 = vmatprep.subr.bf16.mxu0 %v1098_v50  ;;  %1010 = vmatprep.subr.bf16.mxu1 %v1098_v50 }
  0x4e   : > { %667 = vmatpush1.bf16.msra.mxu0 %v1100_v51  ;;  %1026 = vmatpush1.bf16.msra.mxu1 %v1100_v51 }
  0x4f   : > { %668 = vmatprep.subr.bf16.mxu0 %v1101_v52  ;;  %1011 = vmatprep.subr.bf16.mxu1 %v1101_v52 }
  0x52   : > { %669 = vmatpush1.bf16.msra.mxu0 %v1103_v53  ;;  %1027 = vmatpush1.bf16.msra.mxu1 %v1103_v53 }
  0x53   : > { %670 = vmatprep.subr.bf16.mxu0 %v1104_v54  ;;  %1012 = vmatprep.subr.bf16.mxu1 %v1104_v54 }
  0x56   : > { %671 = vmatpush1.bf16.msra.mxu0 %v1106_v55  ;;  %1028 = vmatpush1.bf16.msra.mxu1 %v1106_v55 }
  0x57   : > { %672 = vmatprep.subr.bf16.mxu0 %v1107_v56  ;;  %1013 = vmatprep.subr.bf16.mxu1 %v1107_v56 }
  0x5a   : > { %673 = vmatpush1.bf16.msra.mxu0 %v1109_v57  ;;  %1029 = vmatpush1.bf16.msra.mxu1 %v1109_v57 }
  0x5b   : > { %674 = vmatprep.subr.bf16.mxu0 %v1110_v58  ;;  %1014 = vmatprep.subr.bf16.mxu1 %v1110_v58 }
  0x5e   : > { %675 = vmatpush1.bf16.msra.mxu0 %v1112_v59  ;;  %1030 = vmatpush1.bf16.msra.mxu1 %v1112_v59 }
  0x5f   : > { %676 = vmatprep.subr.bf16.mxu0 %v1113_v60  ;;  %1015 = vmatprep.subr.bf16.mxu1 %v1113_v60 }
  0x62   : > { %677 = vmatpush1.bf16.msra.mxu0 %v1115_v61  ;;  %1031 = vmatpush1.bf16.msra.mxu1 %v1115_v61 }
  0x63   : > { %678 = vmatprep.subr.bf16.mxu0 %v1116_v62  ;;  %1016 = vmatprep.subr.bf16.mxu1 %v1116_v62 }
  0x66   : > { %679 = vmatpush1.bf16.msra.mxu0 %v1118_v63  ;;  %1032 = vmatpush1.bf16.msra.mxu1 %v1118_v63 }
  0x67   : > { %680 = vmatprep.subr.bf16.mxu0 %v1119_v0  ;;  %1017 = vmatprep.subr.bf16.mxu1 %v1119_v0 }
  0x6a   : > { %681 = vmatpush1.bf16.msra.mxu0 %v1121_v1  ;;  %1033 = vmatpush1.bf16.msra.mxu1 %v1121_v1 }
  0x6d   : > { %683 = vmatmul.mubr.bf16.vlgmr.msra.gmra.mrb[0].mxu0 %v1122_v2  ;;  %693 = vmatmul.mubr.bf16.vlgmr.msra.gmra.mrb[0].mxu1 %v1125_v3 }
 0x140   : > { %v684_v11 = vpop.f32.mrb[0].mxu0  ;;  %v694_v12 = vpop.f32.mrb[0].mxu1 }
 0x141   : > { %v742_v13 = vadd.f32 %v735_v9, %v684_v11  ;;  %v746_v14 = vadd.f32 %v735_v9, %v694_v12  ;;  %v686_v15 = vpop.f32.mrb[1].mxu0  ;;  %v696_v16 = vpop.f32.mrb[1].mxu1 }
 0x142   : > { %v743_v17 = vadd.f32 %v739_v10, %v686_v15  ;;  %v747_v18 = vadd.f32 %v739_v10, %v696_v16  ;;  %v688_v19 = vpop.f32.mrb[2].mxu0  ;;  %v698_v20 = vpop.f32.mrb[2].mxu1  ;;  %784 = sbr.rel (!%p1223_p6) target bundleno = 337 (0x151), region = 82 }
 0x143   : > { %v744_v21 = vadd.f32 %v735_v9, %v688_v19  ;;  %v748_v22 = vadd.f32 %v735_v9, %v698_v20  ;;  %v690_v23 = vpop.f32.mrb[3].mxu0  ;;  %v700_v24 = vpop.f32.mrb[3].mxu1 }
 0x144   : > { %v997_v25 = vpack.c.bf16 %v743_v17, %v742_v13  ;;  %v999_v26 = vpack.c.bf16 %v747_v18, %v746_v14  ;;  %v745_v27 = vadd.f32 %v739_v10, %v690_v23  ;;  %v749_v28 = vadd.f32 %v739_v10, %v700_v24 }
 0x146   : > { %774 = vst [vmem:[%s392_s27] sm:$0xff] %v997_v25  ;;  %776 = vst [vmem:[%s392_s27 + $0x10] sm:$0xff] %v999_v26  ;;  %v998_v29 = vpack.c.bf16 %v745_v27, %v744_v21  ;;  %v1000_v30 = vpack.c.bf16 %v749_v28, %v748_v22 }
 0x148   : > { %775 = vst [vmem:[%s392_s27 + $0x8] sm:$0xff] %v998_v29  ;;  %777 = vst [vmem:[%s392_s27 + $0x18] sm:$0xff] %v1000_v30 }
 0x14d   : > { %v824_v31 = vld [vmem:[%s392_s27] sm:$0xff]  ;;  %v828_v33 = vld [vmem:[%s392_s27 + $0x10] sm:$0xff] }
 0x14e   : > { %825 = vst [vmem:[%s790_s30] sm:$0xff] %v824_v31  ;;  %829 = vst [vmem:[%s790_s30 + $0x20] sm:$0xff] %v828_v33 }
 0x14f   : > { %v826_v32 = vld [vmem:[%s392_s27 + $0x8] sm:$0xff]  ;;  %v830_v34 = vld [vmem:[%s392_s27 + $0x18] sm:$0xff] }
 0x150   : > { %827 = vst [vmem:[%s790_s30 + $0x10] sm:$0xff] %v826_v32  ;;  %831 = vst [vmem:[%s790_s30 + $0x30] sm:$0xff] %v830_v34 }
 0x151 PF: > { %s13_s16 = sadd.s32 1, %s1166_s16   ;;  %s1387_s12 = smov %s1154_s13 }
 0x152   : > { %p10_p12 = scmp.ge.s32.totalorder %s13_s16, 4   ;;  %s1388_s13 = smov %s1228_s22 }
 0x153   : > { %s1389_s14 = smov %s1162_s15  ;;  %s1390_s15 = smov %s1392_s17 }
 0x154   :  { %12 = sbr.rel (!%p10_p12) target bundleno = 3 (0x3), region = 157 }

// kernel: _lambda_.40
= control target key start
LH: loop header
LB: loop body
LE: loop exit
PB: predicated region body
PF: predicated region fallthrough
CT: control target
= control target key end

     0   :  { %s1110_s15 = smov 0   ;;  %s1112_s16 = smov 0   ;;  %s1249_s0 = inlined_call_operand.vmem [shape: bf16[32,128], index: 0, kind: input, shape index: {}]   ;;  %s1250_s1 = inlined_call_operand.vmem [shape: bf16[128,512], index: 1, kind: input, shape index: {}]   ;;  %s1251_s2 = inlined_call_operand.vmem [shape: f32[1,512], index: 2, kind: input, shape index: {}]   ;;  %s1252_s3 = inlined_call_operand.vmem [shape: bf16[32,512], index: 3, kind: input, shape index: {}]   ;;  %s1253_s4 = inlined_call_operand.vmem [shape: bf16[32,512], index: 4, kind: output, shape index: {}]  }
   0x1   :  { %s1114_s17 = smov 0   ;;  %s1116_s18 = smov 0  }
   0x2   :  { %s1118_s19 = smov 0  }
   0x3 LB: > { %s29_s20 = sadd.s32 1, %s1078_s18  ;;  %s911_s21 = sadd.s32 4294967295, %s1082_s19   ;;  %s1082_s19 = sphi %s1118_s19, %s14_s19   ;;  %s1078_s18 = sphi %s1116_s18, %s1259_s18   ;;  %s1074_s17 = sphi %s1114_s17, %s1258_s17   ;;  %s1070_s16 = sphi %s1112_s16, %s1257_s16   ;;  %s1066_s15 = sphi %s1110_s15, %s1256_s15  }
   0x4   : > { %p31_p0 = scmp.ge.s32.totalorder %s29_s20, 2  ;;  %p77_p1 = scmp.ne.s32.totalorder %s1070_s16, %s1066_s15 }
   0x5   : > { %p78_p2 = scmp.eq.s32.totalorder %s1082_s19, 0  ;;  %p163_p4 = scmp.eq.s32.totalorder %s911_s21, 1 }
   0x6   : > { %s1261_s20 = smov (%p31_p0, %s29_s20), 0  ;;  %s70_s24 = sadd.s32 1, %s1070_s16 }
   0x7   : > { %p1142_p3 = por %p78_p2, %p77_p1  ;;  %s66_s23 = ssub.s32 %s1078_s18, %s1261_s20 }
   0x8   : > { %p68_p5 = scmp.eq.s32.totalorder %s66_s23, 0  ;;  %p1149_p6 = por %p163_p4, %p77_p1 }
   0x9   : > { %p915_p7 = scmp.ge.s32.totalorder %s1082_s19, 2 }
   0xa   : > { %s1154_s26 = scalar_select %p68_p5, %s1070_s16, %s70_s24  }
   0xb   : > { %197 = sbr.rel (%p915_p7) target bundleno = 37 (0x25), region = 20 }
  0x12   : > { %200 = sbr.rel (!%p1142_p3) target bundleno = 30 (0x1e), region = 24  ;;  %s202_s27 = sand.u32 (%p1142_p3), 1, %s1070_s16  }
  0x13   : > { %s954_s28 = sshll.u32 (%p1142_p3), %s1078_s18, 3  ;;  %s916_s29 = sshll.u32 (%p1142_p3), %s202_s27, 7 }
  0x14   : > { %s1164_s6 = scalar_lea.vmem (%p1142_p3), %s1250_s1, %s954_s28  ;;  %s204_s7 = scalar_lea.vmem (%p1142_p3), [#allocation3], %s916_s29 }
  0x15   : > { %v268_v0 = vld [vmem:[%s1164_s6] sm:$0xff] (%p1142_p3)  ;;  %v270_v1 = vld [vmem:[%s1164_s6 + $0x10] sm:$0xff] (%p1142_p3) }
  0x16   : > { %v272_v2 = vld [vmem:[%s1164_s6 + $0x20] sm:$0xff] (%p1142_p3)  ;;  %269 = vst [vmem:[%s204_s7] sm:$0xff] (%p1142_p3), %v268_v0  ;;  %271 = vst [vmem:[%s204_s7 + $0x8] sm:$0xff] (%p1142_p3), %v270_v1  ;;  %v274_v3 = vld [vmem:[%s1164_s6 + $0x30] sm:$0xff] (%p1142_p3) }
  0x17   : > { %273 = vst [vmem:[%s204_s7 + $0x10] sm:$0xff] (%p1142_p3), %v272_v2  ;;  %v276_v4 = vld [vmem:[%s1164_s6 + $0x40] sm:$0xff] (%p1142_p3)  ;;  %v278_v5 = vld [vmem:[%s1164_s6 + $0x50] sm:$0xff] (%p1142_p3)  ;;  %275 = vst [vmem:[%s204_s7 + $0x18] sm:$0xff] (%p1142_p3), %v274_v3 }
  0x18   : > { %277 = vst [vmem:[%s204_s7 + $0x20] sm:$0xff] (%p1142_p3), %v276_v4  ;;  %279 = vst [vmem:[%s204_s7 + $0x28] sm:$0xff] (%p1142_p3), %v278_v5  ;;  %v280_v6 = vld [vmem:[%s1164_s6 + $0x60] sm:$0xff] (%p1142_p3)  ;;  %v282_v7 = vld [vmem:[%s1164_s6 + $0x70] sm:$0xff] (%p1142_p3) }
  0x19   : > { %v284_v8 = vld [vmem:[%s1164_s6 + $0x80] sm:$0xff]  ;;  %281 = vst [vmem:[%s204_s7 + $0x30] sm:$0xff] %v280_v6  ;;  %283 = vst [vmem:[%s204_s7 + $0x38] sm:$0xff] %v282_v7  ;;  %v286_v9 = vld [vmem:[%s1164_s6 + $0x90] sm:$0xff] }
  0x1a   : > { %285 = vst [vmem:[%s204_s7 + $0x40] sm:$0xff] %v284_v8  ;;  %v288_v10 = vld [vmem:[%s1164_s6 + $0xa0] sm:$0xff]  ;;  %v290_v11 = vld [vmem:[%s1164_s6 + $0xb0] sm:$0xff]  ;;  %287 = vst [vmem:[%s204_s7 + $0x48] sm:$0xff] %v286_v9 }
  0x1b   : > { %289 = vst [vmem:[%s204_s7 + $0x50] sm:$0xff] %v288_v10  ;;  %291 = vst [vmem:[%s204_s7 + $0x58] sm:$0xff] %v290_v11  ;;  %v292_v12 = vld [vmem:[%s1164_s6 + $0xc0] sm:$0xff]  ;;  %v294_v13 = vld [vmem:[%s1164_s6 + $0xd0] sm:$0xff] }
  0x1c   : > { %v296_v14 = vld [vmem:[%s1164_s6 + $0xe0] sm:$0xff]  ;;  %293 = vst [vmem:[%s204_s7 + $0x60] sm:$0xff] %v292_v12  ;;  %295 = vst [vmem:[%s204_s7 + $0x68] sm:$0xff] %v294_v13  ;;  %v298_v15 = vld [vmem:[%s1164_s6 + $0xf0] sm:$0xff] }
  0x1d   : > { %297 = vst [vmem:[%s204_s7 + $0x70] sm:$0xff] %v296_v14  ;;  %299 = vst [vmem:[%s204_s7 + $0x78] sm:$0xff] %v298_v15 }
  0x1e PF: > { %313 = sbr.rel (!%p1142_p3) target bundleno = 37 (0x25), region = 66  ;;  %s315_s8 = sand.u32 (%p1142_p3), 1, %s1070_s16  }
  0x1f   : > { %s955_s9 = sshll.u32 (%p1142_p3), %s1078_s18, 3  ;;  %s919_s10 = sshll.u32 (%p1142_p3), %s315_s8, 5 }
  0x20   : > { %s323_s13 = scalar_lea.vmem (%p1142_p3), %s1252_s3, %s955_s9  ;;  %s317_s14 = scalar_lea.vmem (%p1142_p3), [#allocation4], %s919_s10 }
  0x21   : > { %v357_v16 = vld [vmem:[%s323_s13] sm:$0xff] (%p1142_p3)  ;;  %v359_v17 = vld [vmem:[%s323_s13 + $0x10] sm:$0xff] (%p1142_p3) }
  0x22   : > { %v361_v18 = vld [vmem:[%s323_s13 + $0x20] sm:$0xff] (%p1142_p3)  ;;  %358 = vst [vmem:[%s317_s14] sm:$0xff] (%p1142_p3), %v357_v16  ;;  %360 = vst [vmem:[%s317_s14 + $0x8] sm:$0xff] (%p1142_p3), %v359_v17  ;;  %v363_v19 = vld [vmem:[%s323_s13 + $0x30] sm:$0xff] (%p1142_p3) }
  0x23   : > { %362 = vst [vmem:[%s317_s14 + $0x10] sm:$0xff] (%p1142_p3), %v361_v18  ;;  %364 = vst [vmem:[%s317_s14 + $0x18] sm:$0xff] (%p1142_p3), %v363_v19 }
  0x25 PF: > { %p922_p8 = scmp.ge.s32.totalorder %s1082_s19, 1  ;;  %p369_p9 = scmp.lt.s32.totalorder %s1082_s19, 3 }
  0x27   : > { %p370_p10 = pnand %p922_p8, %p369_p9 }
  0x28   : > { %s376_s21 = sand.u32 (!%p370_p10), 1, %s1066_s15   ;;  %v1084_v20 = vmov (!%p370_p10), 0   ;;  %v1042_v37 = vld [vmem:[%s1249_s0] sm:$0xff] (!%p370_p10)   ;;  %v1043_v38 = vld [vmem:[%s1249_s0 + $0x8] sm:$0xff] (!%p370_p10)   ;;  %s926_s30 = sshll.u32 (!%p370_p10), %s1074_s17, 1  ;;  %v658_v39 = vlaneseq (!%p370_p10) }
  0x29   : > { %373 = sbr.rel (%p370_p10) target bundleno = 308 (0x134), region = 104  ;;  %s923_s22 = sshll.u32 (!%p370_p10), %s376_s21, 7  ;;  %608 = vmatprep.mubr.bf16.mxu0 (!%p370_p10), %v1084_v20  ;;  %618 = vmatprep.mubr.bf16.mxu1 (!%p370_p10), %v1084_v20 }
  0x2a   : > { %s1194_s23 = scalar_lea.vmem (!%p370_p10), [#allocation3], %s923_s22  ;;  %p435_p11 = scmp.lt.s32.totalorder (!%p370_p10), %s926_s30, 3  ;;  %v659_v40 = vshrl.u32 (!%p370_p10), %v658_v39, 7 }
  0x2b   : > { %v1018_v21 = vld [vmem:[%s1194_s23 + $0x4] ss:$8 sps:$4 sm:$0xff] (!%p370_p10)   ;;  %v1020_v22 = vld [vmem:[%s1194_s23] ss:$8 sps:$4 sm:$0xff] (!%p370_p10)   ;;  %v1021_v23 = vld [vmem:[%s1194_s23 + $0x14] ss:$8 sps:$4 sm:$0xff] (!%p370_p10)  }
  0x2c   : > { %576 = vmatprep.subr.bf16.mxu0 (!%p370_p10), %v1018_v21  ;;  %961 = vmatprep.subr.bf16.mxu1 (!%p370_p10), %v1018_v21  ;;  %v1023_v24 = vld [vmem:[%s1194_s23 + $0x10] ss:$8 sps:$4 sm:$0xff] (!%p370_p10)   ;;  %v1024_v25 = vld [vmem:[%s1194_s23 + $0x24] ss:$8 sps:$4 sm:$0xff] (!%p370_p10)   ;;  %v1026_v26 = vld [vmem:[%s1194_s23 + $0x20] ss:$8 sps:$4 sm:$0xff] (!%p370_p10)  }
  0x2d   : > { %577 = vmatpush1.bf16.msra.mxu0 (!%p370_p10), %v1020_v22  ;;  %969 = vmatpush1.bf16.msra.mxu1 (!%p370_p10), %v1020_v22  ;;  %v1027_v27 = vld [vmem:[%s1194_s23 + $0x34] ss:$8 sps:$4 sm:$0xff] (!%p370_p10)   ;;  %v1029_v28 = vld [vmem:[%s1194_s23 + $0x30] ss:$8 sps:$4 sm:$0xff] (!%p370_p10)   ;;  %v1030_v29 = vld [vmem:[%s1194_s23 + $0x44] ss:$8 sps:$4 sm:$0xff] (!%p370_p10)  }
  0x2e   : > { %578 = vmatprep.subr.bf16.mxu0 (!%p370_p10), %v1021_v23  ;;  %962 = vmatprep.subr.bf16.mxu1 (!%p370_p10), %v1021_v23  ;;  %v1032_v30 = vld [vmem:[%s1194_s23 + $0x40] ss:$8 sps:$4 sm:$0xff] (!%p370_p10)   ;;  %v1033_v31 = vld [vmem:[%s1194_s23 + $0x54] ss:$8 sps:$4 sm:$0xff] (!%p370_p10)   ;;  %v1035_v32 = vld [vmem:[%s1194_s23 + $0x50] ss:$8 sps:$4 sm:$0xff] (!%p370_p10)  }
  0x2f   : > { %v1036_v33 = vld [vmem:[%s1194_s23 + $0x64] ss:$8 sps:$4 sm:$0xff] (!%p370_p10)   ;;  %v1038_v34 = vld [vmem:[%s1194_s23 + $0x60] ss:$8 sps:$4 sm:$0xff] (!%p370_p10)   ;;  %v1039_v35 = vld [vmem:[%s1194_s23 + $0x74] ss:$8 sps:$4 sm:$0xff] (!%p370_p10)  }
  0x30   : > { %v1041_v36 = vld [vmem:[%s1194_s23 + $0x70] ss:$8 sps:$4 sm:$0xff]   ;;  %s1263_s30 = smov (!%p435_p11, %s926_s30), 3  ;;  %s1221_s5 = sshll.u32 %s376_s21, 5  ;;  %v660_v41 = vsub.s32 0, %v659_v40  ;;  %v664_v43 = vsub.s32 1, %v659_v40 }
  0x31   : > { %579 = vmatpush1.bf16.msra.mxu0 %v1023_v24  ;;  %970 = vmatpush1.bf16.msra.mxu1 %v1023_v24  ;;  %s437_s8 = scalar_lea.vmem %s1251_s2, %s1263_s30  ;;  %s385_s9 = scalar_lea.vmem [#allocation4], %s1221_s5 }
  0x32   : > { %580 = vmatprep.subr.bf16.mxu0 %v1024_v25  ;;  %963 = vmatprep.subr.bf16.mxu1 %v1024_v25  ;;  %v656_v42 = vld [vmem:[%s437_s8] sm:$0x3]  ;;  %v678_v45 = vld [vmem:[%s385_s9 + $0x10] sm:$0xff]  ;;  %v677_v48 = vld [vmem:[%s385_s9 + $0x8] sm:$0xff]  ;;  %s422_s15 = scalar_lea.vmem [#allocation5], %s1221_s5  ;;  %s960_s10 = sshll.u32 (%p1149_p6), %s1074_s17, 3 }
  0x33   : > { %v676_v44 = vld [vmem:[%s385_s9] sm:$0xff]  ;;  %v661_v46 = vrot.slane %v656_v42, %v660_v41  ;;  %v665_v47 = vrot.slane %v656_v42, %v664_v43  ;;  %v679_v49 = vld [vmem:[%s385_s9 + $0x18] sm:$0xff]  ;;  %v684_v51 = vunpack.c.l.bf16 %v678_v45  ;;  %v685_v55 = vunpack.c.h.bf16 %v678_v45  ;;  %s744_s13 = scalar_lea.vmem (%p1149_p6), %s1253_s4, %s960_s10 }
  0x34   : > { %v680_v50 = vunpack.c.l.bf16 %v676_v44  ;;  %v681_v54 = vunpack.c.h.bf16 %v676_v44  ;;  %v682_v60 = vunpack.c.l.bf16 %v677_v48  ;;  %v686_v61 = vunpack.c.l.bf16 %v679_v49 }
  0x35   : > { %581 = vmatpush1.bf16.msra.mxu0 %v1026_v26  ;;  %971 = vmatpush1.bf16.msra.mxu1 %v1026_v26  ;;  %v683_v2 = vunpack.c.h.bf16 %v677_v48  ;;  %v687_v3 = vunpack.c.h.bf16 %v679_v49 }
  0x36   : > { %582 = vmatprep.subr.bf16.mxu0 %v1027_v27  ;;  %964 = vmatprep.subr.bf16.mxu1 %v1027_v27 }
  0x39   : > { %583 = vmatpush1.bf16.msra.mxu0 %v1029_v28  ;;  %972 = vmatpush1.bf16.msra.mxu1 %v1029_v28 }
  0x3a   : > { %584 = vmatprep.subr.bf16.mxu0 %v1030_v29  ;;  %965 = vmatprep.subr.bf16.mxu1 %v1030_v29 }
  0x3d   : > { %585 = vmatpush1.bf16.msra.mxu0 %v1032_v30  ;;  %973 = vmatpush1.bf16.msra.mxu1 %v1032_v30 }
  0x3e   : > { %586 = vmatprep.subr.bf16.mxu0 %v1033_v31  ;;  %966 = vmatprep.subr.bf16.mxu1 %v1033_v31 }
  0x41   : > { %587 = vmatpush1.bf16.msra.mxu0 %v1035_v32  ;;  %974 = vmatpush1.bf16.msra.mxu1 %v1035_v32 }
  0x42   : > { %588 = vmatprep.subr.bf16.mxu0 %v1036_v33  ;;  %967 = vmatprep.subr.bf16.mxu1 %v1036_v33 }
  0x45   : > { %589 = vmatpush1.bf16.msra.mxu0 %v1038_v34  ;;  %975 = vmatpush1.bf16.msra.mxu1 %v1038_v34 }
  0x46   : > { %590 = vmatprep.subr.bf16.mxu0 %v1039_v35  ;;  %968 = vmatprep.subr.bf16.mxu1 %v1039_v35 }
  0x49   : > { %591 = vmatpush1.bf16.msra.mxu0 %v1041_v36  ;;  %976 = vmatpush1.bf16.msra.mxu1 %v1041_v36 }
  0x4c   : > { %609 = vmatmul.mubr.bf16.vlgmr.msra.gmra.mrb[0].mxu0 %v1042_v37  ;;  %619 = vmatmul.mubr.bf16.vlgmr.msra.gmra.mrb[0].mxu1 %v1043_v38 }
 0x11f   : > { %v610_v52 = vpop.f32.mrb[0].mxu0  ;;  %v620_v53 = vpop.f32.mrb[0].mxu1 }
 0x120   : > { %v668_v56 = vadd.f32 %v661_v46, %v610_v52  ;;  %v672_v57 = vadd.f32 %v661_v46, %v620_v53  ;;  %v612_v58 = vpop.f32.mrb[1].mxu0  ;;  %v622_v59 = vpop.f32.mrb[1].mxu1 }
 0x121   : > { %v669_v62 = vadd.f32 %v665_v47, %v612_v58  ;;  %v673_v63 = vadd.f32 %v665_v47, %v622_v59  ;;  %v614_v0 = vpop.f32.mrb[2].mxu0  ;;  %v624_v1 = vpop.f32.mrb[2].mxu1 }
 0x122   : > { %v688_v4 = vadd.f32 %v680_v50, %v668_v56  ;;  %v692_v5 = vadd.f32 %v684_v51, %v672_v57  ;;  %v670_v6 = vadd.f32 %v661_v46, %v614_v0  ;;  %v674_v7 = vadd.f32 %v661_v46, %v624_v1  ;;  %v616_v8 = vpop.f32.mrb[3].mxu0  ;;  %v626_v9 = vpop.f32.mrb[3].mxu1 }
 0x123   : > { %v689_v10 = vadd.f32 %v681_v54, %v669_v62  ;;  %v693_v11 = vadd.f32 %v685_v55, %v673_v63  ;;  %v671_v12 = vadd.f32 %v665_v47, %v616_v8  ;;  %v675_v13 = vadd.f32 %v665_v47, %v626_v9 }
 0x124   : > { %v696_v14 = vmax.f32 %v688_v4, 0.0  ;;  %v700_v15 = vmax.f32 %v692_v5, 0.0  ;;  %v690_v16 = vadd.f32 %v682_v60, %v670_v6  ;;  %v694_v17 = vadd.f32 %v686_v61, %v674_v7 }
 0x125   : > { %v697_v18 = vmax.f32 %v689_v10, 0.0  ;;  %v701_v19 = vmax.f32 %v693_v11, 0.0  ;;  %v691_v20 = vadd.f32 %v683_v2, %v671_v12  ;;  %v695_v21 = vadd.f32 %v687_v3, %v675_v13  ;;  %738 = sbr.rel (!%p1149_p6) target bundleno = 308 (0x134), region = 124 }
 0x126   : > { %v698_v22 = vmax.f32 %v690_v16, 0.0  ;;  %v702_v23 = vmax.f32 %v694_v17, 0.0 }
 0x127   : > { %v956_v24 = vpack.c.bf16 %v697_v18, %v696_v14  ;;  %v958_v25 = vpack.c.bf16 %v701_v19, %v700_v15  ;;  %v699_v26 = vmax.f32 %v691_v20, 0.0  ;;  %v703_v27 = vmax.f32 %v695_v21, 0.0 }
 0x129   : > { %728 = vst [vmem:[%s422_s15] sm:$0xff] %v956_v24  ;;  %730 = vst [vmem:[%s422_s15 + $0x10] sm:$0xff] %v958_v25  ;;  %v957_v28 = vpack.c.bf16 %v699_v26, %v698_v22  ;;  %v959_v29 = vpack.c.bf16 %v703_v27, %v702_v23 }
 0x12b   : > { %729 = vst [vmem:[%s422_s15 + $0x8] sm:$0xff] %v957_v28  ;;  %731 = vst [vmem:[%s422_s15 + $0x18] sm:$0xff] %v959_v29 }
 0x130   : > { %v778_v30 = vld [vmem:[%s422_s15] sm:$0xff]  ;;  %v782_v32 = vld [vmem:[%s422_s15 + $0x10] sm:$0xff] }
 0x131   : > { %779 = vst [vmem:[%s744_s13] sm:$0xff] %v778_v30  ;;  %783 = vst [vmem:[%s744_s13 + $0x20] sm:$0xff] %v782_v32 }
 0x132   : > { %v780_v31 = vld [vmem:[%s422_s15 + $0x8] sm:$0xff]  ;;  %v784_v33 = vld [vmem:[%s422_s15 + $0x18] sm:$0xff] }
 0x133   : > { %781 = vst [vmem:[%s744_s13 + $0x10] sm:$0xff] %v780_v31  ;;  %785 = vst [vmem:[%s744_s13 + $0x30] sm:$0xff] %v784_v33 }
 0x134 PF: > { %s14_s19 = sadd.s32 1, %s1082_s19   ;;  %s1256_s15 = smov %s1070_s16 }
 0x135   : > { %p11_p12 = scmp.ge.s32.totalorder %s14_s19, 4   ;;  %s1257_s16 = smov %s1154_s26 }
 0x136   : > { %s1258_s17 = smov %s1078_s18  ;;  %s1259_s18 = smov %s1261_s20 }
 0x137   :  { %13 = sbr.rel (!%p11_p12) target bundleno = 3 (0x3), region = 207 }

// kernel: _lambda_.41
= control target key start
LH: loop header
LB: loop body
LE: loop exit
PB: predicated region body
PF: predicated region fallthrough
CT: control target
= control target key end

     0   :  { %s792_s1 = inlined_call_operand.vmem [shape: bf16[512,128], index: 1, kind: input, shape index: {}]   ;;  %s793_s0 = inlined_call_operand.vmem [shape: bf16[32,512], index: 0, kind: input, shape index: {}]   ;;  %s794_s2 = inlined_call_operand.vmem [shape: f32[1,128], index: 2, kind: input, shape index: {}]   ;;  %s795_s3 = inlined_call_operand.vmem [shape: bf16[32,128], index: 3, kind: output, shape index: {}]  }
   0x1   :  { %v599_v0 = vld [vmem:[%s792_s1 + $0x40] sm:$0xff]   ;;  %v603_v4 = vld [vmem:[%s792_s1 + $0x48] sm:$0xff]   ;;  %v607_v8 = vld [vmem:[%s792_s1 + $0x50] sm:$0xff]  }
   0x2   :  { %v600_v1 = vld [vmem:[%s792_s1 + $0xc0] sm:$0xff]   ;;  %543 = vmatprep.subr.bf16.mxu0 %v599_v0  ;;  %v604_v5 = vld [vmem:[%s792_s1 + $0xc8] sm:$0xff]   ;;  %v608_v9 = vld [vmem:[%s792_s1 + $0xd0] sm:$0xff]  }
   0x3   :  { %v601_v2 = vld [vmem:[%s792_s1] sm:$0xff]   ;;  %571 = vmatprep.subr.bf16.mxu1 %v600_v1  ;;  %v605_v6 = vld [vmem:[%s792_s1 + $0x8] sm:$0xff]   ;;  %v609_v10 = vld [vmem:[%s792_s1 + $0x10] sm:$0xff]  }
   0x4   :  { %v602_v3 = vld [vmem:[%s792_s1 + $0x80] sm:$0xff]   ;;  %544 = vmatpush3.bf16.msra.mxu0 %v601_v2  ;;  %v606_v7 = vld [vmem:[%s792_s1 + $0x88] sm:$0xff]   ;;  %v610_v11 = vld [vmem:[%s792_s1 + $0x90] sm:$0xff]  }
   0x5   :  { %572 = vmatpush3.bf16.msra.mxu1 %v602_v3  ;;  %545 = vmatprep.subr.bf16.mxu0 %v603_v4  ;;  %v611_v12 = vld [vmem:[%s792_s1 + $0x58] sm:$0xff]   ;;  %v615_v16 = vld [vmem:[%s792_s1 + $0x60] sm:$0xff]   ;;  %v619_v20 = vld [vmem:[%s792_s1 + $0x68] sm:$0xff]  }
   0x6   :  { %573 = vmatprep.subr.bf16.mxu1 %v604_v5  ;;  %v612_v13 = vld [vmem:[%s792_s1 + $0xd8] sm:$0xff]   ;;  %v616_v17 = vld [vmem:[%s792_s1 + $0xe0] sm:$0xff]   ;;  %v620_v21 = vld [vmem:[%s792_s1 + $0xe8] sm:$0xff]  }
   0x7   :  { %v613_v14 = vld [vmem:[%s792_s1 + $0x18] sm:$0xff]   ;;  %v617_v18 = vld [vmem:[%s792_s1 + $0x20] sm:$0xff]   ;;  %v621_v22 = vld [vmem:[%s792_s1 + $0x28] sm:$0xff]  }
   0x8   :  { %546 = vmatpush3.bf16.msra.mxu0 %v605_v6  ;;  %v614_v15 = vld [vmem:[%s792_s1 + $0x98] sm:$0xff]   ;;  %v618_v19 = vld [vmem:[%s792_s1 + $0xa0] sm:$0xff]   ;;  %v622_v23 = vld [vmem:[%s792_s1 + $0xa8] sm:$0xff]  }
   0x9   :  { %574 = vmatpush3.bf16.msra.mxu1 %v606_v7  ;;  %547 = vmatprep.subr.bf16.mxu0 %v607_v8  ;;  %v623_v24 = vld [vmem:[%s792_s1 + $0x70] sm:$0xff]   ;;  %v627_v28 = vld [vmem:[%s792_s1 + $0x78] sm:$0xff]   ;;  %v523_v49 = vld [vmem:[%s794_s2] ss:$0 sm:$0xff] }
   0xa   :  { %575 = vmatprep.subr.bf16.mxu1 %v608_v9  ;;  %v624_v25 = vld [vmem:[%s792_s1 + $0xf0] sm:$0xff]   ;;  %v628_v29 = vld [vmem:[%s792_s1 + $0xf8] sm:$0xff]  }
   0xb   :  { %v625_v26 = vld [vmem:[%s792_s1 + $0x30] sm:$0xff]   ;;  %v629_v30 = vld [vmem:[%s792_s1 + $0x38] sm:$0xff]  }
   0xc   :  { %548 = vmatpush3.bf16.msra.mxu0 %v609_v10  ;;  %v626_v27 = vld [vmem:[%s792_s1 + $0xb0] sm:$0xff]   ;;  %v630_v31 = vld [vmem:[%s792_s1 + $0xb8] sm:$0xff]  }
   0xd   :  { %576 = vmatpush3.bf16.msra.mxu1 %v610_v11  ;;  %549 = vmatprep.subr.bf16.mxu0 %v611_v12  ;;  %v631_v32 = vld [vmem:[%s793_s0] ss:$16 sps:$4 sm:$0xff]   ;;  %v633_v33 = vld [vmem:[%s793_s0 + $0x4] ss:$16 sps:$4 sm:$0xff]   ;;  %v634_v34 = vld [vmem:[%s793_s0 + $0x8] ss:$16 sps:$4 sm:$0xff]  }
   0xe   :  { %577 = vmatprep.subr.bf16.mxu1 %v612_v13  ;;  %v636_v35 = vld [vmem:[%s793_s0 + $0xc] ss:$16 sps:$4 sm:$0xff]   ;;  %363 = vmatprep.mubr.bf16.mxu0 %v633_v33  ;;  %v637_v36 = vld [vmem:[%s793_s0 + $0x24] ss:$16 sps:$4 sm:$0xff]   ;;  %v641_v38 = vld [vmem:[%s793_s0 + $0x20] ss:$16 sps:$4 sm:$0xff]  }
   0xf   :  { %412 = vmatprep.mubr.bf16.mxu1 %v636_v35  ;;  %v639_v37 = vld [vmem:[%s793_s0 + $0x2c] ss:$16 sps:$4 sm:$0xff]   ;;  %v642_v39 = vld [vmem:[%s793_s0 + $0x28] ss:$16 sps:$4 sm:$0xff]  }
  0x10   :  { %550 = vmatpush3.bf16.msra.mxu0 %v613_v14 }
  0x11   :  { %578 = vmatpush3.bf16.msra.mxu1 %v614_v15  ;;  %551 = vmatprep.subr.bf16.mxu0 %v615_v16 }
  0x12   :  { %579 = vmatprep.subr.bf16.mxu1 %v616_v17 }
  0x14   :  { %552 = vmatpush3.bf16.msra.mxu0 %v617_v18 }
  0x15   :  { %580 = vmatpush3.bf16.msra.mxu1 %v618_v19  ;;  %553 = vmatprep.subr.bf16.mxu0 %v619_v20 }
  0x16   :  { %581 = vmatprep.subr.bf16.mxu1 %v620_v21 }
  0x18   :  { %554 = vmatpush3.bf16.msra.mxu0 %v621_v22 }
  0x19   :  { %582 = vmatpush3.bf16.msra.mxu1 %v622_v23  ;;  %555 = vmatprep.subr.bf16.mxu0 %v623_v24 }
  0x1a   :  { %583 = vmatprep.subr.bf16.mxu1 %v624_v25 }
  0x1c   :  { %556 = vmatpush3.bf16.msra.mxu0 %v625_v26 }
  0x1d   :  { %584 = vmatpush3.bf16.msra.mxu1 %v626_v27  ;;  %557 = vmatprep.subr.bf16.mxu0 %v627_v28 }
  0x1e   :  { %585 = vmatprep.subr.bf16.mxu1 %v628_v29 }
  0x20   :  { %558 = vmatpush3.bf16.msra.mxu0 %v629_v30 }
  0x21   :  { %586 = vmatpush3.bf16.msra.mxu1 %v630_v31 }
  0x23   :  { %364 = vmatmul.mubr.bf16.vlgmr.msra.gmra.mrb[0].mxu0 %v631_v32 }
  0x24   :  { %413 = vmatmul.mubr.bf16.vlgmr.msra.gmra.mrb[0].mxu1 %v634_v34  ;;  %371 = vmatprep.mubr.bf16.mxu0 %v637_v36 }
  0x25   :  { %420 = vmatprep.mubr.bf16.mxu1 %v639_v37 }
  0x2b   :  { %372 = vmatmul.mubr.bf16.gmra.mrb[4].mxu0 %v641_v38 }
  0x2c   :  { %421 = vmatmul.mubr.bf16.gmra.mrb[4].mxu1 %v642_v39 }
  0xf6   :  { %v559_v40 = vpop.f32.mrb[0].mxu0 }
  0xf7   :  { %v587_v41 = vpop.f32.mrb[0].mxu1  ;;  %v560_v42 = vpop.f32.mrb[1].mxu0 }
  0xf8   :  { %v561_v43 = vadd.f32 %v560_v42, %v559_v40  ;;  %v588_v44 = vpop.f32.mrb[1].mxu1  ;;  %v562_v45 = vpop.f32.mrb[2].mxu0 }
  0xf9   :  { %v589_v46 = vadd.f32 %v588_v44, %v587_v41  ;;  %v590_v47 = vpop.f32.mrb[2].mxu1  ;;  %v563_v48 = vpop.f32.mrb[3].mxu0 }
  0xfa   :  { %v564_v50 = vadd.f32 %v563_v48, %v562_v45  ;;  %v591_v51 = vpop.f32.mrb[3].mxu1 }
  0xfb   :  { %v415_v52 = vadd.f32 %v589_v46, %v561_v43  ;;  %v592_v53 = vadd.f32 %v591_v51, %v590_v47 }
  0xfd   :  { %v451_v54 = vadd.f32 %v523_v49, %v415_v52  ;;  %v418_v55 = vadd.f32 %v592_v53, %v564_v50 }
  0xfe   :  { %v565_v56 = vpop.f32.mrb[4].mxu0 }
  0xff   :  { %v452_v57 = vadd.f32 %v523_v49, %v418_v55  ;;  %v593_v58 = vpop.f32.mrb[4].mxu1  ;;  %v566_v59 = vpop.f32.mrb[5].mxu0  ;;  %v455_v63 = vmax.f32 %v451_v54, 0.0 }
 0x100   :  { %v567_v60 = vadd.f32 %v566_v59, %v565_v56  ;;  %v594_v61 = vpop.f32.mrb[5].mxu1  ;;  %v568_v62 = vpop.f32.mrb[6].mxu0 }
 0x101   :  { %v456_v0 = vmax.f32 %v452_v57, 0.0  ;;  %v595_v1 = vadd.f32 %v594_v61, %v593_v58  ;;  %v596_v2 = vpop.f32.mrb[6].mxu1  ;;  %v569_v3 = vpop.f32.mrb[7].mxu0 }
 0x102   :  { %v570_v4 = vadd.f32 %v569_v3, %v568_v62  ;;  %v597_v5 = vpop.f32.mrb[7].mxu1 }
 0x103   :  { %v535_v6 = vpack.c.bf16 %v456_v0, %v455_v63  ;;  %v423_v7 = vadd.f32 %v595_v1, %v567_v60  ;;  %v598_v8 = vadd.f32 %v597_v5, %v596_v2 }
 0x105   :  { %536 = vst [vmem:[%s795_s3] sm:$0xff] %v535_v6   ;;  %v453_v9 = vadd.f32 %v523_v49, %v423_v7  ;;  %v426_v10 = vadd.f32 %v598_v8, %v570_v4 }
 0x107   :  { %v454_v11 = vadd.f32 %v523_v49, %v426_v10  ;;  %v457_v12 = vmax.f32 %v453_v9, 0.0 }
 0x109   :  { %v458_v13 = vmax.f32 %v454_v11, 0.0 }
 0x10b   :  { %v540_v14 = vpack.c.bf16 %v458_v13, %v457_v12 }
 0x10d   :  { %542 = vst [vmem:[%s795_s3 + $0x8] sm:$0xff] %v540_v14  }

</bundles_post_ra>
